<compile_context>
chip_gen: v7x
topology: tpu7x:2x2x1
jax: 0.10.0
libtpu: 0.0.40
codegen_flags: <defaults>
</compile_context>

<pallas_src>
import functools

import jax
import jax.numpy as jnp
from jax import lax
from jax.experimental import pallas as pl
from jax.experimental.pallas import tpu as pltpu

_BN_EPS = 1e-5
_LANE = 128


def _round_up(x, m):
    return (x + m - 1) // m * m


# ----------------------------------------------------------------------------
# In-kernel helpers.
# ----------------------------------------------------------------------------
def _zero_halo(p_ref, hp, wp):
    """Zero only the 1-element halo border of a (hp+2, wp+2, C) scratch."""
    c = p_ref.shape[-1]
    zrow = jnp.zeros((wp + 2, c), p_ref.dtype)
    zcol = jnp.zeros((hp + 2, c), p_ref.dtype)
    p_ref[0, :, :] = zrow
    p_ref[hp + 1, :, :] = zrow
    p_ref[:, 0, :] = zcol
    p_ref[:, wp + 1, :] = zcol


def _conv3x3_accum(p_ref, w_ref, s_ref, b_ref, acc_ref, hp, wp):
    """3x3 'same' conv over the halo-padded scratch as 9 accumulated MXU
    matmuls (per-tap K = C, no im2col concat); folded-BN + ReLU epilogue is
    applied once on the f32 accumulator."""
    c = w_ref.shape[1]
    t = 0
    for dy in range(3):
        for dx in range(3):
            # NOTE: the dx-shifted slice is sublane-misaligned; acceptable at
            # these tile sizes (see row-tiling TODO for the aligned variant).
            tap = p_ref[dy:dy + hp, dx:dx + wp, :].reshape(hp * wp, c)
            contrib = jnp.dot(tap, w_ref[t],
                              preferred_element_type=jnp.float32)
            if t == 0:
                acc_ref[...] = contrib          # first tap initializes (no zero fill)
            else:
                acc_ref[...] += contrib
            t += 1
    return jnp.maximum(acc_ref[...] * s_ref[...] + b_ref[...], 0.0)


# ----------------------------------------------------------------------------
# Fused kernel: maxpool2x2 -> conv3x3+BN+ReLU -> conv3x3+BN+ReLU (one image).
# ----------------------------------------------------------------------------
def _down_fused_kernel(x_ref, w1_ref, s1_ref, b1_ref, w2_ref, s2_ref, b2_ref,
                       o_ref, p1_ref, p2_ref, acc1_ref, acc2_ref,
                       *, hp, wp, cin):
    cmid = p2_ref.shape[-1]

    # ---- 2x2 max pool ------------------------------------------------------
    # x_ref block is (1, Hp, 2, Wp, 2*Cin): the two pooled rows sit on an outer
    # axis, the two pooled columns sit side by side in the lane dim, so the
    # pool is plain VPU max + static lane slices (no strided access).
    x = x_ref[...]
    rows = jnp.maximum(x[0, :, 0], x[0, :, 1])              # (Hp, Wp, 2*Cin)
    pool = jnp.maximum(rows[..., :cin], rows[..., cin:])    # (Hp, Wp, Cin)

    # Zero only the halo borders; interiors are fully overwritten below.
    _zero_halo(p1_ref, hp, wp)
    _zero_halo(p2_ref, hp, wp)
    p1_ref[1:hp + 1, 1:wp + 1, :] = pool.astype(p1_ref.dtype)

    # ---- conv1 + BN + ReLU (per-tap MXU accumulation) ------------------------
    y1 = _conv3x3_accum(p1_ref, w1_ref, s1_ref, b1_ref, acc1_ref, hp, wp)
    p2_ref[1:hp + 1, 1:wp + 1, :] = y1.reshape(hp, wp, cmid).astype(p2_ref.dtype)

    # ---- conv2 + BN + ReLU ----------------------------------------------------
    y2 = _conv3x3_accum(p2_ref, w2_ref, s2_ref, b2_ref, acc2_ref, hp, wp)

    # Lane-dense (multiple-of-128 channels) output store.
    o_ref[...] = y2.reshape(1, hp * wp, y2.shape[-1]).astype(o_ref.dtype)


# ----------------------------------------------------------------------------
# Parameter prep (trace-time; tiny tensors).
# ----------------------------------------------------------------------------
def _prep_weight(w_oihw, cout_pad):
    """OIHW conv weight -> (9, cin, cout_pad) bf16 (cin left unpadded)."""
    cout, cin = w_oihw.shape[0], w_oihw.shape[1]
    w = jnp.transpose(w_oihw, (2, 3, 1, 0))                  # OIHW -> HWIO
    w = jnp.pad(w, ((0, 0), (0, 0), (0, 0), (0, cout_pad - cout)))
    return w.reshape(9, cin, cout_pad).astype(jnp.bfloat16)


def _fold_bn(conv_bias, gamma, beta, mean, var, cpad):
    scale = gamma / jnp.sqrt(var + _BN_EPS)
    shift = beta + (conv_bias - mean) * scale
    c = scale.shape[0]
    scale = jnp.pad(scale, (0, cpad - c)).reshape(1, cpad)
    shift = jnp.pad(shift, (0, cpad - c)).reshape(1, cpad)
    return scale.astype(jnp.float32), shift.astype(jnp.float32)


# ----------------------------------------------------------------------------
# Wrappers.
# ----------------------------------------------------------------------------
def down_forward_nhwc(x_nhwc, params):
    """NHWC in, NHWC out — no edge transposes (preferred entry point)."""
    N, H, W, cin = x_nhwc.shape
    assert H % 2 == 0 and W % 2 == 0, "2x2 max pool expects even H and W"
    hp, wp = H // 2, W // 2
    cmid = params["w1"].shape[0]
    cout = params["w2"].shape[0]
    coutp = _round_up(cout, _LANE)

    # Free (metadata-only) regroup so the kernel pools without strided access:
    # (N, H, W, C) -> (N, Hp, 2, Wp, 2*C).
    x5 = x_nhwc.reshape(N, hp, 2, wp, 2 * cin)

    w1 = _prep_weight(params["w1"], cmid)                    # (9, cin, cmid)
    s1, b1 = _fold_bn(params["b1"], params["g1"], params["be1"],
                      params["m1"], params["v1"], cmid)
    w2 = _prep_weight(params["w2"], coutp)                   # (9, cmid, coutp)
    s2, b2 = _fold_bn(params["b2"], params["g2"], params["be2"],
                      params["m2"], params["v2"], coutp)

    itemsize = jnp.dtype(x_nhwc.dtype).itemsize
    flops = 2 * N * hp * wp * 9 * (cin * cmid + cmid * coutp)
    bytes_accessed = (N * H * W * cin * itemsize
                      + N * hp * wp * coutp * itemsize
                      + (w1.size + w2.size) * 2
                      + (s1.size + b1.size + s2.size + b2.size) * 4)

    kernel = functools.partial(_down_fused_kernel, hp=hp, wp=wp, cin=cin)
    out = pl.pallas_call(
        kernel,
        out_shape=jax.ShapeDtypeStruct((N, hp * wp, coutp), x_nhwc.dtype),
        grid=(N,),
        in_specs=[
            pl.BlockSpec((1, hp, 2, wp, 2 * cin), lambda n: (n, 0, 0, 0, 0)),
            pl.BlockSpec((9, cin, cmid), lambda n: (0, 0, 0)),
            pl.BlockSpec((1, cmid), lambda n: (0, 0)),
            pl.BlockSpec((1, cmid), lambda n: (0, 0)),
            pl.BlockSpec((9, cmid, coutp), lambda n: (0, 0, 0)),
            pl.BlockSpec((1, coutp), lambda n: (0, 0)),
            pl.BlockSpec((1, coutp), lambda n: (0, 0)),
        ],
        out_specs=pl.BlockSpec((1, hp * wp, coutp), lambda n: (n, 0, 0)),
        scratch_shapes=[
            pltpu.VMEM((hp + 2, wp + 2, cin), jnp.bfloat16),    # halo'd pool
            pltpu.VMEM((hp + 2, wp + 2, cmid), jnp.bfloat16),   # halo'd mid act
            pltpu.VMEM((hp * wp, cmid), jnp.float32),           # conv1 f32 acc
            pltpu.VMEM((hp * wp, coutp), jnp.float32),          # conv2 f32 acc
        ],
        compiler_params=pltpu.CompilerParams(
            dimension_semantics=("parallel",),
            vmem_limit_bytes=32 * 1024 * 1024),
        cost_estimate=pl.CostEstimate(flops=flops, transcendentals=0,
                                      bytes_accessed=bytes_accessed),
    )(x5, w1, s1, b1, w2, s2, b2)

    # No-op slice when cout % 128 == 0 (typical UNet); strips toy padding here.
    return out[:, :, :cout].reshape(N, hp, wp, cout)


def down_forward(x_nchw, params):
    """PyTorch-semantics forward: NCHW in, NCHW out (edge transposes only)."""
    x = jnp.transpose(x_nchw, (0, 2, 3, 1))                  # -> NHWC
    y = down_forward_nhwc(x, params)
    return jnp.transpose(y, (0, 3, 1, 2))                    # -> NCHW


# ----------------------------------------------------------------------------
# Deterministic synthetic parameters.
# ----------------------------------------------------------------------------
def init_down_params(key, in_channels, out_channels):
    mid_channels = out_channels  # DoubleConv default
    ks = jax.random.split(key, 12)

    def conv_layer(kw, kb, cin, cout):
        w = jax.random.normal(kw, (cout, cin, 3, 3), jnp.float32) * 0.1  # OIHW
        b = jax.random.normal(kb, (cout,), jnp.float32) * 0.1
        return w, b

    def bn_layer(kg, kb, km, c):
        gamma = 1.0 + 0.1 * jax.random.normal(kg, (c,), jnp.float32)
        beta = 0.1 * jax.random.normal(kb, (c,), jnp.float32)
        mean = 0.1 * jax.random.normal(km, (c,), jnp.float32)
        var = jnp.ones((c,), jnp.float32)
        return gamma, beta, mean, var

    w1, b1 = conv_layer(ks[0], ks[1], in_channels, mid_channels)
    g1, be1, m1, v1 = bn_layer(ks[2], ks[3], ks[4], mid_channels)
    w2, b2 = conv_layer(ks[5], ks[6], mid_channels, out_channels)
    g2, be2, m2, v2 = bn_layer(ks[7], ks[8], ks[9], out_channels)
    return dict(w1=w1, b1=b1, g1=g1, be1=be1, m1=m1, v1=v1,
                w2=w2, b2=b2, g2=g2, be2=be2, m2=m2, v2=v2)


# ----------------------------------------------------------------------------
# Pure-JAX f32 reference (NCHW, PyTorch eval-mode semantics).
# ----------------------------------------------------------------------------
def _ref_down(x, p):
    def conv(x, w, b):
        y = lax.conv_general_dilated(x, w, (1, 1), ((1, 1), (1, 1)),
                                     dimension_numbers=("NCHW", "OIHW", "NCHW"))
        return y + b[None, :, None, None]

    def bn_relu(x, g, be, m, v):
        y = (x - m[None, :, None, None]) / jnp.sqrt(v[None, :, None, None] + _BN_EPS)
        y = y * g[None, :, None, None] + be[None, :, None, None]
        return jnp.maximum(y, 0.0)

    x = lax.reduce_window(x, -jnp.inf, lax.max, (1, 1, 2, 2), (1, 1, 2, 2), "VALID")
    x = bn_relu(conv(x, p["w1"], p["b1"]), p["g1"], p["be1"], p["m1"], p["v1"])
    x = bn_relu(conv(x, p["w2"], p["b2"]), p["g2"], p["be2"], p["m2"], p["v2"])
    return x


if __name__ == "__main__":
    key = jax.random.PRNGKey(0)
    kx, kp = jax.random.split(key)

    N, Cin, Hs, Ws = 2, 4, 16, 16
    Cout = 8
    x = jax.random.normal(kx, (N, Cin, Hs, Ws), jnp.float32)
    params = init_down_params(kp, Cin, Cout)

    out = down_forward(x, params)
    out = jax.block_until_ready(out)
    assert out.shape == (N, Cout, Hs // 2, Ws // 2), out.shape

    # Tolerance relaxed vs. the f32 reference: matmul operands are bf16
    # (f32 accumulation), per the perf guidance.
    ref = jax.block_until_ready(_ref_down(x, params))
    assert jnp.allclose(out, ref, atol=7e-2, rtol=7e-2), float(
        jnp.max(jnp.abs(out - ref))
    )

    print("KERNEL_OK")
</pallas_src>

<mosaic_0001>
module attributes {stable_mosaic.version = 11 : i64} {
  func.func @_down_fused_kernel(%arg0: i32, %arg1: memref<1x8x2x8x8xf32, #tpu.memory_space<vmem>>, %arg2: memref<9x4x8xbf16, #tpu.memory_space<vmem>>, %arg3: memref<1x8xf32, #tpu.memory_space<vmem>>, %arg4: memref<1x8xf32, #tpu.memory_space<vmem>>, %arg5: memref<9x8x128xbf16, #tpu.memory_space<vmem>>, %arg6: memref<1x128xf32, #tpu.memory_space<vmem>>, %arg7: memref<1x128xf32, #tpu.memory_space<vmem>>, %arg8: memref<1x64x128xf32, #tpu.memory_space<vmem>>, %arg9: memref<10x10x4xbf16, #tpu.memory_space<vmem>>, %arg10: memref<10x10x8xbf16, #tpu.memory_space<vmem>>, %arg11: memref<64x8xf32, #tpu.memory_space<vmem>>, %arg12: memref<64x128xf32, #tpu.memory_space<vmem>>) attributes {dimension_semantics = [#tpu.dimension_semantics<parallel>], iteration_bounds = array<i64: 2>, scalar_prefetch = 0 : i64, scratch_operands = 4 : i64, tpu.core_type = #tpu.core_type<tc>, window_params = [{transform_indices = @transform_0, window_bounds = array<i64: 1, 8, 2, 8, 8>}, {pipeline_mode = #tpu.pipeline_mode<synchronous>, transform_indices = @transform_1, window_bounds = array<i64: 9, 4, 8>}, {pipeline_mode = #tpu.pipeline_mode<synchronous>, transform_indices = @transform_2, window_bounds = array<i64: 1, 8>}, {pipeline_mode = #tpu.pipeline_mode<synchronous>, transform_indices = @transform_3, window_bounds = array<i64: 1, 8>}, {pipeline_mode = #tpu.pipeline_mode<synchronous>, transform_indices = @transform_4, window_bounds = array<i64: 9, 8, 128>}, {pipeline_mode = #tpu.pipeline_mode<synchronous>, transform_indices = @transform_5, window_bounds = array<i64: 1, 128>}, {pipeline_mode = #tpu.pipeline_mode<synchronous>, transform_indices = @transform_6, window_bounds = array<i64: 1, 128>}, {transform_indices = @transform_7, window_bounds = array<i64: 1, 64, 128>}]} {
    %c0 = arith.constant 0 : index
    %c0_0 = arith.constant 0 : index
    %c0_1 = arith.constant 0 : index
    %c0_2 = arith.constant 0 : index
    %c0_3 = arith.constant 0 : index
    %0 = vector.load %arg1[%c0, %c0_0, %c0_1, %c0_2, %c0_3] : memref<1x8x2x8x8xf32, #tpu.memory_space<vmem>>, vector<1x8x2x8x8xf32>
    %1 = vector.extract_strided_slice %0 {offsets = [0, 0, 0, 0, 0], sizes = [1, 8, 1, 8, 8], strides = [1, 1, 1, 1, 1]} : vector<1x8x2x8x8xf32> to vector<1x8x1x8x8xf32>
    %2 = vector.shape_cast %1 : vector<1x8x1x8x8xf32> to vector<8x8x8xf32>
    %3 = vector.extract_strided_slice %0 {offsets = [0, 0, 1, 0, 0], sizes = [1, 8, 1, 8, 8], strides = [1, 1, 1, 1, 1]} : vector<1x8x2x8x8xf32> to vector<1x8x1x8x8xf32>
    %4 = vector.shape_cast %3 : vector<1x8x1x8x8xf32> to vector<8x8x8xf32>
    %5 = arith.maximumf %2, %4 : vector<8x8x8xf32>
    %6 = vector.extract_strided_slice %5 {offsets = [0, 0, 0], sizes = [8, 8, 4], strides = [1, 1, 1]} : vector<8x8x8xf32> to vector<8x8x4xf32>
    %7 = vector.extract_strided_slice %5 {offsets = [0, 0, 4], sizes = [8, 8, 4], strides = [1, 1, 1]} : vector<8x8x8xf32> to vector<8x8x4xf32>
    %8 = arith.maximumf %6, %7 : vector<8x8x4xf32>
    %cst = arith.constant 0.000000e+00 : bf16
    %9 = vector.broadcast %cst : bf16 to vector<10x4xbf16>
    %cst_4 = arith.constant 0.000000e+00 : bf16
    %10 = vector.broadcast %cst_4 : bf16 to vector<10x4xbf16>
    %c0_5 = arith.constant 0 : index
    %c0_6 = arith.constant 0 : index
    %c0_7 = arith.constant 0 : index
    %11 = vector.load %arg9[%c0_5, %c0_6, %c0_7] : memref<10x10x4xbf16, #tpu.memory_space<vmem>>, vector<1x10x4xbf16>
    %12 = vector.shape_cast %11 : vector<1x10x4xbf16> to vector<10x4xbf16>
    %13 = vector.shape_cast %9 : vector<10x4xbf16> to vector<1x10x4xbf16>
    tpu.vector_store %arg9[%c0_5, %c0_6, %c0_7], %13 {strides = array<i32>} : memref<10x10x4xbf16, #tpu.memory_space<vmem>>, vector<1x10x4xbf16>,
    %c9 = arith.constant 9 : index
    %c0_8 = arith.constant 0 : index
    %c0_9 = arith.constant 0 : index
    %14 = vector.load %arg9[%c9, %c0_8, %c0_9] : memref<10x10x4xbf16, #tpu.memory_space<vmem>>, vector<1x10x4xbf16>
    %15 = vector.shape_cast %14 : vector<1x10x4xbf16> to vector<10x4xbf16>
    %16 = vector.shape_cast %9 : vector<10x4xbf16> to vector<1x10x4xbf16>
    tpu.vector_store %arg9[%c9, %c0_8, %c0_9], %16 {strides = array<i32>} : memref<10x10x4xbf16, #tpu.memory_space<vmem>>, vector<1x10x4xbf16>,
    %c0_10 = arith.constant 0 : index
    %c0_11 = arith.constant 0 : index
    %c0_12 = arith.constant 0 : index
    %17 = vector.load %arg9[%c0_10, %c0_11, %c0_12] : memref<10x10x4xbf16, #tpu.memory_space<vmem>>, vector<10x1x4xbf16>
    %18 = vector.shape_cast %17 : vector<10x1x4xbf16> to vector<10x4xbf16>
    %19 = vector.shape_cast %10 : vector<10x4xbf16> to vector<10x1x4xbf16>
    tpu.vector_store %arg9[%c0_10, %c0_11, %c0_12], %19 {strides = array<i32>} : memref<10x10x4xbf16, #tpu.memory_space<vmem>>, vector<10x1x4xbf16>,
    %c0_13 = arith.constant 0 : index
    %c9_14 = arith.constant 9 : index
    %c0_15 = arith.constant 0 : index
    %20 = vector.load %arg9[%c0_13, %c9_14, %c0_15] : memref<10x10x4xbf16, #tpu.memory_space<vmem>>, vector<10x1x4xbf16>
    %21 = vector.shape_cast %20 : vector<10x1x4xbf16> to vector<10x4xbf16>
    %22 = vector.shape_cast %10 : vector<10x4xbf16> to vector<10x1x4xbf16>
    tpu.vector_store %arg9[%c0_13, %c9_14, %c0_15], %22 {strides = array<i32>} : memref<10x10x4xbf16, #tpu.memory_space<vmem>>, vector<10x1x4xbf16>,
    %cst_16 = arith.constant 0.000000e+00 : bf16
    %23 = vector.broadcast %cst_16 : bf16 to vector<10x8xbf16>
    %cst_17 = arith.constant 0.000000e+00 : bf16
    %24 = vector.broadcast %cst_17 : bf16 to vector<10x8xbf16>
    %c0_18 = arith.constant 0 : index
    %c0_19 = arith.constant 0 : index
    %c0_20 = arith.constant 0 : index
    %25 = vector.load %arg10[%c0_18, %c0_19, %c0_20] : memref<10x10x8xbf16, #tpu.memory_space<vmem>>, vector<1x10x8xbf16>
    %26 = vector.shape_cast %25 : vector<1x10x8xbf16> to vector<10x8xbf16>
    %27 = vector.shape_cast %23 : vector<10x8xbf16> to vector<1x10x8xbf16>
    tpu.vector_store %arg10[%c0_18, %c0_19, %c0_20], %27 {strides = array<i32>} : memref<10x10x8xbf16, #tpu.memory_space<vmem>>, vector<1x10x8xbf16>,
    %c9_21 = arith.constant 9 : index
    %c0_22 = arith.constant 0 : index
    %c0_23 = arith.constant 0 : index
    %28 = vector.load %arg10[%c9_21, %c0_22, %c0_23] : memref<10x10x8xbf16, #tpu.memory_space<vmem>>, vector<1x10x8xbf16>
    %29 = vector.shape_cast %28 : vector<1x10x8xbf16> to vector<10x8xbf16>
    %30 = vector.shape_cast %23 : vector<10x8xbf16> to vector<1x10x8xbf16>
    tpu.vector_store %arg10[%c9_21, %c0_22, %c0_23], %30 {strides = array<i32>} : memref<10x10x8xbf16, #tpu.memory_space<vmem>>, vector<1x10x8xbf16>,
    %c0_24 = arith.constant 0 : index
    %c0_25 = arith.constant 0 : index
    %c0_26 = arith.constant 0 : index
    %31 = vector.load %arg10[%c0_24, %c0_25, %c0_26] : memref<10x10x8xbf16, #tpu.memory_space<vmem>>, vector<10x1x8xbf16>
    %32 = vector.shape_cast %31 : vector<10x1x8xbf16> to vector<10x8xbf16>
    %33 = vector.shape_cast %24 : vector<10x8xbf16> to vector<10x1x8xbf16>
    tpu.vector_store %arg10[%c0_24, %c0_25, %c0_26], %33 {strides = array<i32>} : memref<10x10x8xbf16, #tpu.memory_space<vmem>>, vector<10x1x8xbf16>,
    %c0_27 = arith.constant 0 : index
    %c9_28 = arith.constant 9 : index
    %c0_29 = arith.constant 0 : index
    %34 = vector.load %arg10[%c0_27, %c9_28, %c0_29] : memref<10x10x8xbf16, #tpu.memory_space<vmem>>, vector<10x1x8xbf16>
    %35 = vector.shape_cast %34 : vector<10x1x8xbf16> to vector<10x8xbf16>
    %36 = vector.shape_cast %24 : vector<10x8xbf16> to vector<10x1x8xbf16>
    tpu.vector_store %arg10[%c0_27, %c9_28, %c0_29], %36 {strides = array<i32>} : memref<10x10x8xbf16, #tpu.memory_space<vmem>>, vector<10x1x8xbf16>,
    %37 = arith.truncf %8 : vector<8x8x4xf32> to vector<8x8x4xbf16>
    %c1 = arith.constant 1 : index
    %c1_30 = arith.constant 1 : index
    %c0_31 = arith.constant 0 : index
    %38 = vector.load %arg9[%c1, %c1_30, %c0_31] : memref<10x10x4xbf16, #tpu.memory_space<vmem>>, vector<8x8x4xbf16>
    tpu.vector_store %arg9[%c1, %c1_30, %c0_31], %37 {strides = array<i32>} : memref<10x10x4xbf16, #tpu.memory_space<vmem>>, vector<8x8x4xbf16>,
    %c0_32 = arith.constant 0 : index
    %c0_33 = arith.constant 0 : index
    %c0_34 = arith.constant 0 : index
    %39 = vector.load %arg9[%c0_32, %c0_33, %c0_34] : memref<10x10x4xbf16, #tpu.memory_space<vmem>>, vector<8x8x4xbf16>
    %40 = vector.shape_cast %39 : vector<8x8x4xbf16> to vector<64x4xbf16>
    %c0_35 = arith.constant 0 : index
    %c0_36 = arith.constant 0 : index
    %c0_37 = arith.constant 0 : index
    %41 = vector.load %arg2[%c0_35, %c0_36, %c0_37] : memref<9x4x8xbf16, #tpu.memory_space<vmem>>, vector<1x4x8xbf16>
    %42 = vector.shape_cast %41 : vector<1x4x8xbf16> to vector<4x8xbf16>
    %cst_38 = arith.constant dense<0.000000e+00> : vector<64x8xf32>
    %43 = tpu.matmul %40, %42, %cst_38 {dimension_numbers = #tpu.dot_dimension_numbers<[1], [0], [0], [1], [0, 0, 1, 1], [], []>} : vector<64x4xbf16>, vector<4x8xbf16>, vector<64x8xf32> -> vector<64x8xf32>
    %c0_39 = arith.constant 0 : index
    %c0_40 = arith.constant 0 : index
    %44 = vector.load %arg11[%c0_39, %c0_40] : memref<64x8xf32, #tpu.memory_space<vmem>>, vector<64x8xf32>
    tpu.vector_store %arg11[%c0_39, %c0_40], %43 {strides = array<i32>} : memref<64x8xf32, #tpu.memory_space<vmem>>, vector<64x8xf32>,
    %c0_41 = arith.constant 0 : index
    %c1_42 = arith.constant 1 : index
    %c0_43 = arith.constant 0 : index
    %45 = vector.load %arg9[%c0_41, %c1_42, %c0_43] : memref<10x10x4xbf16, #tpu.memory_space<vmem>>, vector<8x8x4xbf16>
    %46 = vector.shape_cast %45 : vector<8x8x4xbf16> to vector<64x4xbf16>
    %c1_44 = arith.constant 1 : index
    %c0_45 = arith.constant 0 : index
    %c0_46 = arith.constant 0 : index
    %47 = vector.load %arg2[%c1_44, %c0_45, %c0_46] : memref<9x4x8xbf16, #tpu.memory_space<vmem>>, vector<1x4x8xbf16>
    %48 = vector.shape_cast %47 : vector<1x4x8xbf16> to vector<4x8xbf16>
    %cst_47 = arith.constant dense<0.000000e+00> : vector<64x8xf32>
    %49 = tpu.matmul %46, %48, %cst_47 {dimension_numbers = #tpu.dot_dimension_numbers<[1], [0], [0], [1], [0, 0, 1, 1], [], []>} : vector<64x4xbf16>, vector<4x8xbf16>, vector<64x8xf32> -> vector<64x8xf32>
    %c0_48 = arith.constant 0 : index
    %c0_49 = arith.constant 0 : index
    %50 = vector.load %arg11[%c0_48, %c0_49] : memref<64x8xf32, #tpu.memory_space<vmem>>, vector<64x8xf32>
    %51 = arith.addf %50, %49 : vector<64x8xf32>
    %c0_50 = arith.constant 0 : index
    %c0_51 = arith.constant 0 : index
    %52 = vector.load %arg11[%c0_50, %c0_51] : memref<64x8xf32, #tpu.memory_space<vmem>>, vector<64x8xf32>
    tpu.vector_store %arg11[%c0_50, %c0_51], %51 {strides = array<i32>} : memref<64x8xf32, #tpu.memory_space<vmem>>, vector<64x8xf32>,
    %c0_52 = arith.constant 0 : index
    %c2 = arith.constant 2 : index
    %c0_53 = arith.constant 0 : index
    %53 = vector.load %arg9[%c0_52, %c2, %c0_53] : memref<10x10x4xbf16, #tpu.memory_space<vmem>>, vector<8x8x4xbf16>
    %54 = vector.shape_cast %53 : vector<8x8x4xbf16> to vector<64x4xbf16>
    %c2_54 = arith.constant 2 : index
    %c0_55 = arith.constant 0 : index
    %c0_56 = arith.constant 0 : index
    %55 = vector.load %arg2[%c2_54, %c0_55, %c0_56] : memref<9x4x8xbf16, #tpu.memory_space<vmem>>, vector<1x4x8xbf16>
    %56 = vector.shape_cast %55 : vector<1x4x8xbf16> to vector<4x8xbf16>
    %cst_57 = arith.constant dense<0.000000e+00> : vector<64x8xf32>
    %57 = tpu.matmul %54, %56, %cst_57 {dimension_numbers = #tpu.dot_dimension_numbers<[1], [0], [0], [1], [0, 0, 1, 1], [], []>} : vector<64x4xbf16>, vector<4x8xbf16>, vector<64x8xf32> -> vector<64x8xf32>
    %c0_58 = arith.constant 0 : index
    %c0_59 = arith.constant 0 : index
    %58 = vector.load %arg11[%c0_58, %c0_59] : memref<64x8xf32, #tpu.memory_space<vmem>>, vector<64x8xf32>
    %59 = arith.addf %58, %57 : vector<64x8xf32>
    %c0_60 = arith.constant 0 : index
    %c0_61 = arith.constant 0 : index
    %60 = vector.load %arg11[%c0_60, %c0_61] : memref<64x8xf32, #tpu.memory_space<vmem>>, vector<64x8xf32>
    tpu.vector_store %arg11[%c0_60, %c0_61], %59 {strides = array<i32>} : memref<64x8xf32, #tpu.memory_space<vmem>>, vector<64x8xf32>,
    %c1_62 = arith.constant 1 : index
    %c0_63 = arith.constant 0 : index
    %c0_64 = arith.constant 0 : index
    %61 = vector.load %arg9[%c1_62, %c0_63, %c0_64] : memref<10x10x4xbf16, #tpu.memory_space<vmem>>, vector<8x8x4xbf16>
    %62 = vector.shape_cast %61 : vector<8x8x4xbf16> to vector<64x4xbf16>
    %c3 = arith.constant 3 : index
    %c0_65 = arith.constant 0 : index
    %c0_66 = arith.constant 0 : index
    %63 = vector.load %arg2[%c3, %c0_65, %c0_66] : memref<9x4x8xbf16, #tpu.memory_space<vmem>>, vector<1x4x8xbf16>
    %64 = vector.shape_cast %63 : vector<1x4x8xbf16> to vector<4x8xbf16>
    %cst_67 = arith.constant dense<0.000000e+00> : vector<64x8xf32>
    %65 = tpu.matmul %62, %64, %cst_67 {dimension_numbers = #tpu.dot_dimension_numbers<[1], [0], [0], [1], [0, 0, 1, 1], [], []>} : vector<64x4xbf16>, vector<4x8xbf16>, vector<64x8xf32> -> vector<64x8xf32>
    %c0_68 = arith.constant 0 : index
    %c0_69 = arith.constant 0 : index
    %66 = vector.load %arg11[%c0_68, %c0_69] : memref<64x8xf32, #tpu.memory_space<vmem>>, vector<64x8xf32>
    %67 = arith.addf %66, %65 : vector<64x8xf32>
    %c0_70 = arith.constant 0 : index
    %c0_71 = arith.constant 0 : index
    %68 = vector.load %arg11[%c0_70, %c0_71] : memref<64x8xf32, #tpu.memory_space<vmem>>, vector<64x8xf32>
    tpu.vector_store %arg11[%c0_70, %c0_71], %67 {strides = array<i32>} : memref<64x8xf32, #tpu.memory_space<vmem>>, vector<64x8xf32>,
    %c1_72 = arith.constant 1 : index
    %c1_73 = arith.constant 1 : index
    %c0_74 = arith.constant 0 : index
    %69 = vector.load %arg9[%c1_72, %c1_73, %c0_74] : memref<10x10x4xbf16, #tpu.memory_space<vmem>>, vector<8x8x4xbf16>
    %70 = vector.shape_cast %69 : vector<8x8x4xbf16> to vector<64x4xbf16>
    %c4 = arith.constant 4 : index
    %c0_75 = arith.constant 0 : index
    %c0_76 = arith.constant 0 : index
    %71 = vector.load %arg2[%c4, %c0_75, %c0_76] : memref<9x4x8xbf16, #tpu.memory_space<vmem>>, vector<1x4x8xbf16>
    %72 = vector.shape_cast %71 : vector<1x4x8xbf16> to vector<4x8xbf16>
    %cst_77 = arith.constant dense<0.000000e+00> : vector<64x8xf32>
    %73 = tpu.matmul %70, %72, %cst_77 {dimension_numbers = #tpu.dot_dimension_numbers<[1], [0], [0], [1], [0, 0, 1, 1], [], []>} : vector<64x4xbf16>, vector<4x8xbf16>, vector<64x8xf32> -> vector<64x8xf32>
    %c0_78 = arith.constant 0 : index
    %c0_79 = arith.constant 0 : index
    %74 = vector.load %arg11[%c0_78, %c0_79] : memref<64x8xf32, #tpu.memory_space<vmem>>, vector<64x8xf32>
    %75 = arith.addf %74, %73 : vector<64x8xf32>
    %c0_80 = arith.constant 0 : index
    %c0_81 = arith.constant 0 : index
    %76 = vector.load %arg11[%c0_80, %c0_81] : memref<64x8xf32, #tpu.memory_space<vmem>>, vector<64x8xf32>
    tpu.vector_store %arg11[%c0_80, %c0_81], %75 {strides = array<i32>} : memref<64x8xf32, #tpu.memory_space<vmem>>, vector<64x8xf32>,
    %c1_82 = arith.constant 1 : index
    %c2_83 = arith.constant 2 : index
    %c0_84 = arith.constant 0 : index
    %77 = vector.load %arg9[%c1_82, %c2_83, %c0_84] : memref<10x10x4xbf16, #tpu.memory_space<vmem>>, vector<8x8x4xbf16>
    %78 = vector.shape_cast %77 : vector<8x8x4xbf16> to vector<64x4xbf16>
    %c5 = arith.constant 5 : index
    %c0_85 = arith.constant 0 : index
    %c0_86 = arith.constant 0 : index
    %79 = vector.load %arg2[%c5, %c0_85, %c0_86] : memref<9x4x8xbf16, #tpu.memory_space<vmem>>, vector<1x4x8xbf16>
    %80 = vector.shape_cast %79 : vector<1x4x8xbf16> to vector<4x8xbf16>
    %cst_87 = arith.constant dense<0.000000e+00> : vector<64x8xf32>
    %81 = tpu.matmul %78, %80, %cst_87 {dimension_numbers = #tpu.dot_dimension_numbers<[1], [0], [0], [1], [0, 0, 1, 1], [], []>} : vector<64x4xbf16>, vector<4x8xbf16>, vector<64x8xf32> -> vector<64x8xf32>
    %c0_88 = arith.constant 0 : index
    %c0_89 = arith.constant 0 : index
    %82 = vector.load %arg11[%c0_88, %c0_89] : memref<64x8xf32, #tpu.memory_space<vmem>>, vector<64x8xf32>
    %83 = arith.addf %82, %81 : vector<64x8xf32>
    %c0_90 = arith.constant 0 : index
    %c0_91 = arith.constant 0 : index
    %84 = vector.load %arg11[%c0_90, %c0_91] : memref<64x8xf32, #tpu.memory_space<vmem>>, vector<64x8xf32>
    tpu.vector_store %arg11[%c0_90, %c0_91], %83 {strides = array<i32>} : memref<64x8xf32, #tpu.memory_space<vmem>>, vector<64x8xf32>,
    %c2_92 = arith.constant 2 : index
    %c0_93 = arith.constant 0 : index
    %c0_94 = arith.constant 0 : index
    %85 = vector.load %arg9[%c2_92, %c0_93, %c0_94] : memref<10x10x4xbf16, #tpu.memory_space<vmem>>, vector<8x8x4xbf16>
    %86 = vector.shape_cast %85 : vector<8x8x4xbf16> to vector<64x4xbf16>
    %c6 = arith.constant 6 : index
    %c0_95 = arith.constant 0 : index
    %c0_96 = arith.constant 0 : index
    %87 = vector.load %arg2[%c6, %c0_95, %c0_96] : memref<9x4x8xbf16, #tpu.memory_space<vmem>>, vector<1x4x8xbf16>
    %88 = vector.shape_cast %87 : vector<1x4x8xbf16> to vector<4x8xbf16>
    %cst_97 = arith.constant dense<0.000000e+00> : vector<64x8xf32>
    %89 = tpu.matmul %86, %88, %cst_97 {dimension_numbers = #tpu.dot_dimension_numbers<[1], [0], [0], [1], [0, 0, 1, 1], [], []>} : vector<64x4xbf16>, vector<4x8xbf16>, vector<64x8xf32> -> vector<64x8xf32>
    %c0_98 = arith.constant 0 : index
    %c0_99 = arith.constant 0 : index
    %90 = vector.load %arg11[%c0_98, %c0_99] : memref<64x8xf32, #tpu.memory_space<vmem>>, vector<64x8xf32>
    %91 = arith.addf %90, %89 : vector<64x8xf32>
    %c0_100 = arith.constant 0 : index
    %c0_101 = arith.constant 0 : index
    %92 = vector.load %arg11[%c0_100, %c0_101] : memref<64x8xf32, #tpu.memory_space<vmem>>, vector<64x8xf32>
    tpu.vector_store %arg11[%c0_100, %c0_101], %91 {strides = array<i32>} : memref<64x8xf32, #tpu.memory_space<vmem>>, vector<64x8xf32>,
    %c2_102 = arith.constant 2 : index
    %c1_103 = arith.constant 1 : index
    %c0_104 = arith.constant 0 : index
    %93 = vector.load %arg9[%c2_102, %c1_103, %c0_104] : memref<10x10x4xbf16, #tpu.memory_space<vmem>>, vector<8x8x4xbf16>
    %94 = vector.shape_cast %93 : vector<8x8x4xbf16> to vector<64x4xbf16>
    %c7 = arith.constant 7 : index
    %c0_105 = arith.constant 0 : index
    %c0_106 = arith.constant 0 : index
    %95 = vector.load %arg2[%c7, %c0_105, %c0_106] : memref<9x4x8xbf16, #tpu.memory_space<vmem>>, vector<1x4x8xbf16>
    %96 = vector.shape_cast %95 : vector<1x4x8xbf16> to vector<4x8xbf16>
    %cst_107 = arith.constant dense<0.000000e+00> : vector<64x8xf32>
    %97 = tpu.matmul %94, %96, %cst_107 {dimension_numbers = #tpu.dot_dimension_numbers<[1], [0], [0], [1], [0, 0, 1, 1], [], []>} : vector<64x4xbf16>, vector<4x8xbf16>, vector<64x8xf32> -> vector<64x8xf32>
    %c0_108 = arith.constant 0 : index
    %c0_109 = arith.constant 0 : index
    %98 = vector.load %arg11[%c0_108, %c0_109] : memref<64x8xf32, #tpu.memory_space<vmem>>, vector<64x8xf32>
    %99 = arith.addf %98, %97 : vector<64x8xf32>
    %c0_110 = arith.constant 0 : index
    %c0_111 = arith.constant 0 : index
    %100 = vector.load %arg11[%c0_110, %c0_111] : memref<64x8xf32, #tpu.memory_space<vmem>>, vector<64x8xf32>
    tpu.vector_store %arg11[%c0_110, %c0_111], %99 {strides = array<i32>} : memref<64x8xf32, #tpu.memory_space<vmem>>, vector<64x8xf32>,
    %c2_112 = arith.constant 2 : index
    %c2_113 = arith.constant 2 : index
    %c0_114 = arith.constant 0 : index
    %101 = vector.load %arg9[%c2_112, %c2_113, %c0_114] : memref<10x10x4xbf16, #tpu.memory_space<vmem>>, vector<8x8x4xbf16>
    %102 = vector.shape_cast %101 : vector<8x8x4xbf16> to vector<64x4xbf16>
    %c8 = arith.constant 8 : index
    %c0_115 = arith.constant 0 : index
    %c0_116 = arith.constant 0 : index
    %103 = vector.load %arg2[%c8, %c0_115, %c0_116] : memref<9x4x8xbf16, #tpu.memory_space<vmem>>, vector<1x4x8xbf16>
    %104 = vector.shape_cast %103 : vector<1x4x8xbf16> to vector<4x8xbf16>
    %cst_117 = arith.constant dense<0.000000e+00> : vector<64x8xf32>
    %105 = tpu.matmul %102, %104, %cst_117 {dimension_numbers = #tpu.dot_dimension_numbers<[1], [0], [0], [1], [0, 0, 1, 1], [], []>} : vector<64x4xbf16>, vector<4x8xbf16>, vector<64x8xf32> -> vector<64x8xf32>
    %c0_118 = arith.constant 0 : index
    %c0_119 = arith.constant 0 : index
    %106 = vector.load %arg11[%c0_118, %c0_119] : memref<64x8xf32, #tpu.memory_space<vmem>>, vector<64x8xf32>
    %107 = arith.addf %106, %105 : vector<64x8xf32>
    %c0_120 = arith.constant 0 : index
    %c0_121 = arith.constant 0 : index
    %108 = vector.load %arg11[%c0_120, %c0_121] : memref<64x8xf32, #tpu.memory_space<vmem>>, vector<64x8xf32>
    tpu.vector_store %arg11[%c0_120, %c0_121], %107 {strides = array<i32>} : memref<64x8xf32, #tpu.memory_space<vmem>>, vector<64x8xf32>,
    %c0_122 = arith.constant 0 : index
    %c0_123 = arith.constant 0 : index
    %109 = vector.load %arg11[%c0_122, %c0_123] : memref<64x8xf32, #tpu.memory_space<vmem>>, vector<64x8xf32>
    %c0_124 = arith.constant 0 : index
    %c0_125 = arith.constant 0 : index
    %110 = vector.load %arg3[%c0_124, %c0_125] : memref<1x8xf32, #tpu.memory_space<vmem>>, vector<1x8xf32>
    %111 = vector.broadcast %110 : vector<1x8xf32> to vector<64x8xf32>
    %112 = arith.mulf %109, %111 : vector<64x8xf32>
    %c0_126 = arith.constant 0 : index
    %c0_127 = arith.constant 0 : index
    %113 = vector.load %arg4[%c0_126, %c0_127] : memref<1x8xf32, #tpu.memory_space<vmem>>, vector<1x8xf32>
    %114 = vector.broadcast %113 : vector<1x8xf32> to vector<64x8xf32>
    %115 = arith.addf %112, %114 : vector<64x8xf32>
    %cst_128 = arith.constant 0.000000e+00 : f32
    %116 = vector.broadcast %cst_128 : f32 to vector<64x8xf32>
    %117 = arith.maximumf %115, %116 : vector<64x8xf32>
    %118 = vector.shape_cast %117 : vector<64x8xf32> to vector<8x8x8xf32>
    %119 = arith.truncf %118 : vector<8x8x8xf32> to vector<8x8x8xbf16>
    %c1_129 = arith.constant 1 : index
    %c1_130 = arith.constant 1 : index
    %c0_131 = arith.constant 0 : index
    %120 = vector.load %arg10[%c1_129, %c1_130, %c0_131] : memref<10x10x8xbf16, #tpu.memory_space<vmem>>, vector<8x8x8xbf16>
    tpu.vector_store %arg10[%c1_129, %c1_130, %c0_131], %119 {strides = array<i32>} : memref<10x10x8xbf16, #tpu.memory_space<vmem>>, vector<8x8x8xbf16>,
    %c0_132 = arith.constant 0 : index
    %c0_133 = arith.constant 0 : index
    %c0_134 = arith.constant 0 : index
    %121 = vector.load %arg10[%c0_132, %c0_133, %c0_134] : memref<10x10x8xbf16, #tpu.memory_space<vmem>>, vector<8x8x8xbf16>
    %122 = vector.shape_cast %121 : vector<8x8x8xbf16> to vector<64x8xbf16>
    %c0_135 = arith.constant 0 : index
    %c0_136 = arith.constant 0 : index
    %c0_137 = arith.constant 0 : index
    %123 = vector.load %arg5[%c0_135, %c0_136, %c0_137] : memref<9x8x128xbf16, #tpu.memory_space<vmem>>, vector<1x8x128xbf16>
    %124 = vector.shape_cast %123 : vector<1x8x128xbf16> to vector<8x128xbf16>
    %cst_138 = arith.constant dense<0.000000e+00> : vector<64x128xf32>
    %125 = tpu.matmul %122, %124, %cst_138 {dimension_numbers = #tpu.dot_dimension_numbers<[1], [0], [0], [1], [0, 0, 1, 1], [], []>} : vector<64x8xbf16>, vector<8x128xbf16>, vector<64x128xf32> -> vector<64x128xf32>
    %c0_139 = arith.constant 0 : index
    %c0_140 = arith.constant 0 : index
    %126 = vector.load %arg12[%c0_139, %c0_140] : memref<64x128xf32, #tpu.memory_space<vmem>>, vector<64x128xf32>
    tpu.vector_store %arg12[%c0_139, %c0_140], %125 {strides = array<i32>} : memref<64x128xf32, #tpu.memory_space<vmem>>, vector<64x128xf32>,
    %c0_141 = arith.constant 0 : index
    %c1_142 = arith.constant 1 : index
    %c0_143 = arith.constant 0 : index
    %127 = vector.load %arg10[%c0_141, %c1_142, %c0_143] : memref<10x10x8xbf16, #tpu.memory_space<vmem>>, vector<8x8x8xbf16>
    %128 = vector.shape_cast %127 : vector<8x8x8xbf16> to vector<64x8xbf16>
    %c1_144 = arith.constant 1 : index
    %c0_145 = arith.constant 0 : index
    %c0_146 = arith.constant 0 : index
    %129 = vector.load %arg5[%c1_144, %c0_145, %c0_146] : memref<9x8x128xbf16, #tpu.memory_space<vmem>>, vector<1x8x128xbf16>
    %130 = vector.shape_cast %129 : vector<1x8x128xbf16> to vector<8x128xbf16>
    %cst_147 = arith.constant dense<0.000000e+00> : vector<64x128xf32>
    %131 = tpu.matmul %128, %130, %cst_147 {dimension_numbers = #tpu.dot_dimension_numbers<[1], [0], [0], [1], [0, 0, 1, 1], [], []>} : vector<64x8xbf16>, vector<8x128xbf16>, vector<64x128xf32> -> vector<64x128xf32>
    %c0_148 = arith.constant 0 : index
    %c0_149 = arith.constant 0 : index
    %132 = vector.load %arg12[%c0_148, %c0_149] : memref<64x128xf32, #tpu.memory_space<vmem>>, vector<64x128xf32>
    %133 = arith.addf %132, %131 : vector<64x128xf32>
    %c0_150 = arith.constant 0 : index
    %c0_151 = arith.constant 0 : index
    %134 = vector.load %arg12[%c0_150, %c0_151] : memref<64x128xf32, #tpu.memory_space<vmem>>, vector<64x128xf32>
    tpu.vector_store %arg12[%c0_150, %c0_151], %133 {strides = array<i32>} : memref<64x128xf32, #tpu.memory_space<vmem>>, vector<64x128xf32>,
    %c0_152 = arith.constant 0 : index
    %c2_153 = arith.constant 2 : index
    %c0_154 = arith.constant 0 : index
    %135 = vector.load %arg10[%c0_152, %c2_153, %c0_154] : memref<10x10x8xbf16, #tpu.memory_space<vmem>>, vector<8x8x8xbf16>
    %136 = vector.shape_cast %135 : vector<8x8x8xbf16> to vector<64x8xbf16>
    %c2_155 = arith.constant 2 : index
    %c0_156 = arith.constant 0 : index
    %c0_157 = arith.constant 0 : index
    %137 = vector.load %arg5[%c2_155, %c0_156, %c0_157] : memref<9x8x128xbf16, #tpu.memory_space<vmem>>, vector<1x8x128xbf16>
    %138 = vector.shape_cast %137 : vector<1x8x128xbf16> to vector<8x128xbf16>
    %cst_158 = arith.constant dense<0.000000e+00> : vector<64x128xf32>
    %139 = tpu.matmul %136, %138, %cst_158 {dimension_numbers = #tpu.dot_dimension_numbers<[1], [0], [0], [1], [0, 0, 1, 1], [], []>} : vector<64x8xbf16>, vector<8x128xbf16>, vector<64x128xf32> -> vector<64x128xf32>
    %c0_159 = arith.constant 0 : index
    %c0_160 = arith.constant 0 : index
    %140 = vector.load %arg12[%c0_159, %c0_160] : memref<64x128xf32, #tpu.memory_space<vmem>>, vector<64x128xf32>
    %141 = arith.addf %140, %139 : vector<64x128xf32>
    %c0_161 = arith.constant 0 : index
    %c0_162 = arith.constant 0 : index
    %142 = vector.load %arg12[%c0_161, %c0_162] : memref<64x128xf32, #tpu.memory_space<vmem>>, vector<64x128xf32>
    tpu.vector_store %arg12[%c0_161, %c0_162], %141 {strides = array<i32>} : memref<64x128xf32, #tpu.memory_space<vmem>>, vector<64x128xf32>,
    %c1_163 = arith.constant 1 : index
    %c0_164 = arith.constant 0 : index
    %c0_165 = arith.constant 0 : index
    %143 = vector.load %arg10[%c1_163, %c0_164, %c0_165] : memref<10x10x8xbf16, #tpu.memory_space<vmem>>, vector<8x8x8xbf16>
    %144 = vector.shape_cast %143 : vector<8x8x8xbf16> to vector<64x8xbf16>
    %c3_166 = arith.constant 3 : index
    %c0_167 = arith.constant 0 : index
    %c0_168 = arith.constant 0 : index
    %145 = vector.load %arg5[%c3_166, %c0_167, %c0_168] : memref<9x8x128xbf16, #tpu.memory_space<vmem>>, vector<1x8x128xbf16>
    %146 = vector.shape_cast %145 : vector<1x8x128xbf16> to vector<8x128xbf16>
    %cst_169 = arith.constant dense<0.000000e+00> : vector<64x128xf32>
    %147 = tpu.matmul %144, %146, %cst_169 {dimension_numbers = #tpu.dot_dimension_numbers<[1], [0], [0], [1], [0, 0, 1, 1], [], []>} : vector<64x8xbf16>, vector<8x128xbf16>, vector<64x128xf32> -> vector<64x128xf32>
    %c0_170 = arith.constant 0 : index
    %c0_171 = arith.constant 0 : index
    %148 = vector.load %arg12[%c0_170, %c0_171] : memref<64x128xf32, #tpu.memory_space<vmem>>, vector<64x128xf32>
    %149 = arith.addf %148, %147 : vector<64x128xf32>
    %c0_172 = arith.constant 0 : index
    %c0_173 = arith.constant 0 : index
    %150 = vector.load %arg12[%c0_172, %c0_173] : memref<64x128xf32, #tpu.memory_space<vmem>>, vector<64x128xf32>
    tpu.vector_store %arg12[%c0_172, %c0_173], %149 {strides = array<i32>} : memref<64x128xf32, #tpu.memory_space<vmem>>, vector<64x128xf32>,
    %c1_174 = arith.constant 1 : index
    %c1_175 = arith.constant 1 : index
    %c0_176 = arith.constant 0 : index
    %151 = vector.load %arg10[%c1_174, %c1_175, %c0_176] : memref<10x10x8xbf16, #tpu.memory_space<vmem>>, vector<8x8x8xbf16>
    %152 = vector.shape_cast %151 : vector<8x8x8xbf16> to vector<64x8xbf16>
    %c4_177 = arith.constant 4 : index
    %c0_178 = arith.constant 0 : index
    %c0_179 = arith.constant 0 : index
    %153 = vector.load %arg5[%c4_177, %c0_178, %c0_179] : memref<9x8x128xbf16, #tpu.memory_space<vmem>>, vector<1x8x128xbf16>
    %154 = vector.shape_cast %153 : vector<1x8x128xbf16> to vector<8x128xbf16>
    %cst_180 = arith.constant dense<0.000000e+00> : vector<64x128xf32>
    %155 = tpu.matmul %152, %154, %cst_180 {dimension_numbers = #tpu.dot_dimension_numbers<[1], [0], [0], [1], [0, 0, 1, 1], [], []>} : vector<64x8xbf16>, vector<8x128xbf16>, vector<64x128xf32> -> vector<64x128xf32>
    %c0_181 = arith.constant 0 : index
    %c0_182 = arith.constant 0 : index
    %156 = vector.load %arg12[%c0_181, %c0_182] : memref<64x128xf32, #tpu.memory_space<vmem>>, vector<64x128xf32>
    %157 = arith.addf %156, %155 : vector<64x128xf32>
    %c0_183 = arith.constant 0 : index
    %c0_184 = arith.constant 0 : index
    %158 = vector.load %arg12[%c0_183, %c0_184] : memref<64x128xf32, #tpu.memory_space<vmem>>, vector<64x128xf32>
    tpu.vector_store %arg12[%c0_183, %c0_184], %157 {strides = array<i32>} : memref<64x128xf32, #tpu.memory_space<vmem>>, vector<64x128xf32>,
    %c1_185 = arith.constant 1 : index
    %c2_186 = arith.constant 2 : index
    %c0_187 = arith.constant 0 : index
    %159 = vector.load %arg10[%c1_185, %c2_186, %c0_187] : memref<10x10x8xbf16, #tpu.memory_space<vmem>>, vector<8x8x8xbf16>
    %160 = vector.shape_cast %159 : vector<8x8x8xbf16> to vector<64x8xbf16>
    %c5_188 = arith.constant 5 : index
    %c0_189 = arith.constant 0 : index
    %c0_190 = arith.constant 0 : index
    %161 = vector.load %arg5[%c5_188, %c0_189, %c0_190] : memref<9x8x128xbf16, #tpu.memory_space<vmem>>, vector<1x8x128xbf16>
    %162 = vector.shape_cast %161 : vector<1x8x128xbf16> to vector<8x128xbf16>
    %cst_191 = arith.constant dense<0.000000e+00> : vector<64x128xf32>
    %163 = tpu.matmul %160, %162, %cst_191 {dimension_numbers = #tpu.dot_dimension_numbers<[1], [0], [0], [1], [0, 0, 1, 1], [], []>} : vector<64x8xbf16>, vector<8x128xbf16>, vector<64x128xf32> -> vector<64x128xf32>
    %c0_192 = arith.constant 0 : index
    %c0_193 = arith.constant 0 : index
    %164 = vector.load %arg12[%c0_192, %c0_193] : memref<64x128xf32, #tpu.memory_space<vmem>>, vector<64x128xf32>
    %165 = arith.addf %164, %163 : vector<64x128xf32>
    %c0_194 = arith.constant 0 : index
    %c0_195 = arith.constant 0 : index
    %166 = vector.load %arg12[%c0_194, %c0_195] : memref<64x128xf32, #tpu.memory_space<vmem>>, vector<64x128xf32>
    tpu.vector_store %arg12[%c0_194, %c0_195], %165 {strides = array<i32>} : memref<64x128xf32, #tpu.memory_space<vmem>>, vector<64x128xf32>,
    %c2_196 = arith.constant 2 : index
    %c0_197 = arith.constant 0 : index
    %c0_198 = arith.constant 0 : index
    %167 = vector.load %arg10[%c2_196, %c0_197, %c0_198] : memref<10x10x8xbf16, #tpu.memory_space<vmem>>, vector<8x8x8xbf16>
    %168 = vector.shape_cast %167 : vector<8x8x8xbf16> to vector<64x8xbf16>
    %c6_199 = arith.constant 6 : index
    %c0_200 = arith.constant 0 : index
    %c0_201 = arith.constant 0 : index
    %169 = vector.load %arg5[%c6_199, %c0_200, %c0_201] : memref<9x8x128xbf16, #tpu.memory_space<vmem>>, vector<1x8x128xbf16>
    %170 = vector.shape_cast %169 : vector<1x8x128xbf16> to vector<8x128xbf16>
    %cst_202 = arith.constant dense<0.000000e+00> : vector<64x128xf32>
    %171 = tpu.matmul %168, %170, %cst_202 {dimension_numbers = #tpu.dot_dimension_numbers<[1], [0], [0], [1], [0, 0, 1, 1], [], []>} : vector<64x8xbf16>, vector<8x128xbf16>, vector<64x128xf32> -> vector<64x128xf32>
    %c0_203 = arith.constant 0 : index
    %c0_204 = arith.constant 0 : index
    %172 = vector.load %arg12[%c0_203, %c0_204] : memref<64x128xf32, #tpu.memory_space<vmem>>, vector<64x128xf32>
    %173 = arith.addf %172, %171 : vector<64x128xf32>
    %c0_205 = arith.constant 0 : index
    %c0_206 = arith.constant 0 : index
    %174 = vector.load %arg12[%c0_205, %c0_206] : memref<64x128xf32, #tpu.memory_space<vmem>>, vector<64x128xf32>
    tpu.vector_store %arg12[%c0_205, %c0_206], %173 {strides = array<i32>} : memref<64x128xf32, #tpu.memory_space<vmem>>, vector<64x128xf32>,
    %c2_207 = arith.constant 2 : index
    %c1_208 = arith.constant 1 : index
    %c0_209 = arith.constant 0 : index
    %175 = vector.load %arg10[%c2_207, %c1_208, %c0_209] : memref<10x10x8xbf16, #tpu.memory_space<vmem>>, vector<8x8x8xbf16>
    %176 = vector.shape_cast %175 : vector<8x8x8xbf16> to vector<64x8xbf16>
    %c7_210 = arith.constant 7 : index
    %c0_211 = arith.constant 0 : index
    %c0_212 = arith.constant 0 : index
    %177 = vector.load %arg5[%c7_210, %c0_211, %c0_212] : memref<9x8x128xbf16, #tpu.memory_space<vmem>>, vector<1x8x128xbf16>
    %178 = vector.shape_cast %177 : vector<1x8x128xbf16> to vector<8x128xbf16>
    %cst_213 = arith.constant dense<0.000000e+00> : vector<64x128xf32>
    %179 = tpu.matmul %176, %178, %cst_213 {dimension_numbers = #tpu.dot_dimension_numbers<[1], [0], [0], [1], [0, 0, 1, 1], [], []>} : vector<64x8xbf16>, vector<8x128xbf16>, vector<64x128xf32> -> vector<64x128xf32>
    %c0_214 = arith.constant 0 : index
    %c0_215 = arith.constant 0 : index
    %180 = vector.load %arg12[%c0_214, %c0_215] : memref<64x128xf32, #tpu.memory_space<vmem>>, vector<64x128xf32>
    %181 = arith.addf %180, %179 : vector<64x128xf32>
    %c0_216 = arith.constant 0 : index
    %c0_217 = arith.constant 0 : index
    %182 = vector.load %arg12[%c0_216, %c0_217] : memref<64x128xf32, #tpu.memory_space<vmem>>, vector<64x128xf32>
    tpu.vector_store %arg12[%c0_216, %c0_217], %181 {strides = array<i32>} : memref<64x128xf32, #tpu.memory_space<vmem>>, vector<64x128xf32>,
    %c2_218 = arith.constant 2 : index
    %c2_219 = arith.constant 2 : index
    %c0_220 = arith.constant 0 : index
    %183 = vector.load %arg10[%c2_218, %c2_219, %c0_220] : memref<10x10x8xbf16, #tpu.memory_space<vmem>>, vector<8x8x8xbf16>
    %184 = vector.shape_cast %183 : vector<8x8x8xbf16> to vector<64x8xbf16>
    %c8_221 = arith.constant 8 : index
    %c0_222 = arith.constant 0 : index
    %c0_223 = arith.constant 0 : index
    %185 = vector.load %arg5[%c8_221, %c0_222, %c0_223] : memref<9x8x128xbf16, #tpu.memory_space<vmem>>, vector<1x8x128xbf16>
    %186 = vector.shape_cast %185 : vector<1x8x128xbf16> to vector<8x128xbf16>
    %cst_224 = arith.constant dense<0.000000e+00> : vector<64x128xf32>
    %187 = tpu.matmul %184, %186, %cst_224 {dimension_numbers = #tpu.dot_dimension_numbers<[1], [0], [0], [1], [0, 0, 1, 1], [], []>} : vector<64x8xbf16>, vector<8x128xbf16>, vector<64x128xf32> -> vector<64x128xf32>
    %c0_225 = arith.constant 0 : index
    %c0_226 = arith.constant 0 : index
    %188 = vector.load %arg12[%c0_225, %c0_226] : memref<64x128xf32, #tpu.memory_space<vmem>>, vector<64x128xf32>
    %189 = arith.addf %188, %187 : vector<64x128xf32>
    %c0_227 = arith.constant 0 : index
    %c0_228 = arith.constant 0 : index
    %190 = vector.load %arg12[%c0_227, %c0_228] : memref<64x128xf32, #tpu.memory_space<vmem>>, vector<64x128xf32>
    tpu.vector_store %arg12[%c0_227, %c0_228], %189 {strides = array<i32>} : memref<64x128xf32, #tpu.memory_space<vmem>>, vector<64x128xf32>,
    %c0_229 = arith.constant 0 : index
    %c0_230 = arith.constant 0 : index
    %191 = vector.load %arg12[%c0_229, %c0_230] : memref<64x128xf32, #tpu.memory_space<vmem>>, vector<64x128xf32>
    %c0_231 = arith.constant 0 : index
    %c0_232 = arith.constant 0 : index
    %192 = vector.load %arg6[%c0_231, %c0_232] : memref<1x128xf32, #tpu.memory_space<vmem>>, vector<1x128xf32>
    %193 = vector.broadcast %192 : vector<1x128xf32> to vector<64x128xf32>
    %194 = arith.mulf %191, %193 : vector<64x128xf32>
    %c0_233 = arith.constant 0 : index
    %c0_234 = arith.constant 0 : index
    %195 = vector.load %arg7[%c0_233, %c0_234] : memref<1x128xf32, #tpu.memory_space<vmem>>, vector<1x128xf32>
    %196 = vector.broadcast %195 : vector<1x128xf32> to vector<64x128xf32>
    %197 = arith.addf %194, %196 : vector<64x128xf32>
    %cst_235 = arith.constant 0.000000e+00 : f32
    %198 = vector.broadcast %cst_235 : f32 to vector<64x128xf32>
    %199 = arith.maximumf %197, %198 : vector<64x128xf32>
    %200 = vector.shape_cast %199 : vector<64x128xf32> to vector<1x64x128xf32>
    %c0_236 = arith.constant 0 : index
    %c0_237 = arith.constant 0 : index
    %c0_238 = arith.constant 0 : index
    %201 = vector.load %arg8[%c0_236, %c0_237, %c0_238] : memref<1x64x128xf32, #tpu.memory_space<vmem>>, vector<1x64x128xf32>
    tpu.vector_store %arg8[%c0_236, %c0_237, %c0_238], %200 {strides = array<i32>} : memref<1x64x128xf32, #tpu.memory_space<vmem>>, vector<1x64x128xf32>,
    return
  }
  func.func @transform_0(%arg0: i32) -> (i32, i32, i32, i32, i32) {
    %c0_i32 = arith.constant 0 : i32
    %c0_i32_0 = arith.constant 0 : i32
    %c0_i32_1 = arith.constant 0 : i32
    %c0_i32_2 = arith.constant 0 : i32
    %c0_i32_3 = arith.constant 0 : i32
    return %arg0, %c0_i32, %c0_i32_0, %c0_i32_1, %c0_i32_2 : i32, i32, i32, i32, i32
  }
  func.func @transform_1(%arg0: i32) -> (i32, i32, i32) {
    %c0_i32 = arith.constant 0 : i32
    %c0_i32_0 = arith.constant 0 : i32
    %c0_i32_1 = arith.constant 0 : i32
    %c0_i32_2 = arith.constant 0 : i32
    return %c0_i32, %c0_i32_0, %c0_i32_1 : i32, i32, i32
  }
  func.func @transform_2(%arg0: i32) -> (i32, i32) {
    %c0_i32 = arith.constant 0 : i32
    %c0_i32_0 = arith.constant 0 : i32
    %c0_i32_1 = arith.constant 0 : i32
    return %c0_i32, %c0_i32_0 : i32, i32
  }
  func.func @transform_3(%arg0: i32) -> (i32, i32) {
    %c0_i32 = arith.constant 0 : i32
    %c0_i32_0 = arith.constant 0 : i32
    %c0_i32_1 = arith.constant 0 : i32
    return %c0_i32, %c0_i32_0 : i32, i32
  }
  func.func @transform_4(%arg0: i32) -> (i32, i32, i32) {
    %c0_i32 = arith.constant 0 : i32
    %c0_i32_0 = arith.constant 0 : i32
    %c0_i32_1 = arith.constant 0 : i32
    %c0_i32_2 = arith.constant 0 : i32
    return %c0_i32, %c0_i32_0, %c0_i32_1 : i32, i32, i32
  }
  func.func @transform_5(%arg0: i32) -> (i32, i32) {
    %c0_i32 = arith.constant 0 : i32
    %c0_i32_0 = arith.constant 0 : i32
    %c0_i32_1 = arith.constant 0 : i32
    return %c0_i32, %c0_i32_0 : i32, i32
  }
  func.func @transform_6(%arg0: i32) -> (i32, i32) {
    %c0_i32 = arith.constant 0 : i32
    %c0_i32_0 = arith.constant 0 : i32
    %c0_i32_1 = arith.constant 0 : i32
    return %c0_i32, %c0_i32_0 : i32, i32
  }
  func.func @transform_7(%arg0: i32) -> (i32, i32, i32) {
    %c0_i32 = arith.constant 0 : i32
    %c0_i32_0 = arith.constant 0 : i32
    %c0_i32_1 = arith.constant 0 : i32
    return %arg0, %c0_i32, %c0_i32_0 : i32, i32, i32
  }
}

</mosaic_0001>

<bundles_post_ra>
// kernel: tpu_custom_call.1
= control target key start
LH: loop header
LB: loop body
LE: loop exit
PB: predicated region body
PF: predicated region fallthrough
CT: control target
= control target key end

     0   :  { %12 = vsyncpa [#allocation7], 0  ;;  %s6153_s0 = inlined_call_operand.hbm [shape: f32[2,8,2,8,8], index: 0, kind: input, shape index: {}]   ;;  %s6154_s1 = inlined_call_operand.vmem [shape: bf16[9,4,8], index: 1, kind: input, shape index: {}]   ;;  %s6155_s2 = inlined_call_operand.vmem [shape: f32[1,8], index: 2, kind: input, shape index: {}]   ;;  %s6156_s3 = inlined_call_operand.vmem [shape: f32[1,8], index: 3, kind: input, shape index: {}]   ;;  %s6157_s4 = inlined_call_operand.vmem [shape: bf16[9,8,128], index: 4, kind: input, shape index: {}]   ;;  %s6158_s5 = inlined_call_operand.vmem [shape: f32[1,128], index: 5, kind: input, shape index: {}]   ;;  %s6159_s6 = inlined_call_operand.vmem [shape: f32[1,128], index: 6, kind: input, shape index: {}]   ;;  %s6160_s7 = inlined_call_operand.hbm [shape: f32[2,64,128], index: 7, kind: output, shape index: {}]  }
   0x1   :  { %14 = vsyncpa [#allocation7 + $0x1], 0 }
   0x2   :  { %15 = vsyncpa [#allocation8], 0 }
   0x3   :  { %17 = vsyncpa [#allocation8 + $0x1], 0  ;;  %s5216_s24 = smov 0   ;;  %s5218_s25 = smov 0  }
   0x4   :  { %s5220_s26 = smov 0   ;;  %s5222_s27 = smov 0  }
   0x5 LB: > { %s5237_s28 = sadd.s32 4294967295, %s5166_s27   ;;  %s4367_s29 = sadd.s32 4294967294, %s5166_s27   ;;  %s5166_s27 = sphi %s5222_s27, %s6189_s27   ;;  %s5162_s26 = sphi %s5220_s26, %s6188_s26   ;;  %s5158_s25 = sphi %s5218_s25, %s6187_s25   ;;  %s5154_s24 = sphi %s5216_s24, %s6186_s24  }
   0x6   : > { %s5241_s30 = sadd.s32 1, %s5166_s27   ;;  %s30_s8 = sadd.s32 1, %s5162_s26 }
   0x7   : > { %s27_s9 = ssub.s32 %s5166_s27, %s5241_s30  ;;  %p37_p0 = scmp.ne.s32.totalorder %s5162_s26, %s5158_s25 }
   0x8   : > { %p28_p1 = scmp.eq.s32.totalorder %s27_s9, 0  ;;  %p38_p2 = scmp.eq.s32.totalorder %s5166_s27, 0 }
   0x9   : > { %p43_p3 = scmp.ne.s32.totalorder %s5158_s25, %s5154_s24  ;;  %p44_p4 = scmp.eq.s32.totalorder %s5237_s28, 0 }
   0xa   : > { %s5253_s10 = scalar_select %p28_p1, %s5162_s26, %s30_s8  }
   0xb   : > { %p5255_p5 = por %p38_p2, %p37_p0  ;;  %p5259_p6 = por %p44_p4, %p43_p3 }
   0xc   : > { %p193_p7 = scmp.eq.s32.totalorder %s5237_s28, 1  ;;  %p199_p8 = scmp.eq.s32.totalorder %s4367_s29, 1 }
   0xd   : > { %p4991_p10 = scmp.lt.s32.totalorder %s5166_s27, 2  ;;  %s237_s15 = sand.u32 1, %s5162_s26  }
   0xe   : > { %p5266_p11 = por %p193_p7, %p37_p0  ;;  %p5270_p12 = por %p199_p8, %p43_p3 }
   0xf   : > { %s4609_s16 = sshll.u32 %s5166_s27, 11  ;;  %s4370_s17 = sshll.u32 %s237_s15, 7 }
  0x10   : > { %s6164_s13 = scalar_select %p5266_p11, 1, 0 }
  0x11   : > { %s6165_s14 = scalar_select %p5270_p12, 1, 0 }
  0x12   : > { %s5279_s20 = scalar_lea.hbm %s6153_s0, %s4609_s16  ;;  %s241_s21 = scalar_lea.vmem [#allocation6], %s4370_s17 }
  0x13   : > { %s248_s22 = sshll.u32 %s241_s21, 4  ;;  %p5283_p13 = pnand %p4991_p10, %p5255_p5  ;;  %s5287_s22 = int_to_ptr.vmem [resolvable:$true] %s248_s22 }
  0x14   : > { %s5289_s29 = scalar_lea.sflag [#allocation7], %s237_s15  ;;  %s5070_s8 = scalar_lea.hbm %s5279_s20, 2048 }
  0x15   : > { %p5071_p0 = scmp.ne.s32.totalorder %s5279_s20, %s5070_s8  ;;  %p5072_p1 = pneg %p5283_p13 }
  0x16   : > { %s5075_s16 = scalar_lea.hbm %s6153_s0, 4096  ;;  %p5076_p4 = scmp.lt.u32.totalorder %s5279_s20, %s6153_s0 }
  0x17   : > { %p5073_p2 = pnand %p5072_p1, %p5071_p0  ;;  %p5077_p5 = scmp.lt.u32.totalorder %s5075_s16, %s5070_s8 }
  0x18   : > { %p5079_p8 = scmp.lt.u32.totalorder %s5070_s8, %s5279_s20 }
  0x19   : > { %p5074_p3 = pneg %p5073_p2  ;;  %p5078_p7 = por %p5077_p5, %p5076_p4 }
  0x1b   : > { %p5080_p10 = por %p5079_p8, %p5078_p7 }
  0x1d   : > { %p5081_p9 = pnand %p5080_p10, %p5074_p3 }
  0x1f   : > { %5084 = shalt.err (!%p5081_p9)
}
  0x20   : > { %s5085_s15 = scalar_lea.vmem %s5287_s22, 2048  ;;  %s5168_s19 = smov [#allocation6]  }
  0x21   : > { %p5086_p0 = scmp.ne.s32.totalorder %s5287_s22, %s5085_s15  ;;  %s5090_s21 = sshll.u32 %s5168_s19, 4  ;;  %s5091_s21 = int_to_ptr.vmem [resolvable:$false] %s5090_s21 }
  0x22   : > { %s5092_s9 = scalar_lea.vmem %s5091_s21, 4096  ;;  %p5093_p11 = scmp.lt.s32.totalorder %s5287_s22, %s5091_s21 }
  0x23   : > { %p5088_p2 = pnand %p5086_p0, %p5072_p1  ;;  %p5094_p4 = scmp.lt.s32.totalorder %s5092_s9, %s5085_s15 }
  0x25   : > { %p5089_p12 = pneg %p5088_p2  ;;  %p5095_p5 = por %p5094_p4, %p5093_p11 }
  0x27   : > { %p5096_p7 = pnand %p5095_p5, %p5089_p12 }
  0x29   : > { %5099 = shalt.err (!%p5096_p7)
}
  0x2a   : > { %s5169_s8 = smov 128   ;;  %s5170_s11 = smov 8  }
  0x2b   : > { %4986 = dma.hbm_to_vmem [thread:$0]  (!%p5283_p13), %s5279_s20, 2048, %s5287_s22, %s5289_s29, %s5169_s8, %s5169_s8, %s5170_s11  }
  0x2c   : > { %p4373_p9 = scmp.ge.s32.totalorder %s5166_s27, 1  ;;  %p256_p1 = scmp.lt.s32.totalorder %s5166_s27, 3 }
  0x2e   : > { %p257_p3 = pnand %p4373_p9, %p256_p1 }
  0x2f   : > { %s5320_s16 = sand.u32 (!%p257_p3), 1, %s5158_s25  }
  0x30   : > { %260 = sbr.rel (%p257_p3) target bundleno = 964 (0x3c4), region = 48  ;;  %s4374_s17 = sshll.u32 (!%p257_p3), %s5320_s16, 7 }
  0x31   : > { %s263_s18 = scalar_lea.sflag (!%p257_p3), [#allocation7], %s5320_s16  ;;  %s5324_s15 = scalar_lea.vmem (!%p257_p3), [#allocation6], %s4374_s17 }
  0x37   : > { %5145 = dma.done.wait (%p5259_p6), %s263_s18, 2048  }
  0x38   : > { %5147 = vsyncadd (%p5259_p6), %s263_s18, 4294965248  ;;  %vm362_vm0 = vcmask 27648   ;;  %vm364_vm1 = vcmask 24576   ;;  %vm434_vm2 = vcmask 60416   ;;  %v5171_v0 = vmov 0   ;;  %v304_v4 = vld [vmem:[%s5324_s15 + $0x30] sm:$0xff] }
  0x39   : > { %363 = vst.msk [vmem:[#allocation2] sm:$0xf] %vm362_vm0, %v5171_v0  ;;  %367 = vst.msk [vmem:[#allocation2 + $0x48] sm:$0xf] %vm362_vm0, %v5171_v0  ;;  %vm436_vm3 = vcmask 57344   ;;  %v305_v5 = vld [vmem:[%s5324_s15 + $0x38] sm:$0xff] }
  0x3a   : > { %365 = vst.msk [vmem:[#allocation2 + $0x4] sm:$0x1] %vm364_vm1, %v5171_v0  ;;  %368 = vst.msk [vmem:[#allocation2 + $0x4c] sm:$0x1] %vm364_vm1, %v5171_v0  ;;  %vm370_vm4 = vsmask.f32 256  ;;  %v5358_v8 = vmax.f32 %v304_v4, %v305_v5 }
  0x3b   : > { %435 = vst.msk [vmem:[#allocation3] sm:$0xf] %vm434_vm2, %v5171_v0  ;;  %439 = vst.msk [vmem:[#allocation3 + $0x48] sm:$0xf] %vm434_vm2, %v5171_v0  ;;  %vm402_vm7 = vsmask.f32 7938 }
  0x3c   : > { %437 = vst.msk [vmem:[#allocation3 + $0x4] sm:$0x1] %vm436_vm3, %v5171_v0  ;;  %440 = vst.msk [vmem:[#allocation3 + $0x4c] sm:$0x1] %vm436_vm3, %v5171_v0  ;;  %v306_v6 = vld [vmem:[%s5324_s15 + $0x40] sm:$0xff]  ;;  %v307_v7 = vld [vmem:[%s5324_s15 + $0x48] sm:$0xff] }
  0x3d   : > { %vm5339_vm5 = vmand %vm436_vm3, %vm370_vm4  ;;  %v298_v9 = vld [vmem:[%s5324_s15] sm:$0xff]  ;;  %v299_v10 = vld [vmem:[%s5324_s15 + $0x8] sm:$0xff]  ;;  %v5362_v11 = vmax.f32 %v306_v6, %v307_v7  ;;  %s5172_s12 = smov 124   ;;  %vm709_vm12 = vcmask 1041408   ;;  %vm696_vm13 = vcmask 31744   ;;  %s4375_s21 = sshll.u32 %s5320_s16, 6 }
  0x3e   : > { %vm5344_vm6 = vmand %vm364_vm1, %vm370_vm4  ;;  %v300_v12 = vld [vmem:[%s5324_s15 + $0x10] sm:$0xff]  ;;  %v301_v13 = vld [vmem:[%s5324_s15 + $0x18] sm:$0xff]  ;;  %v5366_v14 = vmax.f32 %v298_v9, %v299_v10  ;;  %vm803_vm14 = vsmask.f32 3328  ;;  %vm804_vm15 = vsmask.f32 7440 }
  0x3f   : > { %vm5350_vm8 = vmand %vm362_vm0, %vm402_vm7  ;;  %v308_v15 = vld [vmem:[%s5324_s15 + $0x50] sm:$0xff]  ;;  %v5369_v16 = vmax.f32 %v300_v12, %v301_v13  ;;  %v309_v17 = vld [vmem:[%s5324_s15 + $0x58] sm:$0xff]  ;;  %v5036_v20 = vpack.i.bf16 %v5362_v11, %v5358_v8  ;;  %vm778_vm4 = vcmask 64512   ;;  %s296_s9 = scalar_lea.vmem [#allocation9], %s4375_s21  ;;  %s4626_s11 = sshll.u32 %s5237_s28, 10 }
  0x40   : > { %v310_v18 = vld [vmem:[%s5324_s15 + $0x60] sm:$0xff]  ;;  %v311_v19 = vld [vmem:[%s5324_s15 + $0x68] sm:$0xff]  ;;  %v5376_v21 = vmax.f32 %v308_v15, %v309_v17  ;;  %vm5384_vm9 = vmand %vm364_vm1, %vm402_vm7  ;;  %vm1068_vm1 = vcmask 1042432   ;;  %s4294_s8 = sshll.u32 %s296_s9, 4  ;;  %s4281_s28 = scalar_lea.sflag [#allocation8], %s5320_s16  ;;  %s6104_s8 = int_to_ptr.vmem [resolvable:$true] %s4294_s8 }
  0x41   : > { %v5378_v22 = vmax.f32 %v310_v18, %v311_v19  ;;  %v302_v23 = vld [vmem:[%s5324_s15 + $0x20] sm:$0xff]  ;;  %v303_v24 = vld [vmem:[%s5324_s15 + $0x28] sm:$0xff]  ;;  %v5031_v26 = vpack.i.bf16 %v5369_v16, %v5366_v14  ;;  %vm5392_vm10 = vmand %vm436_vm3, %vm402_vm7  ;;  %5037 = vrot.lane.b32.xlu1 %v5036_v20, %s5172_s12  ;;  %p6183_p11 = scmp.ne.s32.totalorder %s6164_s13, 0  ;;  %s5173_s20 = smov [#allocation9]  }
  0x42   : > { %v384_v27 = vld [vmem:[#allocation2 + $0x20] sm:$0x1]  ;;  %v387_v28 = vld [vmem:[#allocation2 + $0x28] sm:$0x1]  ;;  %v312_v31 = vld [vmem:[%s5324_s15 + $0x70] sm:$0xff]  ;;  %v5412_v38 = vmax.f32 %v302_v23, %v303_v24  ;;  %s5104_s22 = sshll.u32 %s5173_s20, 4  ;;  %s5105_s22 = int_to_ptr.vmem [resolvable:$false] %s5104_s22 }
  0x43   : > { %v5041_v30 = vpack.i.bf16 %v5378_v22, %v5376_v21  ;;  %v313_v32 = vld [vmem:[%s5324_s15 + $0x78] sm:$0xff]  ;;  %v385_v33 = vsel %vm5344_vm6, 0, %v384_v27  ;;  %v388_v34 = vsel %vm5344_vm6, 0, %v387_v28  ;;  %v399_v35 = vld [vmem:[#allocation2 + $0x48] sm:$0x1]  ;;  %vm5407_vm11 = vmand %vm434_vm2, %vm402_vm7  ;;  %5032 = vrot.lane.b32.xlu0 %v5031_v26, %s5172_s12  ;;  %vm1069_vm2 = vcmask 1046532   ;;  %s6109_s15 = scalar_lea.hbm %s6160_s7, %s4626_s11  ;;  %p5107_p8 = scmp.lt.s32.totalorder %s6104_s8, %s5105_s22 }
  0x44   : > { %v416_v36 = vld [vmem:[#allocation2 + $0x24] sm:$0x1]  ;;  %386 = vst [vmem:[#allocation2 + $0x20] sm:$0x1] %v385_v33  ;;  %389 = vst [vmem:[#allocation2 + $0x28] sm:$0x1] %v388_v34  ;;  %v5433_v55 = vmax.f32 %v312_v31, %v313_v32 }
  0x45   : > { %v400_v39 = vsel %vm5344_vm6, 0, %v399_v35  ;;  %v417_v40 = vsel %vm5384_vm9, 0, %v416_v36  ;;  %v419_v41 = vld [vmem:[#allocation2 + $0x2c] sm:$0x1]  ;;  %v480_v42 = vld [vmem:[#allocation3 + $0x14] sm:$0x1]  ;;  %5042 = vrot.lane.b32.xlu1 %v5041_v30, %s5172_s12  ;;  %vm5539_vm0 = vmor %vm803_vm14, %vm804_vm15 }
  0x46   : > { %401 = vst [vmem:[#allocation2 + $0x48] sm:$0x1] %v400_v39  ;;  %418 = vst [vmem:[#allocation2 + $0x24] sm:$0x1] %v417_v40  ;;  %v420_v43 = vsel %vm5384_vm9, 0, %v419_v41  ;;  %v481_v44 = vsel %vm5392_vm10, 0, %v480_v42 }
  0x47   : > { %v483_v45 = vld [vmem:[#allocation3 + $0x1c] sm:$0x1]  ;;  %v375_v46 = vld [vmem:[#allocation2 + $0x8] sm:$0x1]  ;;  %421 = vst [vmem:[#allocation2 + $0x2c] sm:$0x1] %v420_v43  ;;  %334 = vrot.lane.b32.xlu0 %v5412_v38, %s5172_s12  ;;  %vm5570_vm3 = vmor %vm1068_vm1, %vm1069_vm2 }
  0x48   : > { %482 = vst [vmem:[#allocation3 + $0x14] sm:$0x1] %v481_v44  ;;  %v484_v47 = vsel %vm5392_vm10, 0, %v483_v45  ;;  %v376_v48 = vsel %vm5344_vm6, 0, %v375_v46  ;;  %v378_v49 = vld [vmem:[#allocation2 + $0x10] sm:$0x1] }
  0x49   : > { %v407_v50 = vld [vmem:[#allocation2 + $0xc] sm:$0x1]  ;;  %485 = vst [vmem:[#allocation3 + $0x1c] sm:$0x1] %v484_v47  ;;  %377 = vst [vmem:[#allocation2 + $0x8] sm:$0x1] %v376_v48 }
  0x4a   : > { %v379_v51 = vsel %vm5344_vm6, 0, %v378_v49  ;;  %v408_v52 = vsel %vm5384_vm9, 0, %v407_v50  ;;  %v410_v53 = vld [vmem:[#allocation2 + $0x14] sm:$0x1]  ;;  %v390_v54 = vld [vmem:[#allocation2 + $0x30] sm:$0x1] }
  0x4b   : > { %380 = vst [vmem:[#allocation2 + $0x10] sm:$0x1] %v379_v51  ;;  %409 = vst [vmem:[#allocation2 + $0xc] sm:$0x1] %v408_v52  ;;  %v411_v56 = vsel %vm5384_vm9, 0, %v410_v53  ;;  %v391_v57 = vsel %vm5344_vm6, 0, %v390_v54  ;;  %344 = vrot.lane.b32.xlu0 %v5433_v55, %s5172_s12 }
  0x4c   : > { %v393_v58 = vld [vmem:[#allocation2 + $0x38] sm:$0x1]  ;;  %v422_v59 = vld [vmem:[#allocation2 + $0x34] sm:$0x1]  ;;  %412 = vst [vmem:[#allocation2 + $0x14] sm:$0x1] %v411_v56 }
  0x4d   : > { %392 = vst [vmem:[#allocation2 + $0x30] sm:$0x1] %v391_v57  ;;  %v394_v60 = vsel %vm5344_vm6, 0, %v393_v58  ;;  %v423_v61 = vsel %vm5384_vm9, 0, %v422_v59  ;;  %v425_v62 = vld [vmem:[#allocation2 + $0x3c] sm:$0x1] }
  0x4e   : > { %v381_v63 = vld [vmem:[#allocation2 + $0x18] sm:$0x1]  ;;  %395 = vst [vmem:[#allocation2 + $0x38] sm:$0x1] %v394_v60  ;;  %424 = vst [vmem:[#allocation2 + $0x34] sm:$0x1] %v423_v61 }
  0x4f   : > { %v426_v0 = vsel %vm5384_vm9, 0, %v425_v62  ;;  %v382_v4 = vsel %vm5344_vm6, 0, %v381_v63  ;;  %v413_v5 = vld [vmem:[#allocation2 + $0x1c] sm:$0x1]  ;;  %v396_v6 = vld [vmem:[#allocation2 + $0x40] sm:$0x1] }
  0x50   : > { %427 = vst [vmem:[#allocation2 + $0x3c] sm:$0x1] %v426_v0  ;;  %383 = vst [vmem:[#allocation2 + $0x18] sm:$0x1] %v382_v4  ;;  %v414_v7 = vsel %vm5384_vm9, 0, %v413_v5  ;;  %v397_v9 = vsel %vm5344_vm6, 0, %v396_v6 }
  0x51   : > { %415 = vst [vmem:[#allocation2 + $0x1c] sm:$0x1] %v414_v7  ;;  %398 = vst [vmem:[#allocation2 + $0x40] sm:$0x1] %v397_v9  ;;  %v428_v10 = vld [vmem:[#allocation2 + $0x44] sm:$0x1] }
  0x52   : > { %v372_v12 = vld [vmem:[#allocation2] sm:$0x1]  ;;  %v429_v13 = vsel %vm5384_vm9, 0, %v428_v10  ;;  %v404_v17 = vld [vmem:[#allocation2 + $0x4] sm:$0x1]  ;;  %s5100_s12 = scalar_lea.vmem %s6104_s8, 1024 }
  0x53   : > { %v373_v15 = vsel %vm5344_vm6, 0, %v372_v12  ;;  %430 = vst [vmem:[#allocation2 + $0x44] sm:$0x1] %v429_v13  ;;  %v675_v18 = vld [vmem:[%s6154_s1] sm:$0x3]  ;;  %v405_v20 = vsel %vm5384_vm9, 0, %v404_v17  ;;  %p5101_p6 = scmp.ne.s32.totalorder %s6104_s8, %s5100_s12 }
  0x54   : > { %374 = vst [vmem:[#allocation2] sm:$0x1] %v373_v15  ;;  %4961 = vmatprep.subr.msk.bf16.mxu0 %vm709_vm12, %v675_v18  ;;  %v711_v19 = vsel %vm709_vm12, %v675_v18, 0  ;;  %v5467_v23 = vld [vmem:[%s6154_s1 + $0x2] sm:$0x3]  ;;  %s5106_s23 = scalar_lea.vmem %s5105_s22, 2048 }
  0x55   : > { %4718 = vmatpush3.bf16.msra.mxu0 %v711_v19  ;;  %406 = vst [vmem:[#allocation2 + $0x4] sm:$0x1] %v405_v20  ;;  %v431_v42 = vld [vmem:[#allocation2 + $0x4c] sm:$0x1]  ;;  %v637_v52 = vld [vmem:[#allocation2 + $0x20] sm:$0xf]  ;;  %p5102_p12 = pnand %p5101_p6, %p6183_p11  ;;  %p5108_p10 = scmp.lt.s32.totalorder %s5106_s23, %s5100_s12 }
  0x56   : > { %4962 = vmatprep.subr.msk.bf16.mxu0 %vm709_vm12, %v5467_v23  ;;  %v643_v53 = vld [vmem:[#allocation2 + $0x28] sm:$0xf]  ;;  %v640_v59 = vld [vmem:[#allocation2 + $0x24] sm:$0x1]  ;;  %v646_v60 = vld [vmem:[#allocation2 + $0x2c] sm:$0x1] }
  0x57   : > { %v619_v0 = vld [vmem:[#allocation2 + $0x8] sm:$0xf]  ;;  %v622_v4 = vld [vmem:[#allocation2 + $0xc] sm:$0x1]  ;;  %v625_v17 = vld [vmem:[#allocation2 + $0x10] sm:$0xf]  ;;  %p5103_p13 = pneg %p5102_p12  ;;  %p5109_p0 = por %p5108_p10, %p5107_p8 }
  0x58   : > { %v628_v18 = vld [vmem:[#allocation2 + $0x14] sm:$0x1] }
  0x59   : > { %p5110_p2 = pnand %p5109_p0, %p5103_p13 }
  0x5b   : > { %v5471_v30 = vld [vmem:[#allocation2] sm:$0xf] }
  0x5c   : > { %v807_v40 = vshrl.u32 %v5471_v30, 16  ;;  %v810_v41 = vshll.u32 %v5471_v30, 16 }
  0xb3   : > { %v5038_v24 = vpop.permute.xlu1 %5037 }
  0xb4   : > { %v5040_v26 = vunpack.i.h.bf16 %v5038_v24  ;;  %v5039_v27 = vunpack.i.l.bf16 %v5038_v24 }
  0xb5   : > { %v5033_v28 = vpop.permute.xlu0 %5032 }
  0xb6   : > { %v5035_v31 = vunpack.i.h.bf16 %v5033_v28  ;;  %v5034_v32 = vunpack.i.l.bf16 %v5033_v28  ;;  %v358_v33 = vmax.f32 %v5362_v11, %v5040_v26  ;;  %v357_v34 = vmax.f32 %v5358_v8, %v5039_v27 }
  0xb7   : > { %v5043_v39 = vpop.permute.xlu1 %5042  ;;  %v432_v8 = vsel %vm5384_vm9, 0, %v431_v42  ;;  %v5501_v42 = vld [vmem:[#allocation2 + $0x4] sm:$0x1] }
  0xb8   : > { %v355_v35 = vmax.f32 %v5369_v16, %v5035_v31  ;;  %v354_v36 = vmax.f32 %v5366_v14, %v5034_v32  ;;  %v4614_v43 = vpack.c.bf16 %v358_v33, %v358_v33  ;;  %v4613_v44 = vpack.c.bf16 %v357_v34, %v357_v34  ;;  %433 = vst [vmem:[#allocation2 + $0x4c] sm:$0x1] %v432_v8  ;;  %v655_v8 = vld [vmem:[#allocation2 + $0x38] sm:$0xf] }
  0xb9   : > { %v5045_v45 = vunpack.i.h.bf16 %v5043_v39  ;;  %v5044_v46 = vunpack.i.l.bf16 %v5043_v39  ;;  %v335_v47 = vpop.permute.xlu0 %334  ;;  %v816_v30 = vshll.u32 %v5501_v42, 16  ;;  %v5536_v42 = vld [vmem:[%s6154_s1 + $0x4] sm:$0x3] }
  0xba   : > { %v4611_v48 = vpack.c.bf16 %v355_v35, %v355_v35  ;;  %v4610_v49 = vpack.c.bf16 %v354_v36, %v354_v36  ;;  %v356_v11 = vmax.f32 %v5412_v38, %v335_v47  ;;  %v569_v16 = vshrl.u32 %v4614_v43, 16 }
  0xbb   : > { %v572_v14 = vshll.u32 %v4614_v43, 16  ;;  %v561_v50 = vshrl.u32 %v4613_v44, 16  ;;  %v564_v51 = vshll.u32 %v4613_v44, 16  ;;  %v360_v38 = vmax.f32 %v5378_v22, %v5045_v45 }
  0xbc   : > { %v545_v54 = vshrl.u32 %v4611_v48, 16  ;;  %v548_v56 = vshll.u32 %v4611_v48, 16  ;;  %v537_v57 = vshrl.u32 %v4610_v49, 16  ;;  %v540_v58 = vshll.u32 %v4610_v49, 16  ;;  %v649_v49 = vld [vmem:[#allocation2 + $0x30] sm:$0xf] }
  0xbd   : > { %v571_v61 = vrot.slane %v569_v16, 7  ;;  %v563_v62 = vrot.slane %v561_v50, 7  ;;  %v359_v25 = vmax.f32 %v5376_v21, %v5044_v46  ;;  %v345_v63 = vpop.permute.xlu0 %344  ;;  %v4612_v7 = vpack.c.bf16 %v356_v11, %v356_v11  ;;  %v652_v11 = vld [vmem:[#allocation2 + $0x34] sm:$0x1]  ;;  %v658_v16 = vld [vmem:[#allocation2 + $0x3c] sm:$0x1] }
  0xbe   : > { %v547_v5 = vrot.slane %v545_v54, 7  ;;  %v539_v6 = vrot.slane %v537_v57, 7  ;;  %v361_v9 = vmax.f32 %v5433_v55, %v345_v63  ;;  %v4616_v34 = vpack.c.bf16 %v360_v38, %v360_v38 }
  0xbf   : > { %v574_v10 = vor.u32 %v572_v14, %v571_v61  ;;  %v575_v12 = vrot.slane %v571_v61, 4  ;;  %v566_v13 = vor.u32 %v564_v51, %v563_v62  ;;  %v567_v15 = vrot.slane %v563_v62, 4  ;;  %v631_v14 = vld [vmem:[#allocation2 + $0x18] sm:$0xf] }
  0xc0   : > { %v550_v19 = vor.u32 %v548_v56, %v547_v5  ;;  %v551_v20 = vrot.slane %v547_v5, 4  ;;  %v542_v24 = vor.u32 %v540_v58, %v539_v6  ;;  %v543_v22 = vrot.slane %v539_v6, 4  ;;  %v634_v56 = vld [vmem:[#allocation2 + $0x1c] sm:$0x1]  ;;  %v661_v58 = vld [vmem:[#allocation2 + $0x40] sm:$0xf] }
  0xc1   : > { %v644_v21 = vsel %vm5350_vm8, %v574_v10, %v643_v53  ;;  %v647_v26 = vsel %vm5344_vm6, %v575_v12, %v646_v60  ;;  %v638_v27 = vsel %vm5350_vm8, %v566_v13, %v637_v52  ;;  %v641_v55 = vsel %vm5344_vm6, %v567_v15, %v640_v59  ;;  %v664_v59 = vld [vmem:[#allocation2 + $0x44] sm:$0x1] }
  0xc2   : > { %645 = vst [vmem:[#allocation2 + $0x28] sm:$0xf] %v644_v21  ;;  %648 = vst [vmem:[#allocation2 + $0x2c] sm:$0x1] %v647_v26  ;;  %v626_v28 = vsel %vm5350_vm8, %v550_v19, %v625_v17  ;;  %v629_v31 = vsel %vm5344_vm6, %v551_v20, %v628_v18  ;;  %v620_v32 = vsel %vm5350_vm8, %v542_v24, %v619_v0  ;;  %v553_v36 = vshrl.u32 %v4612_v7, 16 }
  0xc3   : > { %639 = vst [vmem:[#allocation2 + $0x20] sm:$0xf] %v638_v27  ;;  %642 = vst [vmem:[#allocation2 + $0x24] sm:$0x1] %v641_v55  ;;  %v623_v33 = vsel %vm5344_vm6, %v543_v22, %v622_v4  ;;  %v4615_v35 = vpack.c.bf16 %v359_v25, %v359_v25  ;;  %v4617_v39 = vpack.c.bf16 %v361_v9, %v361_v9  ;;  %v5505_v43 = vrot.slane %v807_v40, 4 }
  0xc4   : > { %627 = vst [vmem:[#allocation2 + $0x10] sm:$0xf] %v626_v28  ;;  %630 = vst [vmem:[#allocation2 + $0x14] sm:$0x1] %v629_v31  ;;  %v5509_v44 = vrot.slane %v810_v41, 5  ;;  %v585_v45 = vshrl.u32 %v4616_v34, 16 }
  0xc5   : > { %621 = vst [vmem:[#allocation2 + $0x8] sm:$0xf] %v620_v32  ;;  %624 = vst [vmem:[#allocation2 + $0xc] sm:$0x1] %v623_v33  ;;  %v588_v46 = vshll.u32 %v4616_v34, 16  ;;  %v577_v47 = vshrl.u32 %v4615_v35, 16 }
  0xc6   : > { %v580_v48 = vshll.u32 %v4615_v35, 16  ;;  %v555_v50 = vrot.slane %v553_v36, 7  ;;  %v556_v51 = vshll.u32 %v4612_v7, 16  ;;  %v593_v52 = vshrl.u32 %v4617_v39, 16 }
  0xc7   : > { %v596_v53 = vshll.u32 %v4617_v39, 16  ;;  %v587_v54 = vrot.slane %v585_v45, 7  ;;  %v579_v40 = vrot.slane %v577_v47, 7  ;;  %v813_v61 = vor.u32 %v5509_v44, %v5505_v43 }
  0xc8   : > { %v558_v41 = vor.u32 %v556_v51, %v555_v50  ;;  %v559_v57 = vrot.slane %v555_v50, 4  ;;  %v595_v60 = vrot.slane %v593_v52, 7  ;;  %v945_v27 = vsel %vm709_vm12, %v5467_v23, 0 }
  0xc9   : > { %v590_v62 = vor.u32 %v588_v46, %v587_v54  ;;  %v591_v38 = vrot.slane %v587_v54, 4  ;;  %v582_v25 = vor.u32 %v580_v48, %v579_v40  ;;  %v583_v63 = vrot.slane %v579_v40, 4  ;;  %v797_v35 = vld [vmem:[#allocation2 + $0x28] sm:$0xf]  ;;  %v798_v52 = vld [vmem:[#allocation2 + $0x2c] sm:$0x1] }
  0xca   : > { %v632_v0 = vsel %vm5350_vm8, %v558_v41, %v631_v14  ;;  %v635_v4 = vsel %vm5344_vm6, %v559_v57, %v634_v56  ;;  %v598_v5 = vor.u32 %v596_v53, %v595_v60  ;;  %v599_v6 = vrot.slane %v595_v60, 4  ;;  %v795_v3 = vld [vmem:[#allocation2 + $0x20] sm:$0xf]  ;;  %v796_v44 = vld [vmem:[#allocation2 + $0x24] sm:$0x1] }
  0xcb   : > { %v656_v9 = vsel %vm5350_vm8, %v590_v62, %v655_v8  ;;  %v659_v10 = vsel %vm5344_vm6, %v591_v38, %v658_v16  ;;  %v650_v12 = vsel %vm5350_vm8, %v582_v25, %v649_v49  ;;  %v653_v13 = vsel %vm5344_vm6, %v583_v63, %v652_v11  ;;  %633 = vst [vmem:[#allocation2 + $0x18] sm:$0xf] %v632_v0  ;;  %v791_v24 = vld [vmem:[#allocation2 + $0x10] sm:$0xf]  ;;  %v5048_v39 = vld [vmem:[#allocation2 + $0x20] ss:$8 sps:$4 sm:$0xff]  }
  0xcc   : > { %v5046_v7 = vld [vmem:[#allocation2] ss:$8 sps:$4 sm:$0xff]   ;;  %636 = vst [vmem:[#allocation2 + $0x1c] sm:$0x1] %v635_v4  ;;  %657 = vst [vmem:[#allocation2 + $0x38] sm:$0xf] %v656_v9  ;;  %v662_v17 = vsel %vm5350_vm8, %v598_v5, %v661_v58  ;;  %v665_v18 = vsel %vm5344_vm6, %v599_v6, %v664_v59 }
  0xcd   : > { %v789_v15 = vld [vmem:[#allocation2 + $0x8] sm:$0xf]  ;;  %660 = vst [vmem:[#allocation2 + $0x3c] sm:$0x1] %v659_v10  ;;  %651 = vst [vmem:[#allocation2 + $0x30] sm:$0xf] %v650_v12  ;;  %4719 = vmatprep.mubr.msk.bf16.mxu0 %vm696_vm13, %v5046_v7 }
  0xce   : > { %654 = vst [vmem:[#allocation2 + $0x34] sm:$0x1] %v653_v13  ;;  %v821_v19 = vshrl.u32 %v789_v15, 16  ;;  %v824_v20 = vshll.u32 %v789_v15, 16  ;;  %663 = vst [vmem:[#allocation2 + $0x40] sm:$0xf] %v662_v17 }
  0xcf   : > { %666 = vst [vmem:[#allocation2 + $0x44] sm:$0x1] %v665_v18  ;;  %v790_v22 = vld [vmem:[#allocation2 + $0xc] sm:$0x1]  ;;  %v835_v21 = vshrl.u32 %v791_v24, 16  ;;  %v838_v26 = vshll.u32 %v791_v24, 16 }
  0xd0   : > { %v823_v55 = vrot.slane %v821_v19, 4  ;;  %v826_v28 = vrot.slane %v824_v20, 5  ;;  %v818_v2 = vrot.slane %v816_v30, 5  ;;  %v863_v31 = vshrl.u32 %v795_v3, 16  ;;  %v792_v57 = vld [vmem:[#allocation2 + $0x14] sm:$0x1] }
  0xd1   : > { %v814_v32 = vrot.slane %v813_v61, 4  ;;  %v830_v34 = vshll.u32 %v790_v22, 16  ;;  %v866_v36 = vshll.u32 %v795_v3, 16  ;;  %v837_v43 = vrot.slane %v835_v21, 4 }
  0xd2   : > { %v827_v33 = vor.u32 %v826_v28, %v823_v55  ;;  %v840_v23 = vrot.slane %v838_v26, 5  ;;  %v5047_v45 = vld [vmem:[#allocation2 + $0x10] ss:$8 sps:$4 sm:$0xff]   ;;  %v877_v48 = vshrl.u32 %v797_v35, 16  ;;  %v865_v49 = vrot.slane %v863_v31, 4 }
  0xd3   : > { %v868_v11 = vrot.slane %v866_v36, 5  ;;  %4720 = vmatmul.mubr.msk.bf16.vlgmr.msra.gmra.mrb[0].mxu0 %vm696_vm13, %v5047_v45  ;;  %v832_v8 = vrot.slane %v830_v34, 5  ;;  %v793_v16 = vld [vmem:[#allocation2 + $0x18] sm:$0xf]  ;;  %v819_v14 = vsel %vm5539_vm0, %v814_v32, %v818_v2  ;;  %v794_v40 = vld [vmem:[#allocation2 + $0x1c] sm:$0x1] }
  0xd4   : > { %v828_v47 = vrot.slane %v827_v33, 4  ;;  %4728 = vmatpush3.bf16.msra.mxu0 %v945_v27  ;;  %4723 = vmatprep.mubr.msk.bf16.mxu0 %vm696_vm13, %v5048_v39  ;;  %v849_v50 = vshrl.u32 %v793_v16, 16  ;;  %v852_v51 = vshll.u32 %v793_v16, 16  ;;  %v799_v53 = vld [vmem:[#allocation2 + $0x30] sm:$0xf]  ;;  %v872_v56 = vshll.u32 %v796_v44, 16 }
  0xd5   : > { %4963 = vmatprep.subr.msk.bf16.mxu0 %vm709_vm12, %v5536_v42  ;;  %v879_v30 = vrot.slane %v877_v48, 4  ;;  %v880_v41 = vshll.u32 %v797_v35, 16  ;;  %v841_v58 = vor.u32 %v840_v23, %v837_v43  ;;  %v869_v61 = vor.u32 %v868_v11, %v865_v49  ;;  %v801_v62 = vld [vmem:[#allocation2 + $0x38] sm:$0xf]  ;;  %v800_v18 = vld [vmem:[#allocation2 + $0x34] sm:$0x1] }
  0xd6   : > { %v833_v54 = vsel %vm5539_vm0, %v828_v47, %v832_v8  ;;  %v851_v59 = vrot.slane %v849_v50, 4  ;;  %v854_v60 = vrot.slane %v852_v51, 5  ;;  %v886_v25 = vshll.u32 %v798_v52, 16  ;;  %v5049_v9 = vld [vmem:[#allocation2 + $0x30] ss:$8 sps:$4 sm:$0xff]  }
  0xd7   : > { %v882_v38 = vrot.slane %v880_v41, 5  ;;  %v891_v63 = vshrl.u32 %v799_v53, 16  ;;  %v894_v0 = vshll.u32 %v799_v53, 16  ;;  %v4393_v4 = vcombine.low %v819_v14, %v833_v54  ;;  %v802_v27 = vld [vmem:[#allocation2 + $0x3c] sm:$0x1] }
  0xd8   : > { %v855_v5 = vor.u32 %v854_v60, %v851_v59  ;;  %v858_v6 = vshll.u32 %v794_v40, 16  ;;  %v905_v7 = vshrl.u32 %v801_v62, 16  ;;  %v844_v10 = vshll.u32 %v792_v57, 16  ;;  %v1036_v32 = vld [vmem:[#allocation2] sm:$0xe] }
  0xd9   : > { %v874_v12 = vrot.slane %v872_v56, 5  ;;  %v883_v13 = vor.u32 %v882_v38, %v879_v30  ;;  %v908_v15 = vshll.u32 %v801_v62, 16  ;;  %v893_v19 = vrot.slane %v891_v63, 4  ;;  %v1037_v33 = vld [vmem:[#allocation2 + $0x4] sm:$0x1] }
  0xda   : > { %v856_v17 = vrot.slane %v855_v5, 4  ;;  %v896_v20 = vrot.slane %v894_v0, 5  ;;  %v907_v24 = vrot.slane %v905_v7, 4  ;;  %v870_v22 = vrot.slane %v869_v61, 4  ;;  %v1038_v45 = vld [vmem:[#allocation2 + $0x8] sm:$0xe] }
  0xdb   : > { %4724 = vmatmul.mubr.msk.bf16.gmra.mrb[4].mxu0 %vm696_vm13, %v5049_v9  ;;  %v884_v21 = vrot.slane %v883_v13, 4  ;;  %v888_v26 = vrot.slane %v886_v25, 5  ;;  %v910_v55 = vrot.slane %v908_v15, 5  ;;  %v842_v28 = vrot.slane %v841_v58, 4  ;;  %v1039_v47 = vld [vmem:[#allocation2 + $0xc] sm:$0x1] }
  0xdc   : > { %4729 = vmatprep.mubr.msk.bf16.mxu0 %vm696_vm13, %v4393_v4  ;;  %v860_v3 = vrot.slane %v858_v6, 5  ;;  %v846_v2 = vrot.slane %v844_v10, 5  ;;  %v900_v31 = vshll.u32 %v800_v18, 16  ;;  %v897_v35 = vor.u32 %v896_v20, %v893_v19  ;;  %v4418_v14 = vld [vmem:[%s6154_s1 + $0x6] sm:$0x3] }
  0xdd   : > { %v911_v36 = vor.u32 %v910_v55, %v907_v24  ;;  %v914_v39 = vshll.u32 %v802_v27, 16  ;;  %v875_v43 = vsel %vm5539_vm0, %v870_v22, %v874_v12  ;;  %v889_v23 = vsel %vm5539_vm0, %v884_v21, %v888_v26  ;;  %v1042_v58 = vld [vmem:[#allocation2 + $0x18] sm:$0xe]  ;;  %v1043_v59 = vld [vmem:[#allocation2 + $0x1c] sm:$0x1] }
  0xde   : > { %v861_v34 = vsel %vm5539_vm0, %v856_v17, %v860_v3  ;;  %v847_v44 = vsel %vm5539_vm0, %v842_v28, %v846_v2  ;;  %v4401_v48 = vrot.slane %v1036_v32, 9  ;;  %v1073_v49 = vrot.slane %v1037_v33, 5  ;;  %v1044_v60 = vld [vmem:[#allocation2 + $0x20] sm:$0xe]  ;;  %v1045_v61 = vld [vmem:[#allocation2 + $0x24] sm:$0x1] }
  0xdf   : > { %v4394_v11 = vcombine.low %v847_v44, %v861_v34  ;;  %v1130_v8 = vsel %vm709_vm12, %v5536_v42, 0  ;;  %v902_v16 = vrot.slane %v900_v31, 5  ;;  %v4395_v50 = vcombine.low %v875_v43, %v889_v23  ;;  %v1046_v62 = vld [vmem:[#allocation2 + $0x28] sm:$0xe]  ;;  %v1047_v38 = vld [vmem:[#allocation2 + $0x2c] sm:$0x1] }
  0xe0   : > { %v898_v51 = vrot.slane %v897_v35, 4  ;;  %v912_v52 = vrot.slane %v911_v36, 4  ;;  %v916_v53 = vrot.slane %v914_v39, 5  ;;  %v4402_v54 = vrot.slane %v1038_v45, 9  ;;  %v1040_v63 = vld [vmem:[#allocation2 + $0x10] sm:$0xe] }
  0xe1   : > { %v1077_v40 = vrot.slane %v1039_v47, 5  ;;  %v1074_v41 = vsel %vm5570_vm3, %v4401_v48, %v1073_v49  ;;  %v1041_v0 = vld [vmem:[#allocation2 + $0x14] sm:$0x1]  ;;  %v4404_v5 = vrot.slane %v1042_v58, 9  ;;  %v1085_v6 = vrot.slane %v1043_v59, 5 }
  0xe2   : > { %v903_v56 = vsel %vm5539_vm0, %v898_v51, %v902_v16  ;;  %v917_v30 = vsel %vm5539_vm0, %v912_v52, %v916_v53  ;;  %v4405_v7 = vrot.slane %v1044_v60, 9  ;;  %v1089_v9 = vrot.slane %v1045_v61, 5  ;;  %v1048_v18 = vld [vmem:[#allocation2 + $0x30] sm:$0xe]  ;;  %v1049_v24 = vld [vmem:[#allocation2 + $0x34] sm:$0x1] }
  0xe3   : > { %4730 = vmatmul.mubr.msk.bf16.vlgmr.msra.gmra.mrb[8].mxu0 %vm696_vm13, %v4394_v11  ;;  %v1078_v57 = vsel %vm5570_vm3, %v4402_v54, %v1077_v40  ;;  %v4396_v25 = vcombine.low %v903_v56, %v917_v30  ;;  %v4406_v10 = vrot.slane %v1046_v62, 9  ;;  %v1093_v12 = vrot.slane %v1047_v38, 5  ;;  %v1050_v22 = vld [vmem:[#allocation2 + $0x38] sm:$0xe]  ;;  %v1051_v21 = vld [vmem:[#allocation2 + $0x3c] sm:$0x1] }
  0xe4   : > { %4738 = vmatpush3.bf16.msra.mxu0 %v1130_v8  ;;  %4733 = vmatprep.mubr.msk.bf16.mxu0 %vm696_vm13, %v4395_v50  ;;  %v4410_v4 = vcombine.low %v1074_v41, %v1078_v57  ;;  %v4403_v13 = vrot.slane %v1040_v63, 9  ;;  %v1081_v15 = vrot.slane %v1041_v0, 5  ;;  %v1086_v17 = vsel %vm5570_vm3, %v4404_v5, %v1085_v6  ;;  %v1355_v27 = vld [vmem:[#allocation2 + $0x8] sm:$0xf]  ;;  %v1357_v2 = vld [vmem:[#allocation2 + $0x10] sm:$0xf] }
  0xe5   : > { %4964 = vmatprep.subr.msk.bf16.mxu0 %vm709_vm12, %v4418_v14  ;;  %v1090_v19 = vsel %vm5570_vm3, %v4405_v7, %v1089_v9  ;;  %v1094_v20 = vsel %vm5570_vm3, %v4406_v10, %v1093_v12  ;;  %v1264_v28 = vsel %vm709_vm12, %v4418_v14, 0  ;;  %v4407_v3 = vrot.slane %v1048_v18, 9  ;;  %v4427_v35 = vld [vmem:[%s6154_s1 + $0x8] sm:$0x3]  ;;  %v1359_v8 = vld [vmem:[#allocation2 + $0x18] sm:$0xf] }
  0xe6   : > { %v1082_v26 = vsel %vm5570_vm3, %v4403_v13, %v1081_v15  ;;  %v4412_v31 = vcombine.low %v1090_v19, %v1094_v20  ;;  %v1097_v32 = vrot.slane %v1049_v24, 5  ;;  %v4408_v33 = vrot.slane %v1050_v22, 9  ;;  %v1361_v14 = vld [vmem:[#allocation2 + $0x20] sm:$0xf]  ;;  %v5050_v50 = vld [vmem:[#allocation2 + $0x8] ss:$8 sps:$4 sm:$0xff]  }
  0xe7   : > { %v4411_v55 = vcombine.low %v1082_v26, %v1086_v17  ;;  %v1101_v34 = vrot.slane %v1051_v21, 5  ;;  %v1372_v36 = vshrl.u32 %v1355_v27, 16  ;;  %v1375_v39 = vshll.u32 %v1355_v27, 16  ;;  %v1356_v51 = vld [vmem:[#allocation2 + $0xc] sm:$0x1] }
  0xe8   : > { %v1386_v43 = vshrl.u32 %v1357_v2, 16  ;;  %v1389_v23 = vshll.u32 %v1357_v2, 16  ;;  %v1098_v44 = vsel %vm5570_vm3, %v4407_v3, %v1097_v32  ;;  %v1358_v52 = vld [vmem:[#allocation2 + $0x14] sm:$0x1]  ;;  %v1400_v54 = vshrl.u32 %v1359_v8, 16 }
  0xe9   : > { %v1102_v45 = vsel %vm5570_vm3, %v4408_v33, %v1101_v34  ;;  %v1374_v47 = vrot.slane %v1372_v36, 4  ;;  %v1377_v48 = vrot.slane %v1375_v39, 5  ;;  %v1403_v56 = vshll.u32 %v1359_v8, 16  ;;  %v1365_v57 = vld [vmem:[#allocation2 + $0x30] sm:$0xf] }
  0xea   : > { %v1388_v49 = vrot.slane %v1386_v43, 4  ;;  %v1391_v11 = vrot.slane %v1389_v23, 5  ;;  %v4413_v16 = vcombine.low %v1098_v44, %v1102_v45  ;;  %v1414_v30 = vshrl.u32 %v1361_v14, 16  ;;  %v1363_v61 = vld [vmem:[#allocation2 + $0x28] sm:$0xf] }
  0xeb   : > { %4734 = vmatmul.mubr.msk.bf16.gmra.mrb[12].mxu0 %vm696_vm13, %v4396_v25  ;;  %v1378_v53 = vor.u32 %v1377_v48, %v1374_v47  ;;  %v1417_v41 = vshll.u32 %v1361_v14, 16  ;;  %v1510_v58 = vsel %vm709_vm12, %v4427_v35, 0  ;;  %v1381_v59 = vshll.u32 %v1356_v51, 16  ;;  %v5051_v62 = vld [vmem:[#allocation2 + $0x18] ss:$8 sps:$4 sm:$0xff]  }
  0xec   : > { %4739 = vmatprep.mubr.msk.bf16.mxu0 %vm696_vm13, %v4410_v4  ;;  %v1392_v40 = vor.u32 %v1391_v11, %v1388_v49  ;;  %v1395_v60 = vshll.u32 %v1358_v52, 16  ;;  %v1362_v25 = vld [vmem:[#allocation2 + $0x24] sm:$0x1]  ;;  %v1402_v63 = vrot.slane %v1400_v54, 4  ;;  %v1442_v0 = vshrl.u32 %v1365_v57, 16 }
  0xed   : > { %v1379_v38 = vrot.slane %v1378_v53, 4  ;;  %v1445_v4 = vshll.u32 %v1365_v57, 16  ;;  %v5610_v6 = vld [vmem:[%s6154_s1 + $0xa] sm:$0x3]  ;;  %v1405_v7 = vrot.slane %v1403_v56, 5  ;;  %v1416_v9 = vrot.slane %v1414_v30, 4 }
  0xee   : > { %v1393_v5 = vrot.slane %v1392_v40, 4  ;;  %v1419_v10 = vrot.slane %v1417_v41, 5  ;;  %v1428_v12 = vshrl.u32 %v1363_v61, 16  ;;  %v1431_v13 = vshll.u32 %v1363_v61, 16  ;;  %v5052_v15 = vld [vmem:[#allocation2 + $0x28] ss:$8 sps:$4 sm:$0xff]  }
  0xef   : > { %v1383_v17 = vrot.slane %v1381_v59, 5  ;;  %v1397_v18 = vrot.slane %v1395_v60, 5  ;;  %v1444_v19 = vrot.slane %v1442_v0, 4  ;;  %v1447_v20 = vrot.slane %v1445_v4, 5  ;;  %v1367_v24 = vld [vmem:[#allocation2 + $0x38] sm:$0xf] }
  0xf0   : > { %v1369_v22 = vld [vmem:[#allocation2 + $0x40] sm:$0xf]  ;;  %v1360_v26 = vld [vmem:[#allocation2 + $0x1c] sm:$0x1]  ;;  %v1406_v27 = vor.u32 %v1405_v7, %v1402_v63  ;;  %v1420_v2 = vor.u32 %v1419_v10, %v1416_v9  ;;  %v1430_v32 = vrot.slane %v1428_v12, 4  ;;  %v1433_v33 = vrot.slane %v1431_v13, 5 }
  0xf1   : > { %v1384_v21 = vsel %vm5539_vm0, %v1379_v38, %v1383_v17  ;;  %v1398_v3 = vsel %vm5539_vm0, %v1393_v5, %v1397_v18  ;;  %v1456_v34 = vshrl.u32 %v1367_v24, 16  ;;  %v1470_v36 = vshrl.u32 %v1369_v22, 16  ;;  %v5053_v48 = vld [vmem:[#allocation2 + $0x38] ss:$8 sps:$4 sm:$0xff]   ;;  %v1368_v14 = vld [vmem:[#allocation2 + $0x3c] sm:$0x1] }
  0xf2   : > { %v1473_v39 = vshll.u32 %v1369_v22, 16  ;;  %v1409_v43 = vshll.u32 %v1360_v26, 16  ;;  %v1448_v23 = vor.u32 %v1447_v20, %v1444_v19  ;;  %v4428_v49 = vcombine.low %v1384_v21, %v1398_v3  ;;  %v1370_v30 = vld [vmem:[#allocation2 + $0x44] sm:$0x1]  ;;  %v1601_v63 = vld [vmem:[#allocation2 + $0x8] sm:$0xe] }
  0xf3   : > { %4740 = vmatmul.mubr.msk.bf16.vlgmr.msra.gmra.mrb[16].mxu0 %vm696_vm13, %v4411_v55  ;;  %v1423_v55 = vshll.u32 %v1362_v25, 16  ;;  %v1407_v11 = vrot.slane %v1406_v27, 4  ;;  %v1421_v8 = vrot.slane %v1420_v2, 4  ;;  %v1472_v52 = vrot.slane %v1470_v36, 4  ;;  %v1602_v0 = vld [vmem:[#allocation2 + $0xc] sm:$0x1] }
  0xf4   : > { %4748 = vmatpush3.bf16.msra.mxu0 %v1264_v28  ;;  %4743 = vmatprep.mubr.msk.bf16.mxu0 %vm696_vm13, %v4412_v31  ;;  %v1366_v28 = vld [vmem:[#allocation2 + $0x34] sm:$0x1]  ;;  %v1364_v31 = vld [vmem:[#allocation2 + $0x2c] sm:$0x1]  ;;  %v1475_v53 = vrot.slane %v1473_v39, 5  ;;  %v1411_v54 = vrot.slane %v1409_v43, 5 }
  0xf5   : > { %4965 = vmatprep.subr.msk.bf16.mxu0 %vm709_vm12, %v4427_v35  ;;  %v1459_v35 = vshll.u32 %v1367_v24, 16  ;;  %v1451_v44 = vshll.u32 %v1366_v28, 16  ;;  %v1425_v45 = vrot.slane %v1423_v55, 5  ;;  %v1437_v47 = vshll.u32 %v1364_v31, 16  ;;  %v1603_v4 = vld [vmem:[#allocation2 + $0x10] sm:$0xe] }
  0xf6   : > { %v1449_v40 = vrot.slane %v1448_v23, 4  ;;  %v1412_v41 = vsel %vm5539_vm0, %v1407_v11, %v1411_v54  ;;  %v1465_v59 = vshll.u32 %v1368_v14, 16  ;;  %v1479_v38 = vshll.u32 %v1370_v30, 16  ;;  %v1604_v5 = vld [vmem:[#allocation2 + $0x14] sm:$0x1] }
  0xf7   : > { %v1461_v51 = vrot.slane %v1459_v35, 5  ;;  %v1453_v56 = vrot.slane %v1451_v44, 5  ;;  %v1426_v60 = vsel %vm5539_vm0, %v1421_v8, %v1425_v45  ;;  %v1692_v9 = vsel %vm709_vm12, %v5610_v6, 0  ;;  %v4453_v19 = vld [vmem:[%s6154_s1 + $0xc] sm:$0x3] }
  0xf8   : > { %v4429_v7 = vcombine.low %v1412_v41, %v1426_v60  ;;  %v1467_v12 = vrot.slane %v1465_v59, 5  ;;  %v1481_v18 = vrot.slane %v1479_v38, 5  ;;  %v4436_v20 = vrot.slane %v1601_v63, 9  ;;  %v1605_v27 = vld [vmem:[#allocation2 + $0x18] sm:$0xe] }
  0xf9   : > { %v1454_v25 = vsel %vm5539_vm0, %v1449_v40, %v1453_v56  ;;  %v1635_v24 = vrot.slane %v1602_v0, 5  ;;  %v4437_v22 = vrot.slane %v1603_v4, 9  ;;  %v1639_v21 = vrot.slane %v1604_v5, 5  ;;  %v1606_v55 = vld [vmem:[#allocation2 + $0x1c] sm:$0x1] }
  0xfa   : > { %v1607_v2 = vld [vmem:[#allocation2 + $0x20] sm:$0xe]  ;;  %v1608_v31 = vld [vmem:[#allocation2 + $0x24] sm:$0x1]  ;;  %v1612_v35 = vld [vmem:[#allocation2 + $0x34] sm:$0x1] }
  0xfb   : > { %4744 = vmatmul.mubr.msk.bf16.gmra.mrb[20].mxu0 %vm696_vm13, %v4413_v16  ;;  %v1434_v16 = vor.u32 %v1433_v33, %v1430_v32  ;;  %v1636_v28 = vsel %vm5570_vm3, %v4436_v20, %v1635_v24  ;;  %v1640_v3 = vsel %vm5570_vm3, %v4437_v22, %v1639_v21  ;;  %v1609_v32 = vld [vmem:[#allocation2 + $0x28] sm:$0xe]  ;;  %v1610_v33 = vld [vmem:[#allocation2 + $0x2c] sm:$0x1]  ;;  %v4438_v39 = vrot.slane %v1605_v27, 9 }
  0xfc   : > { %4749 = vmatprep.mubr.msk.bf16.mxu0 %vm696_vm13, %v5050_v50  ;;  %v1458_v50 = vrot.slane %v1456_v34, 4  ;;  %v1611_v34 = vld [vmem:[#allocation2 + $0x30] sm:$0xe]  ;;  %v4445_v43 = vcombine.low %v1636_v28, %v1640_v3  ;;  %v1643_v23 = vrot.slane %v1606_v55, 5  ;;  %v4439_v44 = vrot.slane %v1607_v2, 9 }
  0xfd   : > { %v1435_v57 = vrot.slane %v1434_v16, 4  ;;  %v1647_v45 = vrot.slane %v1608_v31, 5  ;;  %v1655_v11 = vrot.slane %v1612_v35, 5  ;;  %v1613_v14 = vld [vmem:[#allocation2 + $0x38] sm:$0xe]  ;;  %v1827_v56 = vsel %vm709_vm12, %v4453_v19, 0 }
  0xfe   : > { %v1462_v61 = vor.u32 %v1461_v51, %v1458_v50  ;;  %v1644_v8 = vsel %vm5570_vm3, %v4438_v39, %v1643_v23  ;;  %v1616_v54 = vld [vmem:[#allocation2 + $0x44] sm:$0x1]  ;;  %v4442_v30 = vrot.slane %v1613_v14, 9  ;;  %v4462_v60 = vld [vmem:[%s6154_s1 + $0xe] sm:$0x3]  ;;  %vm2596_vm6 = vcmask 1043456  }
  0xff   : > { %v1648_v16 = vsel %vm5570_vm3, %v4439_v44, %v1647_v45  ;;  %v1663_v59 = vrot.slane %v1616_v54, 5  ;;  %v1921_v20 = vld [vmem:[#allocation2 + $0x1c] sm:$0x1]  ;;  %v5056_v35 = vld [vmem:[#allocation2 + $0x30] ss:$8 sps:$4 sm:$0xff]  }
 0x100   : > { %v4446_v40 = vcombine.low %v1644_v8, %v1648_v16  ;;  %v1958_v39 = vshll.u32 %v1921_v20, 16  ;;  %v1923_v44 = vld [vmem:[#allocation2 + $0x24] sm:$0x1]  ;;  %v1925_v45 = vld [vmem:[#allocation2 + $0x2c] sm:$0x1] }
 0x101   : > { %v1927_v16 = vld [vmem:[#allocation2 + $0x34] sm:$0x1]  ;;  %v1933_v20 = vld [vmem:[#allocation2 + $0x4c] sm:$0x1] }
 0x103   : > { %4750 = vmatmul.mubr.msk.bf16.vlgmr.msra.gmra.mrb[24].mxu0 %vm696_vm13, %v5051_v62  ;;  %v1476_v62 = vor.u32 %v1475_v53, %v1472_v52  ;;  %v1614_v52 = vld [vmem:[#allocation2 + $0x3c] sm:$0x1]  ;;  %v1615_v53 = vld [vmem:[#allocation2 + $0x40] sm:$0xe] }
 0x104   : > { %4758 = vmatpush3.bf16.msra.mxu0 %v1510_v58  ;;  %4753 = vmatprep.mubr.msk.bf16.mxu0 %vm696_vm13, %v5052_v15  ;;  %v1439_v58 = vrot.slane %v1437_v47, 5  ;;  %v1463_v15 = vrot.slane %v1462_v61, 4  ;;  %v4440_v47 = vrot.slane %v1609_v32, 9  ;;  %v1920_v61 = vld [vmem:[#allocation2 + $0x18] sm:$0xf] }
 0x105   : > { %4966 = vmatprep.subr.msk.bf16.mxu0 %vm709_vm12, %v5610_v6  ;;  %v1477_v17 = vrot.slane %v1476_v62, 4  ;;  %v1949_v63 = vshrl.u32 %v1920_v61, 16  ;;  %v1952_v0 = vshll.u32 %v1920_v61, 16 }
 0x106   : > { %v1440_v10 = vsel %vm5539_vm0, %v1435_v57, %v1439_v58  ;;  %v1468_v6 = vsel %vm5539_vm0, %v1463_v15, %v1467_v12  ;;  %v1659_v57 = vrot.slane %v1614_v52, 5  ;;  %v4443_v58 = vrot.slane %v1615_v53, 9  ;;  %v1924_v15 = vld [vmem:[#allocation2 + $0x28] sm:$0xf]  ;;  %v1930_v53 = vld [vmem:[#allocation2 + $0x40] sm:$0xf] }
 0x107   : > { %v4430_v13 = vcombine.low %v1440_v10, %v1454_v25  ;;  %v1482_v26 = vsel %vm5539_vm0, %v1477_v17, %v1481_v18  ;;  %v1918_v25 = vld [vmem:[#allocation2 + $0x10] sm:$0xf]  ;;  %v1951_v10 = vrot.slane %v1949_v63, 4  ;;  %v1954_v12 = vrot.slane %v1952_v0, 5  ;;  %v1919_v17 = vld [vmem:[#allocation2 + $0x14] sm:$0x1] }
 0x108   : > { %v4431_v36 = vcombine.low %v1468_v6, %v1482_v26  ;;  %v1660_v62 = vsel %vm5570_vm3, %v4442_v30, %v1659_v57  ;;  %v1664_v38 = vsel %vm5570_vm3, %v4443_v58, %v1663_v59  ;;  %v1935_v5 = vshrl.u32 %v1918_v25, 16  ;;  %v1926_v18 = vld [vmem:[#allocation2 + $0x30] sm:$0xf] }
 0x109   : > { %v4448_v4 = vcombine.low %v1660_v62, %v1664_v38  ;;  %v2073_v26 = vsel %vm709_vm12, %v4462_v60, 0  ;;  %v1955_v27 = vor.u32 %v1954_v12, %v1951_v10  ;;  %v1977_v55 = vshrl.u32 %v1924_v15, 16  ;;  %v5057_v10 = vld [vmem:[#allocation2 + $0x40] ss:$8 sps:$4 sm:$0xff]  }
 0x10a   : > { %v1937_v24 = vrot.slane %v1935_v5, 4  ;;  %v1980_v28 = vshll.u32 %v1924_v15, 16  ;;  %v1991_v3 = vshrl.u32 %v1926_v18, 16  ;;  %v1994_v2 = vshll.u32 %v1926_v18, 16 }
 0x10b   : > { %4754 = vmatmul.mubr.msk.bf16.gmra.mrb[28].mxu0 %vm696_vm13, %v5053_v48  ;;  %v1651_v48 = vrot.slane %v1610_v33, 5  ;;  %v1932_v33 = vld [vmem:[#allocation2 + $0x48] sm:$0xf]  ;;  %v1972_v59 = vshll.u32 %v1923_v44, 16  ;;  %v2000_v62 = vshll.u32 %v1927_v16, 16  ;;  %v2019_v38 = vshrl.u32 %v1930_v53, 16 }
 0x10c   : > { %4759 = vmatprep.mubr.msk.bf16.mxu0 %vm696_vm13, %v4428_v49  ;;  %v4441_v49 = vrot.slane %v1611_v34, 9  ;;  %v5055_v34 = vld [vmem:[#allocation2 + $0x20] ss:$8 sps:$4 sm:$0xff]   ;;  %v1982_v8 = vrot.slane %v1980_v28, 5  ;;  %v1993_v14 = vrot.slane %v1991_v3, 4  ;;  %v2033_v30 = vshrl.u32 %v1932_v33, 16 }
 0x10d   : > { %v1652_v50 = vsel %vm5570_vm3, %v4440_v47, %v1651_v48  ;;  %v1974_v15 = vrot.slane %v1972_v59, 5  ;;  %v2042_v3 = vshll.u32 %v1933_v20, 16  ;;  %v2165_v16 = vld [vmem:[#allocation2 + $0x14] sm:$0x1]  ;;  %v2174_v59 = vld [vmem:[#allocation2 + $0x38] sm:$0xe] }
 0x10e   : > { %v1656_v51 = vsel %vm5570_vm3, %v4441_v49, %v1655_v11  ;;  %v1956_v49 = vrot.slane %v1955_v27, 4  ;;  %v1979_v11 = vrot.slane %v1977_v55, 4  ;;  %v1931_v55 = vld [vmem:[#allocation2 + $0x44] sm:$0x1]  ;;  %v2178_v20 = vld [vmem:[#allocation2 + $0x48] sm:$0xe] }
 0x10f   : > { %v4447_v41 = vcombine.low %v1652_v50, %v1656_v51  ;;  %v1996_v50 = vrot.slane %v1994_v2, 5 }
 0x110   : > { %v1983_v61 = vor.u32 %v1982_v8, %v1979_v11 }
 0x111   : > { %v1997_v0 = vor.u32 %v1996_v50, %v1993_v14 }
 0x113   : > { %4760 = vmatmul.mubr.msk.bf16.vlgmr.msra.gmra.mrb[32].mxu0 %vm696_vm13, %v4429_v7  ;;  %v1938_v7 = vshll.u32 %v1918_v25, 16  ;;  %v2022_v25 = vshll.u32 %v1930_v53, 16 }
 0x114   : > { %4768 = vmatpush3.bf16.msra.mxu0 %v1692_v9  ;;  %4763 = vmatprep.mubr.msk.bf16.mxu0 %vm696_vm13, %v4430_v13  ;;  %v5054_v9 = vld [vmem:[#allocation2 + $0x10] ss:$8 sps:$4 sm:$0xff]   ;;  %v1922_v13 = vld [vmem:[#allocation2 + $0x20] sm:$0xf] }
 0x115   : > { %4967 = vmatprep.subr.msk.bf16.mxu0 %vm709_vm12, %v4453_v19  ;;  %v1928_v19 = vld [vmem:[#allocation2 + $0x38] sm:$0xf]  ;;  %v1940_v22 = vrot.slane %v1938_v7, 5  ;;  %v1963_v21 = vshrl.u32 %v1922_v13, 16  ;;  %v1966_v6 = vshll.u32 %v1922_v13, 16  ;;  %v2035_v7 = vrot.slane %v2033_v30, 4 }
 0x116   : > { %v2005_v31 = vshrl.u32 %v1928_v19, 16  ;;  %v2008_v32 = vshll.u32 %v1928_v19, 16  ;;  %v1984_v19 = vrot.slane %v1983_v61, 4  ;;  %v2170_v30 = vld [vmem:[#allocation2 + $0x28] sm:$0xe] }
 0x117   : > { %v1941_v23 = vor.u32 %v1940_v22, %v1937_v24  ;;  %v1965_v47 = vrot.slane %v1963_v21, 4  ;;  %v1968_v48 = vrot.slane %v1966_v6, 5  ;;  %v2021_v24 = vrot.slane %v2019_v38, 4 }
 0x118   : > { %v2007_v51 = vrot.slane %v2005_v31, 4  ;;  %v2010_v52 = vrot.slane %v2008_v32, 5  ;;  %v2024_v22 = vrot.slane %v2022_v25, 5  ;;  %v1998_v21 = vrot.slane %v1997_v0, 4 }
 0x119   : > { %v1942_v57 = vrot.slane %v1941_v23, 4  ;;  %v1969_v58 = vor.u32 %v1968_v48, %v1965_v47  ;;  %v2002_v6 = vrot.slane %v2000_v62, 5  ;;  %v2164_v47 = vld [vmem:[#allocation2 + $0x10] sm:$0xe]  ;;  %v4474_v0 = vrot.slane %v2170_v30, 9 }
 0x11a   : > { %v2025_v32 = vor.u32 %v2024_v22, %v2021_v24  ;;  %v2179_v24 = vld [vmem:[#allocation2 + $0x4c] sm:$0x1] }
 0x11b   : > { %4764 = vmatmul.mubr.msk.bf16.gmra.mrb[36].mxu0 %vm696_vm13, %v4431_v36  ;;  %v1944_v36 = vshll.u32 %v1919_v17, 16  ;;  %v1970_v13 = vrot.slane %v1969_v58, 4  ;;  %v2173_v58 = vld [vmem:[#allocation2 + $0x34] sm:$0x1] }
 0x11c   : > { %4769 = vmatprep.mubr.msk.bf16.mxu0 %vm696_vm13, %v4445_v43  ;;  %v5673_v43 = vld [vmem:[%s6154_s1 + $0x10] sm:$0x3] }
 0x11d   : > { %v1946_v54 = vrot.slane %v1944_v36, 5  ;;  %v1975_v2 = vsel %vm5539_vm0, %v1970_v13, %v1974_v15  ;;  %v2166_v36 = vld [vmem:[#allocation2 + $0x18] sm:$0xe]  ;;  %v2255_v44 = vsel %vm709_vm12, %v5673_v43, 0  ;;  %v2176_v15 = vld [vmem:[#allocation2 + $0x40] sm:$0xe] }
 0x11e   : > { %v4472_v14 = vrot.slane %v2166_v36, 9 }
 0x11f   : > { %v1947_v12 = vsel %vm5539_vm0, %v1942_v57, %v1946_v54  ;;  %v2168_v54 = vld [vmem:[#allocation2 + $0x20] sm:$0xe]  ;;  %v2172_v57 = vld [vmem:[#allocation2 + $0x30] sm:$0xe] }
 0x120   : > { %v4473_v38 = vrot.slane %v2168_v54, 9 }
 0x123   : > { %4770 = vmatmul.mubr.msk.bf16.vlgmr.msra.gmra.mrb[40].mxu0 %vm696_vm13, %v4446_v40  ;;  %v1960_v40 = vrot.slane %v1958_v39, 5  ;;  %v2167_v39 = vld [vmem:[#allocation2 + $0x1c] sm:$0x1] }
 0x124   : > { %4778 = vmatpush3.bf16.msra.mxu0 %v1827_v56  ;;  %4773 = vmatprep.mubr.msk.bf16.mxu0 %vm696_vm13, %v4447_v41  ;;  %v1929_v56 = vld [vmem:[#allocation2 + $0x3c] sm:$0x1]  ;;  %v2036_v41 = vshll.u32 %v1932_v33, 16  ;;  %v2028_v33 = vshll.u32 %v1931_v55, 16  ;;  %v2202_v50 = vrot.slane %v2167_v39, 5  ;;  %v2226_v55 = vrot.slane %v2179_v24, 5 }
 0x125   : > { %4968 = vmatprep.subr.msk.bf16.mxu0 %vm709_vm12, %v4462_v60  ;;  %v1986_v60 = vshll.u32 %v1925_v45, 16  ;;  %v1961_v63 = vsel %vm5539_vm0, %v1956_v49, %v1960_v40  ;;  %v2014_v5 = vshll.u32 %v1929_v56, 16  ;;  %v2044_v45 = vrot.slane %v2042_v3, 5  ;;  %v2169_v40 = vld [vmem:[#allocation2 + $0x24] sm:$0x1] }
 0x126   : > { %v4463_v18 = vcombine.low %v1947_v12, %v1961_v63  ;;  %v2026_v49 = vrot.slane %v2025_v32, 4  ;;  %v2030_v11 = vrot.slane %v2028_v33, 5  ;;  %v2203_v56 = vsel %vm5570_vm3, %v4472_v14, %v2202_v50 }
 0x127   : > { %v1988_v17 = vrot.slane %v1986_v60, 5  ;;  %v2016_v27 = vrot.slane %v2014_v5, 5  ;;  %v2175_v60 = vld [vmem:[#allocation2 + $0x3c] sm:$0x1]  ;;  %v2206_v63 = vrot.slane %v2169_v40, 5  ;;  %v4475_v5 = vrot.slane %v2172_v57, 9 }
 0x128   : > { %v2031_v53 = vsel %vm5539_vm0, %v2026_v49, %v2030_v11 }
 0x129   : > { %v1989_v31 = vsel %vm5539_vm0, %v1984_v19, %v1988_v17  ;;  %v2207_v12 = vsel %vm5570_vm3, %v4473_v38, %v2206_v63  ;;  %v2177_v19 = vld [vmem:[#allocation2 + $0x44] sm:$0x1] }
 0x12a   : > { %v4464_v23 = vcombine.low %v1975_v2, %v1989_v31 }
 0x12b   : > { %4774 = vmatmul.mubr.msk.bf16.gmra.mrb[44].mxu0 %vm696_vm13, %v4448_v4  ;;  %v2011_v4 = vor.u32 %v2010_v52, %v2007_v51  ;;  %v4471_v51 = vrot.slane %v2164_v47, 9  ;;  %v2198_v52 = vrot.slane %v2165_v16, 5 }
 0x12c   : > { %4779 = vmatprep.mubr.msk.bf16.mxu0 %vm696_vm13, %v5054_v9  ;;  %v2038_v9 = vrot.slane %v2036_v41, 5  ;;  %v2171_v41 = vld [vmem:[#allocation2 + $0x2c] sm:$0x1] }
 0x12d   : > { %v2199_v62 = vsel %vm5570_vm3, %v4471_v51, %v2198_v52 }
 0x12e   : > { %v2039_v28 = vor.u32 %v2038_v9, %v2035_v7  ;;  %v4480_v25 = vcombine.low %v2199_v62, %v2203_v56  ;;  %v2214_v7 = vrot.slane %v2173_v58, 5  ;;  %v4476_v9 = vrot.slane %v2174_v59, 9 }
 0x130   : > { %v2040_v8 = vrot.slane %v2039_v28, 4  ;;  %v2215_v17 = vsel %vm5570_vm3, %v4475_v5, %v2214_v7 }
 0x133   : > { %4780 = vmatmul.mubr.msk.bf16.vlgmr.msra.gmra.mrb[48].mxu0 %vm696_vm13, %v5055_v34  ;;  %v2003_v34 = vsel %vm5539_vm0, %v1998_v21, %v2002_v6  ;;  %v4477_v21 = vrot.slane %v2176_v15, 9 }
 0x134   : > { %4788 = vmatpush3.bf16.msra.mxu0 %v2073_v26  ;;  %4783 = vmatprep.mubr.msk.bf16.mxu0 %vm696_vm13, %v5056_v35  ;;  %v2012_v26 = vrot.slane %v2011_v4, 4  ;;  %v2210_v4 = vrot.slane %v2171_v41, 5 }
 0x135   : > { %4969 = vmatprep.subr.msk.bf16.mxu0 %vm709_vm12, %v5673_v43  ;;  %v2045_v43 = vsel %vm5539_vm0, %v2040_v8, %v2044_v45 }
 0x136   : > { %v2017_v35 = vsel %vm5539_vm0, %v2012_v26, %v2016_v27  ;;  %v4466_v61 = vcombine.low %v2031_v53, %v2045_v43  ;;  %v2211_v13 = vsel %vm5570_vm3, %v4474_v0, %v2210_v4  ;;  %v2222_v26 = vrot.slane %v2177_v19, 5 }
 0x137   : > { %v4465_v48 = vcombine.low %v2003_v34, %v2017_v35  ;;  %v4481_v22 = vcombine.low %v2207_v12, %v2211_v13  ;;  %v4478_v27 = vrot.slane %v2178_v20, 9 }
 0x138   : > { %v2223_v28 = vsel %vm5570_vm3, %v4477_v21, %v2222_v26  ;;  %v446_v21 = vld [vmem:[#allocation3 + $0x8] sm:$0x1] }
 0x139   : > { %v2227_v3 = vsel %vm5570_vm3, %v4478_v27, %v2226_v55  ;;  %v447_v27 = vsel %vm5339_vm5, 0, %v446_v21  ;;  %v5754_v55 = vld [vmem:[%s6157_s4 + $0x4] sm:$0xf] }
 0x13a   : > { %v4483_v2 = vcombine.low %v2223_v28, %v2227_v3  ;;  %v449_v28 = vld [vmem:[#allocation3 + $0x10] sm:$0x1]  ;;  %448 = vst [vmem:[#allocation3 + $0x8] sm:$0x1] %v447_v27 }
 0x13b   : > { %4784 = vmatmul.mubr.msk.bf16.gmra.mrb[52].mxu0 %vm696_vm13, %v5057_v10  ;;  %v2218_v10 = vrot.slane %v2175_v60, 5 }
 0x13c   : > { %4789 = vmatprep.mubr.msk.bf16.mxu0 %vm696_vm13, %v4463_v18 }
 0x13d   : > { %v2219_v18 = vsel %vm5570_vm3, %v4476_v9, %v2218_v10 }
 0x13e   : > { %v4482_v6 = vcombine.low %v2215_v17, %v2219_v18  ;;  %v2563_v17 = vld [vmem:[%s6157_s4] sm:$0xf]  ;;  %v443_v18 = vld [vmem:[#allocation3] sm:$0x1] }
 0x13f   : > { %4970 = vmatprep.subr.msk.bf16.mxu1 %vm2596_vm6, %v2563_v17  ;;  %v2598_v24 = vsel %vm2596_vm6, %v2563_v17, 0 }
 0x140   : > { %4808 = vmatpush3.bf16.msra.mxu1 %v2598_v24 }
 0x141   : > { %4971 = vmatprep.subr.msk.bf16.mxu1 %vm2596_vm6, %v5754_v55 }
 0x143   : > { %4790 = vmatmul.mubr.msk.bf16.vlgmr.msra.gmra.mrb[56].mxu0 %vm696_vm13, %v4464_v23 }
 0x144   : > { %4798 = vmatpush3.bf16.msra.mxu0 %v2255_v44  ;;  %4793 = vmatprep.mubr.msk.bf16.mxu0 %vm696_vm13, %v4465_v48 }
 0x14b   : > { %4794 = vmatmul.mubr.msk.bf16.gmra.mrb[60].mxu0 %vm696_vm13, %v4466_v61 }
 0x14c   : > { %4799 = vmatprep.mubr.msk.bf16.mxu0 %vm696_vm13, %v4480_v25 }
 0x153   : > { %4800 = vmatmul.mubr.msk.bf16.vlgmr.msra.gmra.mrb[64].mxu0 %vm696_vm13, %v4481_v22  ;;  %v444_v22 = vsel %vm5339_vm5, 0, %v443_v18  ;;  %v489_v18 = vld [vmem:[#allocation3 + $0x2c] sm:$0x1] }
 0x154   : > { %4803 = vmatprep.mubr.msk.bf16.mxu0 %vm696_vm13, %v4482_v6  ;;  %445 = vst [vmem:[#allocation3] sm:$0x1] %v444_v22  ;;  %v490_v24 = vsel %vm5392_vm10, 0, %v489_v18 }
 0x155   : > { %491 = vst [vmem:[#allocation3 + $0x2c] sm:$0x1] %v490_v24 }
 0x15b   : > { %4804 = vmatmul.mubr.msk.bf16.gmra.mrb[68].mxu0 %vm696_vm13, %v4483_v2 }
 0x1a6   : > { %v4721_v31 = vpop.f32.mrb[0].mxu0 }
 0x1a7   : > { %781 = vst.msk [vmem:[#allocation4 + $0x10] sm:$0xff] %vm778_vm4, %v4721_v31  ;;  %v747_v32 = vpop.f32.mrb[1].mxu0 }
 0x1a8   : > { %779 = vst.msk [vmem:[#allocation4] sm:$0xff] %vm778_vm4, %v747_v32  ;;  %v4722_v33 = vpop.f32.mrb[2].mxu0  ;;  %v450_v32 = vsel %vm5339_vm5, 0, %v449_v28 }
 0x1a9   : > { %782 = vst.msk [vmem:[#allocation4 + $0x18] sm:$0xff] %vm778_vm4, %v4722_v33  ;;  %v750_v34 = vpop.f32.mrb[3].mxu0  ;;  %v452_v33 = vld [vmem:[#allocation3 + $0x18] sm:$0x1]  ;;  %451 = vst [vmem:[#allocation3 + $0x10] sm:$0x1] %v450_v32 }
 0x1aa   : > { %780 = vst.msk [vmem:[#allocation4 + $0x8] sm:$0xff] %vm778_vm4, %v750_v34 }
 0x1ae   : > { %v4725_v35 = vpop.f32.mrb[4].mxu0  ;;  %v1014_v45 = vld [vmem:[#allocation4 + $0x10] sm:$0xff] }
 0x1af   : > { %785 = vst.msk [vmem:[#allocation4 + $0x30] sm:$0xff] %vm778_vm4, %v4725_v35  ;;  %v763_v36 = vpop.f32.mrb[5].mxu0  ;;  %v1012_v49 = vld [vmem:[#allocation4] sm:$0xff] }
 0x1b0   : > { %783 = vst.msk [vmem:[#allocation4 + $0x20] sm:$0xff] %vm778_vm4, %v763_v36  ;;  %v4726_v39 = vpop.f32.mrb[6].mxu0  ;;  %v1015_v16 = vld [vmem:[#allocation4 + $0x18] sm:$0xff] }
 0x1b1   : > { %786 = vst.msk [vmem:[#allocation4 + $0x38] sm:$0xff] %vm778_vm4, %v4726_v39  ;;  %v766_v23 = vpop.f32.mrb[7].mxu0  ;;  %v1013_v51 = vld [vmem:[#allocation4 + $0x8] sm:$0xff]  ;;  %v453_v39 = vsel %vm5339_vm5, 0, %v452_v33 }
 0x1b2   : > { %784 = vst.msk [vmem:[#allocation4 + $0x28] sm:$0xff] %vm778_vm4, %v766_v23  ;;  %v455_v23 = vld [vmem:[#allocation3 + $0x20] sm:$0x1]  ;;  %454 = vst [vmem:[#allocation3 + $0x18] sm:$0x1] %v453_v39 }
 0x1b6   : > { %v4731_v44 = vpop.f32.mrb[8].mxu0  ;;  %v1018_v43 = vld [vmem:[#allocation4 + $0x30] sm:$0xff] }
 0x1b7   : > { %v1022_v47 = vadd.f32 %v4731_v44, %v1014_v45  ;;  %v981_v48 = vpop.f32.mrb[9].mxu0  ;;  %v1016_v56 = vld [vmem:[#allocation4 + $0x20] sm:$0xff]  ;;  %v456_v45 = vsel %vm5339_vm5, 0, %v455_v23 }
 0x1b8   : > { %v1020_v11 = vadd.f32 %v1012_v49, %v981_v48  ;;  %v4732_v8 = vpop.f32.mrb[10].mxu0  ;;  %v1019_v57 = vld [vmem:[#allocation4 + $0x38] sm:$0xff]  ;;  %v461_v48 = vld [vmem:[#allocation3 + $0x30] sm:$0x1]  ;;  %457 = vst [vmem:[#allocation3 + $0x20] sm:$0x1] %v456_v45 }
 0x1b9   : > { %1030 = vst.msk [vmem:[#allocation4 + $0x10] sm:$0xff] %vm778_vm4, %v1022_v47  ;;  %v1023_v14 = vadd.f32 %v4732_v8, %v1015_v16  ;;  %v984_v50 = vpop.f32.mrb[11].mxu0  ;;  %v1017_v60 = vld [vmem:[#allocation4 + $0x28] sm:$0xff]  ;;  %v458_v47 = vld [vmem:[#allocation3 + $0x28] sm:$0x1] }
 0x1ba   : > { %1028 = vst.msk [vmem:[#allocation4] sm:$0xff] %vm778_vm4, %v1020_v11  ;;  %v1021_v52 = vadd.f32 %v1013_v51, %v984_v50  ;;  %v459_v49 = vsel %vm5339_vm5, 0, %v458_v47  ;;  %v462_v11 = vsel %vm5339_vm5, 0, %v461_v48  ;;  %v464_v8 = vld [vmem:[#allocation3 + $0x38] sm:$0x1] }
 0x1bb   : > { %1031 = vst.msk [vmem:[#allocation4 + $0x18] sm:$0xff] %vm778_vm4, %v1023_v14  ;;  %460 = vst [vmem:[#allocation3 + $0x28] sm:$0x1] %v459_v49  ;;  %v465_v16 = vsel %vm5339_vm5, 0, %v464_v8 }
 0x1bc   : > { %1029 = vst.msk [vmem:[#allocation4 + $0x8] sm:$0xff] %vm778_vm4, %v1021_v52  ;;  %463 = vst [vmem:[#allocation3 + $0x30] sm:$0x1] %v462_v11 }
 0x1bd   : > { %466 = vst [vmem:[#allocation3 + $0x38] sm:$0x1] %v465_v16 }
 0x1be   : > { %v4735_v53 = vpop.f32.mrb[12].mxu0 }
 0x1bf   : > { %v1026_v54 = vadd.f32 %v4735_v53, %v1018_v43  ;;  %v997_v40 = vpop.f32.mrb[13].mxu0 }
 0x1c0   : > { %v1024_v30 = vadd.f32 %v1016_v56, %v997_v40  ;;  %v4736_v41 = vpop.f32.mrb[14].mxu0  ;;  %v1199_v38 = vld [vmem:[#allocation4 + $0x10] sm:$0xff] }
 0x1c1   : > { %1034 = vst.msk [vmem:[#allocation4 + $0x30] sm:$0xff] %vm778_vm4, %v1026_v54  ;;  %v1027_v58 = vadd.f32 %v4736_v41, %v1019_v57  ;;  %v1000_v59 = vpop.f32.mrb[15].mxu0  ;;  %v1197_v0 = vld [vmem:[#allocation4] sm:$0xff]  ;;  %v474_v57 = vld [vmem:[#allocation3 + $0x4] sm:$0x1] }
 0x1c2   : > { %1032 = vst.msk [vmem:[#allocation4 + $0x20] sm:$0xff] %vm778_vm4, %v1024_v30  ;;  %v1025_v61 = vadd.f32 %v1017_v60, %v1000_v59  ;;  %v1200_v7 = vld [vmem:[#allocation4 + $0x18] sm:$0xff]  ;;  %v475_v59 = vsel %vm5392_vm10, 0, %v474_v57 }
 0x1c3   : > { %1035 = vst.msk [vmem:[#allocation4 + $0x38] sm:$0xff] %vm778_vm4, %v1027_v58  ;;  %v1198_v12 = vld [vmem:[#allocation4 + $0x8] sm:$0xff]  ;;  %v477_v60 = vld [vmem:[#allocation3 + $0xc] sm:$0x1]  ;;  %476 = vst [vmem:[#allocation3 + $0x4] sm:$0x1] %v475_v59 }
 0x1c4   : > { %1033 = vst.msk [vmem:[#allocation4 + $0x28] sm:$0xff] %vm778_vm4, %v1025_v61  ;;  %v478_v61 = vsel %vm5392_vm10, 0, %v477_v60 }
 0x1c5   : > { %479 = vst [vmem:[#allocation3 + $0xc] sm:$0x1] %v478_v61 }
 0x1c6   : > { %v4741_v62 = vpop.f32.mrb[16].mxu0 }
 0x1c7   : > { %v1207_v25 = vadd.f32 %v4741_v62, %v1199_v38  ;;  %v1166_v63 = vpop.f32.mrb[17].mxu0 }
 0x1c8   : > { %v1205_v4 = vadd.f32 %v1197_v0, %v1166_v63  ;;  %v4742_v5 = vpop.f32.mrb[18].mxu0  ;;  %v1203_v15 = vld [vmem:[#allocation4 + $0x30] sm:$0xff] }
 0x1c9   : > { %1215 = vst.msk [vmem:[#allocation4 + $0x10] sm:$0xff] %vm778_vm4, %v1207_v25  ;;  %v1208_v9 = vadd.f32 %v4742_v5, %v1200_v7  ;;  %v1169_v10 = vpop.f32.mrb[19].mxu0  ;;  %v1201_v20 = vld [vmem:[#allocation4 + $0x20] sm:$0xff] }
 0x1ca   : > { %1213 = vst.msk [vmem:[#allocation4] sm:$0xff] %vm778_vm4, %v1205_v4  ;;  %v1206_v13 = vadd.f32 %v1198_v12, %v1169_v10  ;;  %v1204_v31 = vld [vmem:[#allocation4 + $0x38] sm:$0xff] }
 0x1cb   : > { %1216 = vst.msk [vmem:[#allocation4 + $0x18] sm:$0xff] %vm778_vm4, %v1208_v9  ;;  %v1202_v36 = vld [vmem:[#allocation4 + $0x28] sm:$0xff] }
 0x1cc   : > { %1214 = vst.msk [vmem:[#allocation4 + $0x8] sm:$0xff] %vm778_vm4, %v1206_v13 }
 0x1ce   : > { %v4745_v19 = vpop.f32.mrb[20].mxu0 }
 0x1cf   : > { %v1211_v6 = vadd.f32 %v4745_v19, %v1203_v15  ;;  %v1182_v26 = vpop.f32.mrb[21].mxu0  ;;  %v486_v15 = vld [vmem:[#allocation3 + $0x24] sm:$0x1]  ;;  %v492_v19 = vld [vmem:[#allocation3 + $0x34] sm:$0x1] }
 0x1d0   : > { %v1209_v3 = vadd.f32 %v1201_v20, %v1182_v26  ;;  %v4746_v2 = vpop.f32.mrb[22].mxu0  ;;  %v1333_v50 = vld [vmem:[#allocation4 + $0x10] sm:$0xff]  ;;  %v487_v17 = vsel %vm5392_vm10, 0, %v486_v15  ;;  %v495_v20 = vld [vmem:[#allocation3 + $0x3c] sm:$0x1]  ;;  %v493_v22 = vsel %vm5392_vm10, 0, %v492_v19 }
 0x1d1   : > { %1219 = vst.msk [vmem:[#allocation4 + $0x30] sm:$0xff] %vm778_vm4, %v1211_v6  ;;  %v1212_v34 = vadd.f32 %v4746_v2, %v1204_v31  ;;  %v1185_v35 = vpop.f32.mrb[23].mxu0  ;;  %v1331_v53 = vld [vmem:[#allocation4] sm:$0xff]  ;;  %488 = vst [vmem:[#allocation3 + $0x24] sm:$0x1] %v487_v17  ;;  %v496_v21 = vsel %vm5392_vm10, 0, %v495_v20 }
 0x1d2   : > { %1217 = vst.msk [vmem:[#allocation4 + $0x20] sm:$0xff] %vm778_vm4, %v1209_v3  ;;  %v1210_v44 = vadd.f32 %v1202_v36, %v1185_v35  ;;  %v1334_v40 = vld [vmem:[#allocation4 + $0x18] sm:$0xff]  ;;  %494 = vst [vmem:[#allocation3 + $0x34] sm:$0x1] %v493_v22 }
 0x1d3   : > { %1220 = vst.msk [vmem:[#allocation4 + $0x38] sm:$0xff] %vm778_vm4, %v1212_v34  ;;  %v1332_v41 = vld [vmem:[#allocation4 + $0x8] sm:$0xff]  ;;  %497 = vst [vmem:[#allocation3 + $0x3c] sm:$0x1] %v496_v21 }
 0x1d4   : > { %1218 = vst.msk [vmem:[#allocation4 + $0x28] sm:$0xff] %vm778_vm4, %v1210_v44 }
 0x1d6   : > { %v4751_v14 = vpop.f32.mrb[24].mxu0 }
 0x1d7   : > { %v1341_v51 = vadd.f32 %v4751_v14, %v1333_v50  ;;  %v1300_v52 = vpop.f32.mrb[25].mxu0 }
 0x1d8   : > { %v1339_v43 = vadd.f32 %v1331_v53, %v1300_v52  ;;  %v4752_v54 = vpop.f32.mrb[26].mxu0  ;;  %v1337_v38 = vld [vmem:[#allocation4 + $0x30] sm:$0xff] }
 0x1d9   : > { %1349 = vst.msk [vmem:[#allocation4 + $0x10] sm:$0xff] %vm778_vm4, %v1341_v51  ;;  %v1342_v56 = vadd.f32 %v4752_v54, %v1334_v40  ;;  %v1303_v30 = vpop.f32.mrb[27].mxu0  ;;  %v1335_v0 = vld [vmem:[#allocation4 + $0x20] sm:$0xff] }
 0x1da   : > { %1347 = vst.msk [vmem:[#allocation4] sm:$0xff] %vm778_vm4, %v1339_v43  ;;  %v1340_v58 = vadd.f32 %v1332_v41, %v1303_v30  ;;  %v1338_v7 = vld [vmem:[#allocation4 + $0x38] sm:$0xff] }
 0x1db   : > { %1350 = vst.msk [vmem:[#allocation4 + $0x18] sm:$0xff] %vm778_vm4, %v1342_v56  ;;  %v1336_v12 = vld [vmem:[#allocation4 + $0x28] sm:$0xff] }
 0x1dc   : > { %1348 = vst.msk [vmem:[#allocation4 + $0x8] sm:$0xff] %vm778_vm4, %v1340_v58 }
 0x1de   : > { %v4755_v62 = vpop.f32.mrb[28].mxu0 }
 0x1df   : > { %v1345_v25 = vadd.f32 %v4755_v62, %v1337_v38  ;;  %v1316_v63 = vpop.f32.mrb[29].mxu0 }
 0x1e0   : > { %v1343_v4 = vadd.f32 %v1335_v0, %v1316_v63  ;;  %v4756_v5 = vpop.f32.mrb[30].mxu0  ;;  %v1579_v26 = vld [vmem:[#allocation4 + $0x10] sm:$0xff] }
 0x1e1   : > { %1353 = vst.msk [vmem:[#allocation4 + $0x30] sm:$0xff] %vm778_vm4, %v1345_v25  ;;  %v1346_v9 = vadd.f32 %v4756_v5, %v1338_v7  ;;  %v1319_v10 = vpop.f32.mrb[31].mxu0  ;;  %v1577_v3 = vld [vmem:[#allocation4] sm:$0xff] }
 0x1e2   : > { %1351 = vst.msk [vmem:[#allocation4 + $0x20] sm:$0xff] %vm778_vm4, %v1343_v4  ;;  %v1344_v13 = vadd.f32 %v1336_v12, %v1319_v10  ;;  %v1580_v32 = vld [vmem:[#allocation4 + $0x18] sm:$0xff]  ;;  %v467_v12 = vld [vmem:[#allocation3 + $0x40] sm:$0x1] }
 0x1e3   : > { %1354 = vst.msk [vmem:[#allocation4 + $0x38] sm:$0xff] %vm778_vm4, %v1346_v9  ;;  %v1578_v35 = vld [vmem:[#allocation4 + $0x8] sm:$0xff]  ;;  %v468_v15 = vsel %vm5339_vm5, 0, %v467_v12 }
 0x1e4   : > { %1352 = vst.msk [vmem:[#allocation4 + $0x28] sm:$0xff] %vm778_vm4, %v1344_v13  ;;  %v498_v13 = vld [vmem:[#allocation3 + $0x44] sm:$0x1]  ;;  %469 = vst [vmem:[#allocation3 + $0x40] sm:$0x1] %v468_v15 }
 0x1e5   : > { %v499_v17 = vsel %vm5392_vm10, 0, %v498_v13 }
 0x1e6   : > { %v4761_v6 = vpop.f32.mrb[32].mxu0  ;;  %500 = vst [vmem:[#allocation3 + $0x44] sm:$0x1] %v499_v17 }
 0x1e7   : > { %v1587_v27 = vadd.f32 %v4761_v6, %v1579_v26  ;;  %v1546_v28 = vpop.f32.mrb[33].mxu0 }
 0x1e8   : > { %v1585_v2 = vadd.f32 %v1577_v3, %v1546_v28  ;;  %v4762_v31 = vpop.f32.mrb[34].mxu0  ;;  %v1583_v23 = vld [vmem:[#allocation4 + $0x30] sm:$0xff] }
 0x1e9   : > { %1595 = vst.msk [vmem:[#allocation4 + $0x10] sm:$0xff] %vm778_vm4, %v1587_v27  ;;  %v1588_v33 = vadd.f32 %v4762_v31, %v1580_v32  ;;  %v1549_v34 = vpop.f32.mrb[35].mxu0  ;;  %v1581_v47 = vld [vmem:[#allocation4 + $0x20] sm:$0xff]  ;;  %v470_v31 = vld [vmem:[#allocation3 + $0x48] sm:$0x1] }
 0x1ea   : > { %1593 = vst.msk [vmem:[#allocation4] sm:$0xff] %vm778_vm4, %v1585_v2  ;;  %v1586_v36 = vadd.f32 %v1578_v35, %v1549_v34  ;;  %v1584_v11 = vld [vmem:[#allocation4 + $0x38] sm:$0xff] }
 0x1eb   : > { %1596 = vst.msk [vmem:[#allocation4 + $0x18] sm:$0xff] %vm778_vm4, %v1588_v33  ;;  %v1582_v14 = vld [vmem:[#allocation4 + $0x28] sm:$0xff]  ;;  %v501_v32 = vld [vmem:[#allocation3 + $0x4c] sm:$0x1]  ;;  %v471_v33 = vsel %vm5339_vm5, 0, %v470_v31 }
 0x1ec   : > { %1594 = vst.msk [vmem:[#allocation4 + $0x8] sm:$0xff] %vm778_vm4, %v1586_v36  ;;  %v502_v34 = vsel %vm5392_vm10, 0, %v501_v32  ;;  %472 = vst [vmem:[#allocation3 + $0x48] sm:$0x1] %v471_v33  ;;  %v5846_v31 = vld [vmem:[%s6156_s3] ss:$0 sm:$0xff] }
 0x1ed   : > { %503 = vst [vmem:[#allocation3 + $0x4c] sm:$0x1] %v502_v34 }
 0x1ee   : > { %v4765_v39 = vpop.f32.mrb[36].mxu0 }
 0x1ef   : > { %v1591_v44 = vadd.f32 %v4765_v39, %v1583_v23  ;;  %v1562_v45 = vpop.f32.mrb[37].mxu0 }
 0x1f0   : > { %v1589_v48 = vadd.f32 %v1581_v47, %v1562_v45  ;;  %v4766_v49 = vpop.f32.mrb[38].mxu0  ;;  %v1761_v52 = vld [vmem:[#allocation4 + $0x10] sm:$0xff] }
 0x1f1   : > { %1599 = vst.msk [vmem:[#allocation4 + $0x30] sm:$0xff] %vm778_vm4, %v1591_v44  ;;  %v1592_v8 = vadd.f32 %v4766_v49, %v1584_v11  ;;  %v1565_v16 = vpop.f32.mrb[39].mxu0  ;;  %v1759_v54 = vld [vmem:[#allocation4] sm:$0xff] }
 0x1f2   : > { %1597 = vst.msk [vmem:[#allocation4 + $0x20] sm:$0xff] %vm778_vm4, %v1589_v48  ;;  %v1590_v50 = vadd.f32 %v1582_v14, %v1565_v16  ;;  %v1762_v30 = vld [vmem:[#allocation4 + $0x18] sm:$0xff] }
 0x1f3   : > { %1600 = vst.msk [vmem:[#allocation4 + $0x38] sm:$0xff] %vm778_vm4, %v1592_v8  ;;  %v1760_v58 = vld [vmem:[#allocation4 + $0x8] sm:$0xff] }
 0x1f4   : > { %1598 = vst.msk [vmem:[#allocation4 + $0x28] sm:$0xff] %vm778_vm4, %v1590_v50 }
 0x1f6   : > { %v4771_v51 = vpop.f32.mrb[40].mxu0 }
 0x1f7   : > { %v1769_v53 = vadd.f32 %v4771_v51, %v1761_v52  ;;  %v1728_v43 = vpop.f32.mrb[41].mxu0 }
 0x1f8   : > { %v1767_v40 = vadd.f32 %v1759_v54, %v1728_v43  ;;  %v4772_v56 = vpop.f32.mrb[42].mxu0  ;;  %v1765_v61 = vld [vmem:[#allocation4 + $0x30] sm:$0xff] }
 0x1f9   : > { %1777 = vst.msk [vmem:[#allocation4 + $0x10] sm:$0xff] %vm778_vm4, %v1769_v53  ;;  %v1770_v41 = vadd.f32 %v4772_v56, %v1762_v30  ;;  %v1731_v57 = vpop.f32.mrb[43].mxu0  ;;  %v1763_v25 = vld [vmem:[#allocation4 + $0x20] sm:$0xff] }
 0x1fa   : > { %1775 = vst.msk [vmem:[#allocation4] sm:$0xff] %vm778_vm4, %v1767_v40  ;;  %v1768_v59 = vadd.f32 %v1760_v58, %v1731_v57  ;;  %v1766_v4 = vld [vmem:[#allocation4 + $0x38] sm:$0xff] }
 0x1fb   : > { %1778 = vst.msk [vmem:[#allocation4 + $0x18] sm:$0xff] %vm778_vm4, %v1770_v41  ;;  %v1764_v9 = vld [vmem:[#allocation4 + $0x28] sm:$0xff] }
 0x1fc   : > { %1776 = vst.msk [vmem:[#allocation4 + $0x8] sm:$0xff] %vm778_vm4, %v1768_v59 }
 0x1fe   : > { %v4775_v60 = vpop.f32.mrb[44].mxu0 }
 0x1ff   : > { %v1773_v62 = vadd.f32 %v4775_v60, %v1765_v61  ;;  %v1744_v38 = vpop.f32.mrb[45].mxu0 }
 0x200   : > { %v1771_v63 = vadd.f32 %v1763_v25, %v1744_v38  ;;  %v4776_v0 = vpop.f32.mrb[46].mxu0  ;;  %v1896_v19 = vld [vmem:[#allocation4 + $0x10] sm:$0xff] }
 0x201   : > { %1781 = vst.msk [vmem:[#allocation4 + $0x30] sm:$0xff] %vm778_vm4, %v1773_v62  ;;  %v1774_v5 = vadd.f32 %v4776_v0, %v1766_v4  ;;  %v1747_v7 = vpop.f32.mrb[47].mxu0  ;;  %v1894_v22 = vld [vmem:[#allocation4] sm:$0xff] }
 0x202   : > { %1779 = vst.msk [vmem:[#allocation4 + $0x20] sm:$0xff] %vm778_vm4, %v1771_v63  ;;  %v1772_v10 = vadd.f32 %v1764_v9, %v1747_v7  ;;  %v1897_v26 = vld [vmem:[#allocation4 + $0x18] sm:$0xff] }
 0x203   : > { %1782 = vst.msk [vmem:[#allocation4 + $0x38] sm:$0xff] %vm778_vm4, %v1774_v5  ;;  %v1895_v3 = vld [vmem:[#allocation4 + $0x8] sm:$0xff] }
 0x204   : > { %1780 = vst.msk [vmem:[#allocation4 + $0x28] sm:$0xff] %vm778_vm4, %v1772_v10 }
 0x206   : > { %v4781_v18 = vpop.f32.mrb[48].mxu0 }
 0x207   : > { %v1904_v20 = vadd.f32 %v4781_v18, %v1896_v19  ;;  %v1863_v24 = vpop.f32.mrb[49].mxu0 }
 0x208   : > { %v1902_v21 = vadd.f32 %v1894_v22, %v1863_v24  ;;  %v4782_v6 = vpop.f32.mrb[50].mxu0  ;;  %v1900_v36 = vld [vmem:[#allocation4 + $0x30] sm:$0xff] }
 0x209   : > { %1912 = vst.msk [vmem:[#allocation4 + $0x10] sm:$0xff] %vm778_vm4, %v1904_v20  ;;  %v1905_v27 = vadd.f32 %v4782_v6, %v1897_v26  ;;  %v1866_v28 = vpop.f32.mrb[51].mxu0  ;;  %v1898_v44 = vld [vmem:[#allocation4 + $0x20] sm:$0xff] }
 0x20a   : > { %1910 = vst.msk [vmem:[#allocation4] sm:$0xff] %vm778_vm4, %v1902_v21  ;;  %v1903_v2 = vadd.f32 %v1895_v3, %v1866_v28  ;;  %v1901_v48 = vld [vmem:[#allocation4 + $0x38] sm:$0xff]  ;;  %v5841_v21 = vld [vmem:[%s6155_s2] ss:$0 sm:$0xff] }
 0x20b   : > { %1913 = vst.msk [vmem:[#allocation4 + $0x18] sm:$0xff] %vm778_vm4, %v1905_v27  ;;  %v1899_v8 = vld [vmem:[#allocation4 + $0x28] sm:$0xff] }
 0x20c   : > { %1911 = vst.msk [vmem:[#allocation4 + $0x8] sm:$0xff] %vm778_vm4, %v1903_v2 }
 0x20e   : > { %v4785_v35 = vpop.f32.mrb[52].mxu0 }
 0x20f   : > { %v1908_v39 = vadd.f32 %v4785_v35, %v1900_v36  ;;  %v1879_v23 = vpop.f32.mrb[53].mxu0 }
 0x210   : > { %v1906_v45 = vadd.f32 %v1898_v44, %v1879_v23  ;;  %v4786_v47 = vpop.f32.mrb[54].mxu0  ;;  %v2142_v14 = vld [vmem:[#allocation4 + $0x10] sm:$0xff] }
 0x211   : > { %1916 = vst.msk [vmem:[#allocation4 + $0x30] sm:$0xff] %vm778_vm4, %v1908_v39  ;;  %v1909_v49 = vadd.f32 %v4786_v47, %v1901_v48  ;;  %v1882_v11 = vpop.f32.mrb[55].mxu0  ;;  %v2140_v52 = vld [vmem:[#allocation4] sm:$0xff] }
 0x212   : > { %1914 = vst.msk [vmem:[#allocation4 + $0x20] sm:$0xff] %vm778_vm4, %v1906_v45  ;;  %v1907_v16 = vadd.f32 %v1899_v8, %v1882_v11  ;;  %v2143_v54 = vld [vmem:[#allocation4 + $0x18] sm:$0xff]  ;;  %v2673_v45 = vld [vmem:[#allocation3] sm:$0xf] }
 0x213   : > { %1917 = vst.msk [vmem:[#allocation4 + $0x38] sm:$0xff] %vm778_vm4, %v1909_v49  ;;  %v2141_v30 = vld [vmem:[#allocation4 + $0x8] sm:$0xff] }
 0x214   : > { %1915 = vst.msk [vmem:[#allocation4 + $0x28] sm:$0xff] %vm778_vm4, %v1907_v16 }
 0x216   : > { %v4791_v29 = vpop.f32.mrb[56].mxu0 }
 0x217   : > { %v2150_v50 = vadd.f32 %v4791_v29, %v2142_v14  ;;  %v2109_v51 = vpop.f32.mrb[57].mxu0 }
 0x218   : > { %v2148_v53 = vadd.f32 %v2140_v52, %v2109_v51  ;;  %v4792_v43 = vpop.f32.mrb[58].mxu0  ;;  %v2146_v58 = vld [vmem:[#allocation4 + $0x30] sm:$0xff]  ;;  %v2693_v51 = vshll.u32 %v2673_v45, 16 }
 0x219   : > { %2158 = vst.msk [vmem:[#allocation4 + $0x10] sm:$0xff] %vm778_vm4, %v2150_v50  ;;  %v2151_v40 = vadd.f32 %v4792_v43, %v2143_v54  ;;  %v2112_v56 = vpop.f32.mrb[59].mxu0  ;;  %v2144_v61 = vld [vmem:[#allocation4 + $0x20] sm:$0xff]  ;;  %v2690_v50 = vshrl.u32 %v2673_v45, 16 }
 0x21a   : > { %2156 = vst.msk [vmem:[#allocation4] sm:$0xff] %vm778_vm4, %v2148_v53  ;;  %v2149_v41 = vadd.f32 %v2141_v30, %v2112_v56  ;;  %v2147_v25 = vld [vmem:[#allocation4 + $0x38] sm:$0xff]  ;;  %v5862_v30 = vsel %vm2596_vm6, %v5754_v55, 0 }
 0x21b   : > { %2159 = vst.msk [vmem:[#allocation4 + $0x18] sm:$0xff] %vm778_vm4, %v2151_v40  ;;  %v2145_v4 = vld [vmem:[#allocation4 + $0x28] sm:$0xff] }
 0x21c   : > { %2157 = vst.msk [vmem:[#allocation4 + $0x8] sm:$0xff] %vm778_vm4, %v2149_v41 }
 0x21e   : > { %v4795_v57 = vpop.f32.mrb[60].mxu0 }
 0x21f   : > { %v2154_v59 = vadd.f32 %v4795_v57, %v2146_v58  ;;  %v2125_v60 = vpop.f32.mrb[61].mxu0 }
 0x220   : > { %v2152_v62 = vadd.f32 %v2144_v61, %v2125_v60  ;;  %v4796_v38 = vpop.f32.mrb[62].mxu0  ;;  %v2324_v9 = vld [vmem:[#allocation4 + $0x10] sm:$0xff]  ;;  %v5866_v60 = vrot.slane %v2693_v51, 5 }
 0x221   : > { %2162 = vst.msk [vmem:[#allocation4 + $0x30] sm:$0xff] %vm778_vm4, %v2154_v59  ;;  %v2155_v63 = vadd.f32 %v4796_v38, %v2147_v25  ;;  %v2128_v0 = vpop.f32.mrb[63].mxu0  ;;  %v2322_v13 = vld [vmem:[#allocation4] sm:$0xff]  ;;  %v5864_v59 = vrot.slane %v2690_v50, 4  ;;  %v2525_v50 = vld [vmem:[#allocation3 + $0x20] sm:$0xf] }
 0x222   : > { %2160 = vst.msk [vmem:[#allocation4 + $0x20] sm:$0xff] %vm778_vm4, %v2152_v62  ;;  %v2153_v5 = vadd.f32 %v2145_v4, %v2128_v0  ;;  %v2325_v18 = vld [vmem:[#allocation4 + $0x18] sm:$0xff] }
 0x223   : > { %2163 = vst.msk [vmem:[#allocation4 + $0x38] sm:$0xff] %vm778_vm4, %v2155_v63  ;;  %v2323_v24 = vld [vmem:[#allocation4 + $0x8] sm:$0xff] }
 0x224   : > { %2161 = vst.msk [vmem:[#allocation4 + $0x28] sm:$0xff] %vm778_vm4, %v2153_v5 }
 0x226   : > { %v4801_v7 = vpop.f32.mrb[64].mxu0 }
 0x227   : > { %v2332_v10 = vadd.f32 %v4801_v7, %v2324_v9  ;;  %v2291_v12 = vpop.f32.mrb[65].mxu0 }
 0x228   : > { %v2330_v15 = vadd.f32 %v2322_v13, %v2291_v12  ;;  %v4802_v17 = vpop.f32.mrb[66].mxu0  ;;  %v2328_v26 = vld [vmem:[#allocation4 + $0x30] sm:$0xff] }
 0x229   : > { %2340 = vst.msk [vmem:[#allocation4 + $0x10] sm:$0xff] %vm778_vm4, %v2332_v10  ;;  %v2333_v19 = vadd.f32 %v4802_v17, %v2325_v18  ;;  %v2294_v20 = vpop.f32.mrb[67].mxu0  ;;  %v2326_v3 = vld [vmem:[#allocation4 + $0x20] sm:$0xff] }
 0x22a   : > { %2338 = vst.msk [vmem:[#allocation4] sm:$0xff] %vm778_vm4, %v2330_v15  ;;  %v2331_v22 = vadd.f32 %v2323_v24, %v2294_v20  ;;  %v2329_v34 = vld [vmem:[#allocation4 + $0x38] sm:$0xff]  ;;  %v2522_v15 = vld [vmem:[#allocation3 + $0x1c] sm:$0x1] }
 0x22b   : > { %2341 = vst.msk [vmem:[#allocation4 + $0x18] sm:$0xff] %vm778_vm4, %v2333_v19  ;;  %v2327_v44 = vld [vmem:[#allocation4 + $0x28] sm:$0xff] }
 0x22c   : > { %2339 = vst.msk [vmem:[#allocation4 + $0x8] sm:$0xff] %vm778_vm4, %v2331_v22 }
 0x22e   : > { %v4805_v6 = vpop.f32.mrb[68].mxu0 }
 0x22f   : > { %v2336_v27 = vadd.f32 %v4805_v6, %v2328_v26  ;;  %v2307_v28 = vpop.f32.mrb[69].mxu0 }
 0x230   : > { %v2348_v2 = vld [vmem:[#allocation4 + $0x10] sm:$0xff]  ;;  %v2334_v32 = vadd.f32 %v2326_v3, %v2307_v28  ;;  %v4806_v33 = vpop.f32.mrb[70].mxu0 }
 0x231   : > { %v2363_v35 = vmul.f32 %v5841_v21, %v2348_v2  ;;  %v2346_v36 = vld [vmem:[#allocation4] sm:$0xff]  ;;  %2344 = vst.msk [vmem:[#allocation4 + $0x30] sm:$0xff] %vm778_vm4, %v2336_v27  ;;  %v2337_v39 = vadd.f32 %v4806_v33, %v2329_v34  ;;  %v2310_v23 = vpop.f32.mrb[71].mxu0 }
 0x232   : > { %v2361_v47 = vmul.f32 %v5841_v21, %v2346_v36  ;;  %v2349_v48 = vld [vmem:[#allocation4 + $0x18] sm:$0xff]  ;;  %2342 = vst.msk [vmem:[#allocation4 + $0x20] sm:$0xff] %vm778_vm4, %v2334_v32  ;;  %v2335_v49 = vadd.f32 %v2327_v44, %v2310_v23  ;;  %v2516_v36 = vld [vmem:[#allocation3 + $0x14] sm:$0x1] }
 0x233   : > { %v2378_v11 = vadd.f32 %v5846_v31, %v2363_v35  ;;  %v2364_v8 = vmul.f32 %v5841_v21, %v2349_v48  ;;  %v2347_v16 = vld [vmem:[#allocation4 + $0x8] sm:$0xff]  ;;  %2345 = vst.msk [vmem:[#allocation4 + $0x38] sm:$0xff] %vm778_vm4, %v2337_v39  ;;  %v2507_v48 = vld [vmem:[#allocation3 + $0x8] sm:$0xf] }
 0x234   : > { %v2376_v29 = vadd.f32 %v5846_v31, %v2361_v47  ;;  %v2362_v14 = vmul.f32 %v5841_v21, %v2347_v16  ;;  %2343 = vst.msk [vmem:[#allocation4 + $0x28] sm:$0xff] %vm778_vm4, %v2335_v49  ;;  %v2513_v49 = vld [vmem:[#allocation3 + $0x10] sm:$0xf] }
 0x235   : > { %v2386_v52 = vmax.f32 %v2378_v11, 0.0  ;;  %v2379_v53 = vadd.f32 %v5846_v31, %v2364_v8 }
 0x236   : > { %v2384_v43 = vmax.f32 %v2376_v29, 0.0  ;;  %v2377_v54 = vadd.f32 %v5846_v31, %v2362_v14  ;;  %v2519_v14 = vld [vmem:[#allocation3 + $0x18] sm:$0xf] }
 0x237   : > { %v4620_v40 = vpack.c.bf16 %v2386_v52, %v2386_v52  ;;  %v2387_v56 = vmax.f32 %v2379_v53, 0.0 }
 0x238   : > { %v4618_v41 = vpack.c.bf16 %v2384_v43, %v2384_v43  ;;  %v2385_v57 = vmax.f32 %v2377_v54, 0.0  ;;  %v2352_v58 = vld [vmem:[#allocation4 + $0x30] sm:$0xff]  ;;  %v2510_v54 = vld [vmem:[#allocation3 + $0xc] sm:$0x1] }
 0x239   : > { %v2441_v61 = vshrl.u32 %v4620_v40, 16  ;;  %v2444_v62 = vshll.u32 %v4620_v40, 16  ;;  %v4621_v38 = vpack.c.bf16 %v2387_v56, %v2387_v56  ;;  %v2367_v25 = vmul.f32 %v5841_v21, %v2352_v58  ;;  %v2350_v63 = vld [vmem:[#allocation4 + $0x20] sm:$0xff] }
 0x23a   : > { %v2425_v0 = vshrl.u32 %v4618_v41, 16  ;;  %v2428_v4 = vshll.u32 %v4618_v41, 16  ;;  %v4619_v5 = vpack.c.bf16 %v2385_v57, %v2385_v57  ;;  %v2365_v7 = vmul.f32 %v5841_v21, %v2350_v63  ;;  %v2353_v13 = vld [vmem:[#allocation4 + $0x38] sm:$0xff]  ;;  %v2543_v57 = vld [vmem:[#allocation3 + $0x38] sm:$0xf] }
 0x23b   : > { %v2443_v55 = vrot.slane %v2441_v61, 7  ;;  %v2449_v9 = vshrl.u32 %v4621_v38, 16  ;;  %v2452_v10 = vshll.u32 %v4621_v38, 16  ;;  %v2382_v12 = vadd.f32 %v5846_v31, %v2367_v25  ;;  %v2351_v32 = vld [vmem:[#allocation4 + $0x28] sm:$0xff]  ;;  %v2528_v25 = vld [vmem:[#allocation3 + $0x24] sm:$0x1] }
 0x23c   : > { %v2427_v17 = vrot.slane %v2425_v0, 7  ;;  %v2433_v18 = vshrl.u32 %v4619_v5, 16  ;;  %v2436_v19 = vshll.u32 %v4619_v5, 16  ;;  %v2380_v20 = vadd.f32 %v5846_v31, %v2365_v7  ;;  %v2546_v63 = vld [vmem:[#allocation3 + $0x3c] sm:$0x1] }
 0x23d   : > { %v2446_v24 = vor.u32 %v2444_v62, %v2443_v55  ;;  %v2447_v22 = vrot.slane %v2443_v55, 4  ;;  %v2451_v6 = vrot.slane %v2449_v9, 7  ;;  %v2390_v26 = vmax.f32 %v2382_v12, 0.0  ;;  %v2531_v5 = vld [vmem:[#allocation3 + $0x28] sm:$0xf] }
 0x23e   : > { %v2431_v27 = vrot.slane %v2427_v17, 4  ;;  %v2435_v28 = vrot.slane %v2433_v18, 7  ;;  %v2388_v3 = vmax.f32 %v2380_v20, 0.0  ;;  %v2368_v2 = vmul.f32 %v5841_v21, %v2353_v13  ;;  %v2534_v55 = vld [vmem:[#allocation3 + $0x2c] sm:$0x1] }
 0x23f   : > { %v2523_v33 = vsel %vm5339_vm5, %v2447_v22, %v2522_v15  ;;  %v2454_v34 = vor.u32 %v2452_v10, %v2451_v6  ;;  %v2455_v35 = vrot.slane %v2451_v6, 4  ;;  %v4624_v39 = vpack.c.bf16 %v2390_v26, %v2390_v26  ;;  %v2674_v13 = vld [vmem:[#allocation3 + $0x4] sm:$0x1] }
 0x240   : > { %2524 = vst [vmem:[#allocation3 + $0x1c] sm:$0x1] %v2523_v33  ;;  %v2438_v23 = vor.u32 %v2436_v19, %v2435_v28  ;;  %v2439_v44 = vrot.slane %v2435_v28, 4  ;;  %v4622_v45 = vpack.c.bf16 %v2388_v3, %v2388_v3  ;;  %v2383_v47 = vadd.f32 %v5846_v31, %v2368_v2  ;;  %v2552_v28 = vld [vmem:[#allocation3 + $0x44] sm:$0x1] }
 0x241   : > { %v2473_v11 = vshrl.u32 %v4624_v39, 16  ;;  %v2476_v8 = vshll.u32 %v4624_v39, 16  ;;  %v2366_v16 = vmul.f32 %v5841_v21, %v2351_v32  ;;  %v2430_v29 = vor.u32 %v2428_v4, %v2427_v17  ;;  %v2537_v32 = vld [vmem:[#allocation3 + $0x30] sm:$0xf] }
 0x242   : > { %v2517_v51 = vsel %vm5339_vm5, %v2439_v44, %v2516_v36  ;;  %v2457_v52 = vshrl.u32 %v4622_v45, 16  ;;  %v2460_v53 = vshll.u32 %v4622_v45, 16  ;;  %v2391_v43 = vmax.f32 %v2383_v47, 0.0 }
 0x243   : > { %2518 = vst [vmem:[#allocation3 + $0x14] sm:$0x1] %v2517_v51  ;;  %v2475_v40 = vrot.slane %v2473_v11, 7  ;;  %v2381_v56 = vadd.f32 %v5846_v31, %v2366_v16  ;;  %v2508_v41 = vsel %vm5407_vm11, %v2430_v29, %v2507_v48  ;;  %v2514_v21 = vsel %vm5407_vm11, %v2438_v23, %v2513_v49  ;;  %v5907_v23 = vld [vmem:[%s6157_s4 + $0x8] sm:$0xf] }
 0x244   : > { %v2459_v58 = vrot.slane %v2457_v52, 7  ;;  %v4625_v61 = vpack.c.bf16 %v2391_v43, %v2391_v43  ;;  %2509 = vst [vmem:[#allocation3 + $0x8] sm:$0xf] %v2508_v41  ;;  %2515 = vst [vmem:[#allocation3 + $0x10] sm:$0xf] %v2514_v21  ;;  %v2520_v62 = vsel %vm5407_vm11, %v2446_v24, %v2519_v14  ;;  %v2526_v38 = vsel %vm5407_vm11, %v2454_v34, %v2525_v50 }
 0x245   : > { %v2478_v31 = vor.u32 %v2476_v8, %v2475_v40  ;;  %v2479_v0 = vrot.slane %v2475_v40, 4  ;;  %v2389_v4 = vmax.f32 %v2381_v56, 0.0  ;;  %2521 = vst [vmem:[#allocation3 + $0x18] sm:$0xf] %v2520_v62  ;;  %2527 = vst [vmem:[#allocation3 + $0x20] sm:$0xf] %v2526_v38  ;;  %v2511_v7 = vsel %vm5339_vm5, %v2431_v27, %v2510_v54 }
 0x246   : > { %v2462_v9 = vor.u32 %v2460_v53, %v2459_v58  ;;  %v2463_v10 = vrot.slane %v2459_v58, 4  ;;  %v2481_v12 = vshrl.u32 %v4625_v61, 16  ;;  %2512 = vst [vmem:[#allocation3 + $0xc] sm:$0x1] %v2511_v7  ;;  %v2696_v15 = vor.u32 %v5866_v60, %v5864_v59  ;;  %v2549_v27 = vld [vmem:[#allocation3 + $0x40] sm:$0xf] }
 0x247   : > { %v4623_v17 = vpack.c.bf16 %v2389_v4, %v2389_v4  ;;  %v2544_v18 = vsel %vm5407_vm11, %v2478_v31, %v2543_v57  ;;  %v2529_v19 = vsel %vm5339_vm5, %v2455_v35, %v2528_v25  ;;  %v2547_v20 = vsel %vm5339_vm5, %v2479_v0, %v2546_v63  ;;  %v2540_v34 = vld [vmem:[#allocation3 + $0x34] sm:$0x1]  ;;  %v5909_v45 = vld [vmem:[#allocation3 + $0x1c] sm:$0x1] }
 0x248   : > { %v2483_v24 = vrot.slane %v2481_v12, 7  ;;  %v2484_v22 = vshll.u32 %v4625_v61, 16  ;;  %v2532_v6 = vsel %vm5407_vm11, %v2462_v9, %v2531_v5  ;;  %2545 = vst [vmem:[#allocation3 + $0x38] sm:$0xf] %v2544_v18  ;;  %2530 = vst [vmem:[#allocation3 + $0x24] sm:$0x1] %v2529_v19  ;;  %v2535_v59 = vsel %vm5339_vm5, %v2463_v10, %v2534_v55 }
 0x249   : > { %2548 = vst [vmem:[#allocation3 + $0x3c] sm:$0x1] %v2547_v20  ;;  %v2465_v60 = vshrl.u32 %v4623_v17, 16  ;;  %2533 = vst [vmem:[#allocation3 + $0x28] sm:$0xf] %v2532_v6  ;;  %v2699_v26 = vshll.u32 %v2674_v13, 16 }
 0x24a   : > { %2536 = vst [vmem:[#allocation3 + $0x2c] sm:$0x1] %v2535_v59  ;;  %v2486_v3 = vor.u32 %v2484_v22, %v2483_v24  ;;  %v2487_v2 = vrot.slane %v2483_v24, 4  ;;  %v5902_v33 = vrot.slane %v2696_v15, 4  ;;  %v2468_v36 = vshll.u32 %v4623_v17, 16 }
 0x24b   : > { %v2467_v35 = vrot.slane %v2465_v60, 7  ;;  %v5058_v39 = vld [vmem:[#allocation3] ss:$8 sps:$4 sm:$0xff]   ;;  %v2701_v16 = vrot.slane %v2699_v26, 5  ;;  %v2677_v51 = vld [vmem:[#allocation3 + $0x10] sm:$0xf] }
 0x24c   : > { %v5059_v44 = vld [vmem:[#allocation3 + $0x10] ss:$8 sps:$4 sm:$0xff]   ;;  %v2550_v47 = vsel %vm5407_vm11, %v2486_v3, %v2549_v27  ;;  %v2553_v48 = vsel %vm5339_vm5, %v2487_v2, %v2552_v28  ;;  %4809 = vmatprep.mubr.msk.bf16.mxu1 %vm778_vm4, %v5058_v39  ;;  %v2675_v8 = vld [vmem:[#allocation3 + $0x8] sm:$0xf]  ;;  %v2718_v54 = vshrl.u32 %v2677_v51, 16  ;;  %v2721_v58 = vshll.u32 %v2677_v51, 16 }
 0x24d   : > { %v2470_v49 = vor.u32 %v2468_v36, %v2467_v35  ;;  %v2471_v11 = vrot.slane %v2467_v35, 4  ;;  %2551 = vst [vmem:[#allocation3 + $0x40] sm:$0xf] %v2550_v47  ;;  %2554 = vst [vmem:[#allocation3 + $0x44] sm:$0x1] %v2553_v48  ;;  %4810 = vmatmul.mubr.msk.bf16.vlgmr.msra.gmra.mrb[0].mxu1 %vm778_vm4, %v5059_v44  ;;  %v2704_v14 = vshrl.u32 %v2675_v8, 16  ;;  %v2702_v1 = vsel %vm5539_vm0, %v5902_v33, %v2701_v16 }
 0x24e   : > { %v2676_v29 = vld [vmem:[#allocation3 + $0xc] sm:$0x1]  ;;  %v2707_v50 = vshll.u32 %v2675_v8, 16  ;;  %4818 = vmatpush3.bf16.msra.mxu1 %v5862_v30  ;;  %v2679_v43 = vld [vmem:[#allocation3 + $0x18] sm:$0xf]  ;;  %v2720_v57 = vrot.slane %v2718_v54, 4 }
 0x24f   : > { %v2538_v52 = vsel %vm5407_vm11, %v2470_v49, %v2537_v32  ;;  %v2713_v53 = vshll.u32 %v2676_v29, 16  ;;  %v2541_v40 = vsel %vm5339_vm5, %v2471_v11, %v2540_v34  ;;  %v2706_v41 = vrot.slane %v2704_v14, 4  ;;  %4972 = vmatprep.subr.msk.bf16.mxu1 %vm2596_vm6, %v5907_v23  ;;  %v2681_v61 = vld [vmem:[#allocation3 + $0x20] sm:$0xf]  ;;  %v2678_v38 = vld [vmem:[#allocation3 + $0x14] sm:$0x1] }
 0x250   : > { %v5060_v56 = vld [vmem:[#allocation3 + $0x20] ss:$8 sps:$4 sm:$0xff]   ;;  %2539 = vst [vmem:[#allocation3 + $0x30] sm:$0xf] %v2538_v52  ;;  %v2709_v21 = vrot.slane %v2707_v50, 5  ;;  %v2732_v30 = vshrl.u32 %v2679_v43, 16 }
 0x251   : > { %2542 = vst [vmem:[#allocation3 + $0x34] sm:$0x1] %v2541_v40  ;;  %v2741_v37 = vshll.u32 %v5909_v45, 16  ;;  %4813 = vmatprep.mubr.msk.bf16.mxu1 %vm778_vm4, %v5060_v56  ;;  %v2735_v25 = vshll.u32 %v2679_v43, 16  ;;  %v2683_v63 = vld [vmem:[#allocation3 + $0x28] sm:$0xf] }
 0x252   : > { %v2710_v62 = vor.u32 %v2709_v21, %v2706_v41  ;;  %v2746_v31 = vshrl.u32 %v2681_v61, 16  ;;  %v2715_v0 = vrot.slane %v2713_v53, 5  ;;  %v2723_v4 = vrot.slane %v2721_v58, 5  ;;  %v2682_v7 = vld [vmem:[#allocation3 + $0x24] sm:$0x1] }
 0x253   : > { %v2734_v5 = vrot.slane %v2732_v30, 4  ;;  %v2749_v55 = vshll.u32 %v2681_v61, 16  ;;  %v2737_v10 = vrot.slane %v2735_v25, 5  ;;  %v2684_v12 = vld [vmem:[#allocation3 + $0x2c] sm:$0x1]  ;;  %v2760_v15 = vshrl.u32 %v2683_v63, 16 }
 0x254   : > { %v2711_v9 = vrot.slane %v2710_v62, 4  ;;  %v2748_v13 = vrot.slane %v2746_v31, 4  ;;  %v2724_v17 = vor.u32 %v2723_v4, %v2720_v57  ;;  %v2727_v18 = vshll.u32 %v2678_v38, 16  ;;  %v2687_v60 = vld [vmem:[#allocation3 + $0x38] sm:$0xf] }
 0x255   : > { %v2751_v19 = vrot.slane %v2749_v55, 5  ;;  %v2763_v20 = vshll.u32 %v2683_v63, 16  ;;  %v2738_v22 = vor.u32 %v2737_v10, %v2734_v5  ;;  %v2755_v6 = vshll.u32 %v2682_v7, 16  ;;  %v2688_v40 = vld [vmem:[#allocation3 + $0x3c] sm:$0x1] }
 0x256   : > { %v2716_v24 = vsel %vm5539_vm0, %v2711_v9, %v2715_v0  ;;  %v2762_v59 = vrot.slane %v2760_v15, 4  ;;  %v2769_v2 = vshll.u32 %v2684_v12, 16  ;;  %v2725_v32 = vrot.slane %v2724_v17, 4  ;;  %v2919_v56 = vld [vmem:[#allocation3] sm:$0xe] }
 0x257   : > { %v5061_v26 = vld [vmem:[#allocation3 + $0x30] ss:$8 sps:$4 sm:$0xff]   ;;  %v4507_v27 = vcombine.low %v2702_v1, %v2716_v24  ;;  %v2752_v28 = vor.u32 %v2751_v19, %v2748_v13  ;;  %v2765_v3 = vrot.slane %v2763_v20, 5  ;;  %v2739_v34 = vrot.slane %v2738_v22, 4  ;;  %v2920_v41 = vld [vmem:[#allocation3 + $0x4] sm:$0x1] }
 0x258   : > { %v2685_v33 = vld [vmem:[#allocation3 + $0x30] sm:$0xf]  ;;  %4814 = vmatmul.mubr.msk.bf16.gmra.mrb[4].mxu1 %vm778_vm4, %v5061_v26  ;;  %v2729_v44 = vrot.slane %v2727_v18, 5  ;;  %v2743_v45 = vrot.slane %v2741_v37, 5  ;;  %v2788_v48 = vshrl.u32 %v2687_v60, 16  ;;  %v2757_v49 = vrot.slane %v2755_v6, 5 }
 0x259   : > { %v2753_v35 = vrot.slane %v2752_v28, 4  ;;  %v2766_v36 = vor.u32 %v2765_v3, %v2762_v59  ;;  %v2774_v39 = vshrl.u32 %v2685_v33, 16  ;;  %4819 = vmatprep.mubr.msk.bf16.mxu1 %vm778_vm4, %v4507_v27  ;;  %v2777_v47 = vshll.u32 %v2685_v33, 16  ;;  %v2686_v16 = vld [vmem:[#allocation3 + $0x34] sm:$0x1] }
 0x25a   : > { %v2771_v8 = vrot.slane %v2769_v2, 5  ;;  %v2730_v14 = vsel %vm5539_vm0, %v2725_v32, %v2729_v44  ;;  %v2790_v51 = vrot.slane %v2788_v48, 4  ;;  %v2791_v52 = vshll.u32 %v2687_v60, 16  ;;  %v2921_v37 = vld [vmem:[#allocation3 + $0x8] sm:$0xe] }
 0x25b   : > { %v2767_v11 = vrot.slane %v2766_v36, 4  ;;  %v2776_v29 = vrot.slane %v2774_v39, 4  ;;  %v2779_v50 = vrot.slane %v2777_v47, 5  ;;  %v2744_v53 = vsel %vm5539_vm0, %v2739_v34, %v2743_v45  ;;  %v2922_v61 = vld [vmem:[#allocation3 + $0xc] sm:$0x1] }
 0x25c   : > { %v2758_v43 = vsel %vm5539_vm0, %v2753_v35, %v2757_v49  ;;  %v2783_v58 = vshll.u32 %v2686_v16, 16  ;;  %v2793_v30 = vrot.slane %v2791_v52, 5  ;;  %v4508_v1 = vcombine.low %v2730_v14, %v2744_v53  ;;  %v4532_v38 = vld [vmem:[%s6157_s4 + $0xc] sm:$0xf]  ;;  %v2924_v12 = vld [vmem:[#allocation3 + $0x14] sm:$0x1] }
 0x25d   : > { %v2772_v54 = vsel %vm5539_vm0, %v2767_v11, %v2771_v8  ;;  %v2780_v57 = vor.u32 %v2779_v50, %v2776_v29  ;;  %v3010_v62 = vsel %vm2596_vm6, %v5907_v23, 0  ;;  %v2797_v31 = vshll.u32 %v2688_v40, 16  ;;  %v2923_v17 = vld [vmem:[#allocation3 + $0x10] sm:$0xe]  ;;  %v2929_v19 = vld [vmem:[#allocation3 + $0x28] sm:$0xe] }
 0x25e   : > { %v4509_v21 = vcombine.low %v2758_v43, %v2772_v54  ;;  %v2794_v63 = vor.u32 %v2793_v30, %v2790_v51  ;;  %v4515_v0 = vrot.slane %v2919_v56, 9  ;;  %v2953_v4 = vrot.slane %v2920_v41, 5  ;;  %v2930_v20 = vld [vmem:[#allocation3 + $0x2c] sm:$0x1]  ;;  %v2925_v22 = vld [vmem:[#allocation3 + $0x18] sm:$0xe] }
 0x25f   : > { %v2781_v25 = vrot.slane %v2780_v57, 4  ;;  %v4516_v5 = vrot.slane %v2921_v37, 9  ;;  %v2957_v7 = vrot.slane %v2922_v61, 5  ;;  %v2785_v55 = vrot.slane %v2783_v58, 5  ;;  %v2926_v6 = vld [vmem:[#allocation3 + $0x1c] sm:$0x1] }
 0x260   : > { %4820 = vmatmul.mubr.msk.bf16.vlgmr.msra.gmra.mrb[0].mxu1 %vm778_vm4, %v4508_v1  ;;  %v2795_v9 = vrot.slane %v2794_v63, 4  ;;  %v2799_v10 = vrot.slane %v2797_v31, 5  ;;  %v2954_v13 = vsel %vm5570_vm3, %v4515_v0, %v2953_v4  ;;  %v4517_v60 = vrot.slane %v2923_v17, 9  ;;  %v2927_v27 = vld [vmem:[#allocation3 + $0x20] sm:$0xe] }
 0x261   : > { %4828 = vmatpush3.bf16.msra.mxu1 %v3010_v62  ;;  %4823 = vmatprep.mubr.msk.bf16.mxu1 %vm778_vm4, %v4509_v21  ;;  %v2786_v23 = vsel %vm5539_vm0, %v2781_v25, %v2785_v55  ;;  %v2958_v15 = vsel %vm5570_vm3, %v4516_v5, %v2957_v7  ;;  %v2961_v26 = vrot.slane %v2924_v12, 5  ;;  %v2928_v28 = vld [vmem:[#allocation3 + $0x24] sm:$0x1]  ;;  %v4520_v3 = vrot.slane %v2929_v19, 9  ;;  %v2931_v44 = vld [vmem:[#allocation3 + $0x30] sm:$0xe] }
 0x262   : > { %4973 = vmatprep.subr.msk.bf16.mxu1 %vm2596_vm6, %v4532_v38  ;;  %v2800_v18 = vsel %vm5539_vm0, %v2795_v9, %v2799_v10  ;;  %v4524_v59 = vcombine.low %v2954_v13, %v2958_v15  ;;  %v2973_v2 = vrot.slane %v2930_v20, 5  ;;  %v4518_v32 = vrot.slane %v2925_v22, 9  ;;  %v2932_v45 = vld [vmem:[#allocation3 + $0x34] sm:$0x1]  ;;  %v2933_v8 = vld [vmem:[#allocation3 + $0x38] sm:$0xe] }
 0x263   : > { %v4510_v24 = vcombine.low %v2786_v23, %v2800_v18  ;;  %v2965_v33 = vrot.slane %v2926_v6, 5  ;;  %v4519_v34 = vrot.slane %v2927_v27, 9  ;;  %v2969_v35 = vrot.slane %v2928_v28, 5  ;;  %v2934_v16 = vld [vmem:[#allocation3 + $0x3c] sm:$0x1] }
 0x264   : > { %v2962_v36 = vsel %vm5570_vm3, %v4517_v60, %v2961_v26  ;;  %v2974_v39 = vsel %vm5570_vm3, %v4520_v3, %v2973_v2  ;;  %v3144_v49 = vsel %vm2596_vm6, %v4532_v38, 0  ;;  %v4521_v14 = vrot.slane %v2931_v44, 9  ;;  %v4541_v51 = vld [vmem:[%s6157_s4 + $0x10] sm:$0xf]  ;;  %v3237_v52 = vld [vmem:[#allocation3 + $0x10] sm:$0xf] }
 0x265   : > { %v2966_v47 = vsel %vm5570_vm3, %v4518_v32, %v2965_v33  ;;  %v2970_v11 = vsel %vm5570_vm3, %v4519_v34, %v2969_v35  ;;  %v2977_v50 = vrot.slane %v2932_v45, 5  ;;  %v4522_v53 = vrot.slane %v2933_v8, 9  ;;  %v3235_v40 = vld [vmem:[#allocation3 + $0x8] sm:$0xf]  ;;  %v3241_v37 = vld [vmem:[#allocation3 + $0x20] sm:$0xf] }
 0x266   : > { %v4525_v48 = vcombine.low %v2962_v36, %v2966_v47  ;;  %v4526_v29 = vcombine.low %v2970_v11, %v2974_v39  ;;  %v2981_v43 = vrot.slane %v2934_v16, 5  ;;  %v3266_v56 = vshrl.u32 %v3237_v52, 16  ;;  %v5062_v61 = vld [vmem:[#allocation3 + $0x8] ss:$8 sps:$4 sm:$0xff]   ;;  %v3236_v38 = vld [vmem:[#allocation3 + $0xc] sm:$0x1] }
 0x267   : > { %v2978_v54 = vsel %vm5570_vm3, %v4521_v14, %v2977_v50  ;;  %v3269_v41 = vshll.u32 %v3237_v52, 16  ;;  %v3252_v58 = vshrl.u32 %v3235_v40, 16  ;;  %v3255_v30 = vshll.u32 %v3235_v40, 16  ;;  %v3245_v63 = vld [vmem:[#allocation3 + $0x30] sm:$0xf] }
 0x268   : > { %4824 = vmatmul.mubr.msk.bf16.gmra.mrb[4].mxu1 %vm778_vm4, %v4510_v24  ;;  %v2982_v21 = vsel %vm5570_vm3, %v4522_v53, %v2981_v43  ;;  %v3268_v1 = vrot.slane %v3266_v56, 4  ;;  %v3294_v25 = vshrl.u32 %v3241_v37, 16  ;;  %v3238_v31 = vld [vmem:[#allocation3 + $0x14] sm:$0x1]  ;;  %v3239_v5 = vld [vmem:[#allocation3 + $0x18] sm:$0xf] }
 0x269   : > { %4829 = vmatprep.mubr.msk.bf16.mxu1 %vm778_vm4, %v4524_v59  ;;  %v4527_v57 = vcombine.low %v2978_v54, %v2982_v21  ;;  %v3271_v62 = vrot.slane %v3269_v41, 5  ;;  %v3254_v0 = vrot.slane %v3252_v58, 4  ;;  %v3257_v4 = vrot.slane %v3255_v30, 5  ;;  %v3243_v9 = vld [vmem:[#allocation3 + $0x28] sm:$0xf] }
 0x26a   : > { %v3297_v55 = vshll.u32 %v3241_v37, 16  ;;  %v5063_v23 = vld [vmem:[#allocation3 + $0x18] ss:$8 sps:$4 sm:$0xff]   ;;  %v3390_v10 = vsel %vm2596_vm6, %v4541_v51, 0  ;;  %v3261_v12 = vshll.u32 %v3236_v38, 16  ;;  %v3322_v13 = vshrl.u32 %v3245_v63, 16 }
 0x26b   : > { %v3272_v7 = vor.u32 %v3271_v62, %v3268_v1  ;;  %v3325_v15 = vshll.u32 %v3245_v63, 16  ;;  %v5064_v17 = vld [vmem:[#allocation3 + $0x28] ss:$8 sps:$4 sm:$0xff]   ;;  %v3275_v18 = vshll.u32 %v3238_v31, 16  ;;  %v5984_v19 = vld [vmem:[%s6157_s4 + $0x14] sm:$0xf]  ;;  %v3258_v6 = vor.u32 %v3257_v4, %v3254_v0 }
 0x26c   : > { %v3280_v20 = vshrl.u32 %v3239_v5, 16  ;;  %v3283_v24 = vshll.u32 %v3239_v5, 16  ;;  %v3296_v22 = vrot.slane %v3294_v25, 4  ;;  %v3308_v59 = vshrl.u32 %v3243_v9, 16  ;;  %v3249_v2 = vld [vmem:[#allocation3 + $0x40] sm:$0xf] }
 0x26d   : > { %v3311_v60 = vshll.u32 %v3243_v9, 16  ;;  %v3273_v26 = vrot.slane %v3272_v7, 4  ;;  %v3299_v27 = vrot.slane %v3297_v55, 5  ;;  %v3324_v28 = vrot.slane %v3322_v13, 4  ;;  %v3242_v32 = vld [vmem:[#allocation3 + $0x24] sm:$0x1] }
 0x26e   : > { %v3327_v3 = vrot.slane %v3325_v15, 5  ;;  %v3282_v33 = vrot.slane %v3280_v20, 4  ;;  %v3285_v34 = vrot.slane %v3283_v24, 5  ;;  %v3259_v35 = vrot.slane %v3258_v6, 4  ;;  %v3247_v45 = vld [vmem:[#allocation3 + $0x38] sm:$0xf] }
 0x26f   : > { %v3277_v36 = vrot.slane %v3275_v18, 5  ;;  %v3310_v39 = vrot.slane %v3308_v59, 4  ;;  %v3313_v44 = vrot.slane %v3311_v60, 5  ;;  %v3240_v47 = vld [vmem:[#allocation3 + $0x1c] sm:$0x1]  ;;  %v3350_v11 = vshrl.u32 %v3249_v2, 16 }
 0x270   : > { %4830 = vmatmul.mubr.msk.bf16.vlgmr.msra.gmra.mrb[0].mxu1 %vm778_vm4, %v4525_v48  ;;  %v3300_v48 = vor.u32 %v3299_v27, %v3296_v22  ;;  %v3353_v8 = vshll.u32 %v3249_v2, 16  ;;  %v3263_v16 = vrot.slane %v3261_v12, 5  ;;  %v3328_v14 = vor.u32 %v3327_v3, %v3324_v28  ;;  %v3244_v52 = vld [vmem:[#allocation3 + $0x2c] sm:$0x1]  ;;  %v5065_v54 = vld [vmem:[#allocation3 + $0x38] ss:$8 sps:$4 sm:$0xff]  }
 0x271   : > { %4838 = vmatpush3.bf16.msra.mxu1 %v3144_v49  ;;  %4833 = vmatprep.mubr.msk.bf16.mxu1 %vm778_vm4, %v4526_v29  ;;  %v3246_v49 = vld [vmem:[#allocation3 + $0x34] sm:$0x1]  ;;  %v3278_v29 = vsel %vm5539_vm0, %v3273_v26, %v3277_v36  ;;  %v3286_v50 = vor.u32 %v3285_v34, %v3282_v33  ;;  %v3336_v53 = vshrl.u32 %v3247_v45, 16  ;;  %v3339_v43 = vshll.u32 %v3247_v45, 16  ;;  %v3250_v4 = vld [vmem:[#allocation3 + $0x44] sm:$0x1] }
 0x272   : > { %4974 = vmatprep.subr.msk.bf16.mxu1 %vm2596_vm6, %v4541_v51  ;;  %v3303_v51 = vshll.u32 %v3242_v32, 16  ;;  %v3264_v40 = vsel %vm5539_vm0, %v3259_v35, %v3263_v16  ;;  %v3289_v56 = vshll.u32 %v3240_v47, 16  ;;  %v3314_v41 = vor.u32 %v3313_v44, %v3310_v39  ;;  %v3484_v18 = vld [vmem:[#allocation3 + $0x14] sm:$0x1]  ;;  %v4567_v6 = vld [vmem:[%s6157_s4 + $0x18] sm:$0xf] }
 0x273   : > { %v3331_v21 = vshll.u32 %v3246_v49, 16  ;;  %v3301_v58 = vrot.slane %v3300_v48, 4  ;;  %v3352_v30 = vrot.slane %v3350_v11, 4  ;;  %v3355_v37 = vrot.slane %v3353_v8, 5  ;;  %v3481_v27 = vld [vmem:[#allocation3 + $0x8] sm:$0xe] }
 0x274   : > { %v3329_v1 = vrot.slane %v3328_v14, 4  ;;  %v3287_v62 = vrot.slane %v3286_v50, 4  ;;  %v3305_v38 = vrot.slane %v3303_v51, 5  ;;  %v3338_v25 = vrot.slane %v3336_v53, 4  ;;  %v3482_v28 = vld [vmem:[#allocation3 + $0xc] sm:$0x1] }
 0x275   : > { %v3341_v63 = vrot.slane %v3339_v43, 5  ;;  %v3315_v31 = vrot.slane %v3314_v41, 4  ;;  %v3333_v0 = vrot.slane %v3331_v21, 5  ;;  %v3291_v5 = vrot.slane %v3289_v56, 5  ;;  %v3487_v44 = vld [vmem:[#allocation3 + $0x20] sm:$0xe] }
 0x276   : > { %v3306_v7 = vsel %vm5539_vm0, %v3301_v58, %v3305_v38  ;;  %v3356_v55 = vor.u32 %v3355_v37, %v3352_v30  ;;  %v3359_v15 = vshll.u32 %v3250_v4, 16  ;;  %v3572_v24 = vsel %vm2596_vm6, %v5984_v19, 0  ;;  %v3488_v45 = vld [vmem:[#allocation3 + $0x24] sm:$0x1]  ;;  %v3491_v48 = vld [vmem:[#allocation3 + $0x30] sm:$0xe] }
 0x277   : > { %v3292_v12 = vsel %vm5539_vm0, %v3287_v62, %v3291_v5  ;;  %v3342_v13 = vor.u32 %v3341_v63, %v3338_v25  ;;  %v3519_v2 = vrot.slane %v3484_v18, 5  ;;  %v4550_v33 = vrot.slane %v3481_v27, 9  ;;  %v3492_v49 = vld [vmem:[#allocation3 + $0x34] sm:$0x1]  ;;  %v3485_v16 = vld [vmem:[#allocation3 + $0x18] sm:$0xe] }
 0x278   : > { %4834 = vmatmul.mubr.msk.bf16.gmra.mrb[4].mxu1 %vm778_vm4, %v4527_v57  ;;  %v4542_v57 = vcombine.low %v3264_v40, %v3278_v29  ;;  %v4543_v20 = vcombine.low %v3292_v12, %v3306_v7  ;;  %v3357_v26 = vrot.slane %v3356_v55, 4  ;;  %v3361_v32 = vrot.slane %v3359_v15, 5  ;;  %v3486_v29 = vld [vmem:[#allocation3 + $0x1c] sm:$0x1]  ;;  %v3490_v53 = vld [vmem:[#allocation3 + $0x2c] sm:$0x1] }
 0x279   : > { %4839 = vmatprep.mubr.msk.bf16.mxu1 %vm778_vm4, %v5062_v61  ;;  %v3317_v61 = vshll.u32 %v3244_v52, 16  ;;  %v3515_v34 = vrot.slane %v3482_v28, 5  ;;  %v4553_v50 = vrot.slane %v3487_v44, 9  ;;  %v3527_v51 = vrot.slane %v3488_v45, 5  ;;  %v3489_v52 = vld [vmem:[#allocation3 + $0x28] sm:$0xe] }
 0x27a   : > { %v3362_v36 = vsel %vm5539_vm0, %v3357_v26, %v3361_v32  ;;  %v4555_v43 = vrot.slane %v3491_v48, 9  ;;  %v4552_v40 = vrot.slane %v3485_v16, 9  ;;  %v3523_v56 = vrot.slane %v3486_v29, 5  ;;  %v3495_v30 = vld [vmem:[#allocation3 + $0x40] sm:$0xe] }
 0x27b   : > { %v3319_v9 = vrot.slane %v3317_v61, 5  ;;  %v3516_v8 = vsel %vm5570_vm3, %v4550_v33, %v3515_v34  ;;  %v4554_v41 = vrot.slane %v3489_v52, 9  ;;  %v3531_v21 = vrot.slane %v3490_v53, 5  ;;  %v3496_v37 = vld [vmem:[#allocation3 + $0x44] sm:$0x1] }
 0x27c   : > { %v3524_v61 = vsel %vm5570_vm3, %v4552_v40, %v3523_v56  ;;  %v3707_v62 = vsel %vm2596_vm6, %v4567_v6, 0  ;;  %v3493_v25 = vld [vmem:[#allocation3 + $0x38] sm:$0xe]  ;;  %v3494_v63 = vld [vmem:[#allocation3 + $0x3c] sm:$0x1]  ;;  %v3543_v4 = vrot.slane %v3496_v37, 5 }
 0x27d   : > { %v3320_v22 = vsel %vm5539_vm0, %v3315_v31, %v3319_v9  ;;  %v3532_v38 = vsel %vm5570_vm3, %v4554_v41, %v3531_v21  ;;  %v4576_v5 = vld [vmem:[%s6157_s4 + $0x1c] sm:$0xf]  ;;  %v4556_v7 = vrot.slane %v3493_v25, 9  ;;  %v3539_v55 = vrot.slane %v3494_v63, 5  ;;  %v3798_v9 = vld [vmem:[#allocation3 + $0x10] sm:$0xf] }
 0x27e   : > { %v3815_v12 = vshrl.u32 %v3798_v9, 16  ;;  %v3802_v28 = vld [vmem:[#allocation3 + $0x20] sm:$0xf]  ;;  %v3808_v32 = vld [vmem:[#allocation3 + $0x38] sm:$0xf] }
 0x27f   : > { %v3540_v15 = vsel %vm5570_vm3, %v4556_v7, %v3539_v55  ;;  %v3801_v44 = vld [vmem:[#allocation3 + $0x1c] sm:$0x1]  ;;  %v3843_v45 = vshrl.u32 %v3802_v28, 16  ;;  %v5067_v48 = vld [vmem:[#allocation3 + $0x20] ss:$8 sps:$4 sm:$0xff]   ;;  %v3888_v16 = vshll.u32 %v3808_v32, 16 }
 0x280   : > { %4840 = vmatmul.mubr.msk.bf16.vlgmr.msra.gmra.mrb[0].mxu1 %vm778_vm4, %v5063_v23  ;;  %v3334_v23 = vsel %vm5539_vm0, %v3329_v1, %v3333_v0  ;;  %v4557_v0 = vrot.slane %v3495_v30, 9  ;;  %v5068_v29 = vld [vmem:[#allocation3 + $0x30] ss:$8 sps:$4 sm:$0xff]   ;;  %v3838_v53 = vshll.u32 %v3801_v44, 16  ;;  %v3810_v40 = vld [vmem:[#allocation3 + $0x40] sm:$0xf] }
 0x281   : > { %4848 = vmatpush3.bf16.msra.mxu1 %v3390_v10  ;;  %4843 = vmatprep.mubr.msk.bf16.mxu1 %vm778_vm4, %v5064_v17  ;;  %v3248_v10 = vld [vmem:[#allocation3 + $0x3c] sm:$0x1]  ;;  %v3483_v17 = vld [vmem:[#allocation3 + $0x10] sm:$0xe]  ;;  %v4544_v59 = vcombine.low %v3320_v22, %v3334_v23  ;;  %v3817_v22 = vrot.slane %v3815_v12, 4  ;;  %v3845_v56 = vrot.slane %v3843_v45, 4 }
 0x282   : > { %4975 = vmatprep.subr.msk.bf16.mxu1 %vm2596_vm6, %v5984_v19  ;;  %v3345_v60 = vshll.u32 %v3248_v10, 16  ;;  %v4551_v3 = vrot.slane %v3483_v17, 9  ;;  %v3343_v19 = vrot.slane %v3342_v13, 4  ;;  %v3544_v23 = vsel %vm5570_vm3, %v4557_v0, %v3543_v4  ;;  %v3800_v10 = vld [vmem:[#allocation3 + $0x18] sm:$0xf] }
 0x283   : > { %v3818_v13 = vshll.u32 %v3798_v9, 16  ;;  %v4562_v17 = vcombine.low %v3540_v15, %v3544_v23  ;;  %v3829_v18 = vshrl.u32 %v3800_v10, 16  ;;  %v3805_v37 = vld [vmem:[#allocation3 + $0x2c] sm:$0x1]  ;;  %v3807_v25 = vld [vmem:[#allocation3 + $0x34] sm:$0x1] }
 0x284   : > { %v3347_v35 = vrot.slane %v3345_v60, 5  ;;  %v3520_v39 = vsel %vm5570_vm3, %v4551_v3, %v3519_v2  ;;  %v3806_v60 = vld [vmem:[#allocation3 + $0x30] sm:$0xf]  ;;  %v3799_v3 = vld [vmem:[#allocation3 + $0x14] sm:$0x1]  ;;  %v3899_v63 = vshrl.u32 %v3810_v40, 16 }
 0x285   : > { %v4559_v14 = vcombine.low %v3516_v8, %v3520_v39  ;;  %v3831_v26 = vrot.slane %v3829_v18, 4  ;;  %v3871_v34 = vshrl.u32 %v3806_v60, 16  ;;  %v3953_v39 = vsel %vm2596_vm6, %v4576_v5, 0  ;;  %v3809_v9 = vld [vmem:[#allocation3 + $0x3c] sm:$0x1] }
 0x286   : > { %v3348_v47 = vsel %vm5539_vm0, %v3343_v19, %v3347_v35  ;;  %v3874_v35 = vshll.u32 %v3806_v60, 16  ;;  %v3885_v8 = vshrl.u32 %v3808_v32, 16  ;;  %v3840_v4 = vrot.slane %v3838_v53, 5  ;;  %v5069_v12 = vld [vmem:[#allocation3 + $0x40] ss:$8 sps:$4 sm:$0xff]  }
 0x287   : > { %v4545_v11 = vcombine.low %v3348_v47, %v3362_v36  ;;  %v3812_v36 = vld [vmem:[#allocation3 + $0x48] sm:$0xf]  ;;  %v3846_v47 = vshll.u32 %v3802_v28, 16  ;;  %v3866_v55 = vshll.u32 %v3805_v37, 16  ;;  %v4046_v53 = vld [vmem:[#allocation3 + $0x18] sm:$0xe] }
 0x288   : > { %4844 = vmatmul.mubr.msk.bf16.gmra.mrb[4].mxu1 %vm778_vm4, %v5065_v54  ;;  %v3535_v54 = vrot.slane %v3492_v49, 5  ;;  %v3824_v49 = vshll.u32 %v3799_v3, 16  ;;  %v3913_v21 = vshrl.u32 %v3812_v36, 16  ;;  %v4051_v37 = vld [vmem:[#allocation3 + $0x2c] sm:$0x1] }
 0x289   : > { %4849 = vmatprep.mubr.msk.bf16.mxu1 %vm778_vm4, %v4542_v57  ;;  %v3528_v57 = vsel %vm5570_vm3, %v4553_v50, %v3527_v51  ;;  %v3848_v41 = vrot.slane %v3846_v47, 5  ;;  %v3868_v28 = vrot.slane %v3866_v55, 5 }
 0x28a   : > { %v3536_v58 = vsel %vm5570_vm3, %v4555_v43, %v3535_v54  ;;  %v4560_v1 = vcombine.low %v3524_v61, %v3528_v57  ;;  %v3873_v43 = vrot.slane %v3871_v34, 4  ;;  %v3876_v54 = vrot.slane %v3874_v35, 5 }
 0x28b   : > { %v4561_v31 = vcombine.low %v3532_v38, %v3536_v58  ;;  %v3916_v57 = vshll.u32 %v3812_v36, 16  ;;  %v3826_v58 = vrot.slane %v3824_v49, 5  ;;  %v3887_v61 = vrot.slane %v3885_v8, 4  ;;  %v4045_v49 = vld [vmem:[#allocation3 + $0x14] sm:$0x1] }
 0x28c   : > { %v3849_v7 = vor.u32 %v3848_v41, %v3845_v56  ;;  %v3915_v23 = vrot.slane %v3913_v21, 4  ;;  %v4586_v41 = vrot.slane %v4046_v53, 9 }
 0x290   : > { %4850 = vmatmul.mubr.msk.bf16.vlgmr.msra.gmra.mrb[0].mxu1 %vm778_vm4, %v4543_v20  ;;  %v3832_v20 = vshll.u32 %v3800_v10, 16  ;;  %v3918_v10 = vrot.slane %v3916_v57, 5 }
 0x291   : > { %4858 = vmatpush3.bf16.msra.mxu1 %v3572_v24  ;;  %4853 = vmatprep.mubr.msk.bf16.mxu1 %vm778_vm4, %v4544_v59  ;;  %v5066_v24 = vld [vmem:[#allocation3 + $0x10] ss:$8 sps:$4 sm:$0xff]   ;;  %v3804_v59 = vld [vmem:[#allocation3 + $0x28] sm:$0xf] }
 0x292   : > { %4976 = vmatprep.subr.msk.bf16.mxu1 %vm2596_vm6, %v4567_v6  ;;  %v3820_v6 = vrot.slane %v3818_v13, 5  ;;  %v3834_v27 = vrot.slane %v3832_v20, 5  ;;  %v3857_v2 = vshrl.u32 %v3804_v59, 16  ;;  %v3860_v19 = vshll.u32 %v3804_v59, 16 }
 0x293   : > { %v3919_v36 = vor.u32 %v3918_v10, %v3915_v23 }
 0x294   : > { %v3821_v33 = vor.u32 %v3820_v6, %v3817_v22  ;;  %v3859_v50 = vrot.slane %v3857_v2, 4  ;;  %v3862_v51 = vrot.slane %v3860_v19, 5  ;;  %v3813_v22 = vld [vmem:[#allocation3 + $0x4c] sm:$0x1]  ;;  %v3901_v6 = vrot.slane %v3899_v63, 4 }
 0x295   : > { %v3811_v19 = vld [vmem:[#allocation3 + $0x44] sm:$0x1]  ;;  %v3922_v32 = vshll.u32 %v3813_v22, 16 }
 0x296   : > { %v3822_v52 = vrot.slane %v3821_v33, 4  ;;  %v3863_v38 = vor.u32 %v3862_v51, %v3859_v50  ;;  %v3908_v47 = vshll.u32 %v3811_v19, 16  ;;  %v4049_v63 = vld [vmem:[#allocation3 + $0x24] sm:$0x1] }
 0x297   : > { %v4086_v23 = vrot.slane %v4049_v63, 5 }
 0x298   : > { %4854 = vmatmul.mubr.msk.bf16.gmra.mrb[4].mxu1 %vm778_vm4, %v4545_v11  ;;  %v3835_v11 = vor.u32 %v3834_v27, %v3831_v26  ;;  %v3827_v0 = vsel %vm5539_vm0, %v3822_v52, %v3826_v58  ;;  %v3894_v26 = vshll.u32 %v3809_v9, 16  ;;  %v3850_v27 = vrot.slane %v3849_v7, 4  ;;  %v4055_v7 = vld [vmem:[#allocation3 + $0x3c] sm:$0x1] }
 0x299   : > { %4859 = vmatprep.mubr.msk.bf16.mxu1 %vm778_vm4, %v4559_v14  ;;  %v6047_v14 = vld [vmem:[%s6157_s4 + $0x20] sm:$0xf]  ;;  %v3920_v52 = vrot.slane %v3919_v36, 4  ;;  %v3910_v56 = vrot.slane %v3908_v47, 5 }
 0x29a   : > { %v3836_v30 = vrot.slane %v3835_v11, 4  ;;  %v3896_v44 = vrot.slane %v3894_v26, 5  ;;  %v4135_v8 = vsel %vm2596_vm6, %v6047_v14, 0 }
 0x29c   : > { %v3841_v13 = vsel %vm5539_vm0, %v3836_v30, %v3840_v4  ;;  %v4050_v30 = vld [vmem:[#allocation3 + $0x28] sm:$0xe]  ;;  %v4090_v4 = vrot.slane %v4051_v37, 5 }
 0x29d   : > { %v4577_v20 = vcombine.low %v3827_v0, %v3841_v13  ;;  %v4588_v0 = vrot.slane %v4050_v30, 9 }
 0x29f   : > { %v4091_v13 = vsel %vm5570_vm3, %v4588_v0, %v4090_v4 }
 0x2a0   : > { %4860 = vmatmul.mubr.msk.bf16.vlgmr.msra.gmra.mrb[0].mxu1 %vm778_vm4, %v4560_v1  ;;  %v3890_v1 = vrot.slane %v3888_v16, 5 }
 0x2a1   : > { %4868 = vmatpush3.bf16.msra.mxu1 %v3707_v62  ;;  %4863 = vmatprep.mubr.msk.bf16.mxu1 %vm778_vm4, %v4561_v31  ;;  %v3803_v62 = vld [vmem:[#allocation3 + $0x24] sm:$0x1]  ;;  %v3902_v31 = vshll.u32 %v3810_v40, 16  ;;  %v4078_v40 = vrot.slane %v4045_v49, 5 }
 0x2a2   : > { %4977 = vmatprep.subr.msk.bf16.mxu1 %vm2596_vm6, %v4576_v5  ;;  %v3877_v5 = vor.u32 %v3876_v54, %v3873_v43  ;;  %v3852_v15 = vshll.u32 %v3803_v62, 16  ;;  %v3891_v18 = vor.u32 %v3890_v1, %v3887_v61  ;;  %v4047_v43 = vld [vmem:[#allocation3 + $0x1c] sm:$0x1]  ;;  %v4052_v61 = vld [vmem:[#allocation3 + $0x30] sm:$0xe] }
 0x2a3   : > { %v3904_v59 = vrot.slane %v3902_v31, 5  ;;  %v4082_v21 = vrot.slane %v4047_v43, 5  ;;  %v4053_v1 = vld [vmem:[#allocation3 + $0x34] sm:$0x1]  ;;  %v4589_v46 = vrot.slane %v4052_v61, 9 }
 0x2a4   : > { %v3878_v60 = vrot.slane %v3877_v5, 4  ;;  %v3892_v2 = vrot.slane %v3891_v18, 4  ;;  %v3854_v33 = vrot.slane %v3852_v15, 5  ;;  %v4054_v5 = vld [vmem:[#allocation3 + $0x38] sm:$0xe]  ;;  %v4094_v55 = vrot.slane %v4053_v1, 5 }
 0x2a5   : > { %v3905_v35 = vor.u32 %v3904_v59, %v3901_v6  ;;  %v4590_v10 = vrot.slane %v4054_v5, 9  ;;  %v4058_v15 = vld [vmem:[#allocation3 + $0x48] sm:$0xe]  ;;  %v4056_v18 = vld [vmem:[#allocation3 + $0x40] sm:$0xe] }
 0x2a6   : > { %v3855_v45 = vsel %vm5539_vm0, %v3850_v27, %v3854_v33  ;;  %v3897_v16 = vsel %vm5539_vm0, %v3892_v2, %v3896_v44  ;;  %v4591_v27 = vrot.slane %v4056_v18, 9  ;;  %v4602_v33 = vld [vmem:[%s6158_s5] ss:$0 sm:$0xff] }
 0x2a7   : > { %v3906_v51 = vrot.slane %v3905_v35, 4  ;;  %v4603_v35 = vld [vmem:[%s6159_s6] ss:$0 sm:$0xff] }
 0x2a8   : > { %4864 = vmatmul.mubr.msk.bf16.gmra.mrb[4].mxu1 %vm778_vm4, %v4562_v17  ;;  %v3880_v17 = vshll.u32 %v3807_v25, 16  ;;  %v4048_v25 = vld [vmem:[#allocation3 + $0x20] sm:$0xe] }
 0x2a9   : > { %4869 = vmatprep.mubr.msk.bf16.mxu1 %vm778_vm4, %v5066_v24  ;;  %v3864_v24 = vrot.slane %v3863_v38, 4  ;;  %v4083_v38 = vsel %vm5570_vm3, %v4586_v41, %v4082_v21  ;;  %v4587_v9 = vrot.slane %v4048_v25, 9 }
 0x2aa   : > { %v3882_v3 = vrot.slane %v3880_v17, 5  ;;  %v4095_v17 = vsel %vm5570_vm3, %v4589_v46, %v4094_v55 }
 0x2ab   : > { %v3869_v34 = vsel %vm5539_vm0, %v3864_v24, %v3868_v28  ;;  %v4059_v24 = vld [vmem:[#allocation3 + $0x4c] sm:$0x1]  ;;  %v4087_v22 = vsel %vm5570_vm3, %v4587_v9, %v4086_v23 }
 0x2ac   : > { %v4578_v11 = vcombine.low %v3855_v45, %v3869_v34  ;;  %v4595_v6 = vcombine.low %v4087_v22, %v4091_v13 }
 0x2b0   : > { %4870 = vmatmul.mubr.msk.bf16.vlgmr.msra.gmra.mrb[0].mxu1 %vm778_vm4, %v5067_v48  ;;  %v4044_v48 = vld [vmem:[#allocation3 + $0x10] sm:$0xe] }
 0x2b1   : > { %4878 = vmatpush3.bf16.msra.mxu1 %v3953_v39  ;;  %4873 = vmatprep.mubr.msk.bf16.mxu1 %vm778_vm4, %v5068_v29  ;;  %v3883_v39 = vsel %vm5539_vm0, %v3878_v60, %v3882_v3  ;;  %v3924_v29 = vrot.slane %v3922_v32, 5  ;;  %v4585_v54 = vrot.slane %v4044_v48, 9  ;;  %v4592_v60 = vrot.slane %v4058_v15, 9 }
 0x2b2   : > { %4978 = vmatprep.subr.msk.bf16.mxu1 %vm2596_vm6, %v6047_v14  ;;  %v4579_v50 = vcombine.low %v3883_v39, %v3897_v16  ;;  %v3911_v14 = vsel %vm5539_vm0, %v3906_v51, %v3910_v56  ;;  %v4106_v3 = vrot.slane %v4059_v24, 5 }
 0x2b3   : > { %v3925_v57 = vsel %vm5539_vm0, %v3920_v52, %v3924_v29  ;;  %v4079_v58 = vsel %vm5570_vm3, %v4585_v54, %v4078_v40 }
 0x2b4   : > { %v4580_v62 = vcombine.low %v3911_v14, %v3925_v57  ;;  %v4594_v31 = vcombine.low %v4079_v58, %v4083_v38  ;;  %v4107_v19 = vsel %vm5570_vm3, %v4592_v60, %v4106_v3 }
 0x2b8   : > { %4874 = vmatmul.mubr.msk.bf16.gmra.mrb[4].mxu1 %vm778_vm4, %v5069_v12  ;;  %v4098_v12 = vrot.slane %v4055_v7, 5 }
 0x2b9   : > { %4879 = vmatprep.mubr.msk.bf16.mxu1 %vm778_vm4, %v4577_v20  ;;  %v4057_v20 = vld [vmem:[#allocation3 + $0x44] sm:$0x1] }
 0x2ba   : > { %v4099_v59 = vsel %vm5570_vm3, %v4590_v10, %v4098_v12  ;;  %v4102_v28 = vrot.slane %v4057_v20, 5 }
 0x2bb   : > { %v4596_v26 = vcombine.low %v4095_v17, %v4099_v59 }
 0x2bc   : > { %v4103_v2 = vsel %vm5570_vm3, %v4591_v27, %v4102_v28 }
 0x2bd   : > { %v4597_v32 = vcombine.low %v4103_v2, %v4107_v19 }
 0x2c0   : > { %4880 = vmatmul.mubr.msk.bf16.vlgmr.msra.gmra.mrb[0].mxu1 %vm778_vm4, %v4578_v11 }
 0x2c1   : > { %4888 = vmatpush3.bf16.msra.mxu1 %v4135_v8  ;;  %4883 = vmatprep.mubr.msk.bf16.mxu1 %vm778_vm4, %v4579_v50 }
 0x2c8   : > { %4884 = vmatmul.mubr.msk.bf16.gmra.mrb[4].mxu1 %vm778_vm4, %v4580_v62 }
 0x2c9   : > { %4889 = vmatprep.mubr.msk.bf16.mxu1 %vm778_vm4, %v4594_v31 }
 0x2d0   : > { %4890 = vmatmul.mubr.msk.bf16.vlgmr.msra.gmra.mrb[0].mxu1 %vm778_vm4, %v4595_v6 }
 0x2d1   : > { %4893 = vmatprep.mubr.msk.bf16.mxu1 %vm778_vm4, %v4596_v26 }
 0x2d8   : > { %4894 = vmatmul.mubr.msk.bf16.gmra.mrb[4].mxu1 %vm778_vm4, %v4597_v32 }
 0x3a3   : > { %v4891_v34 = vpop.f32.mrb[0].mxu1 }
 0x3a4   : > { %v4243_v36 = vmul.f32 %v4891_v34, %v4602_v33  ;;  %v4171_v39 = vpop.f32.mrb[1].mxu1 }
 0x3a5   : > { %v4241_v44 = vmul.f32 %v4602_v33, %v4171_v39  ;;  %v4892_v45 = vpop.f32.mrb[2].mxu1 }
 0x3a6   : > { %v4258_v47 = vadd.f32 %v4603_v35, %v4243_v36  ;;  %v4244_v42 = vmul.f32 %v4892_v45, %v4602_v33  ;;  %v4174_v48 = vpop.f32.mrb[3].mxu1 }
 0x3a7   : > { %v4256_v49 = vadd.f32 %v4603_v35, %v4241_v44  ;;  %v4242_v11 = vmul.f32 %v4602_v33, %v4174_v48 }
 0x3a8   : > { %v4266_v8 = vmax.f32 %v4258_v47, 0.0  ;;  %v4259_v16 = vadd.f32 %v4603_v35, %v4244_v42 }
 0x3a9   : > { %v4264_v29 = vmax.f32 %v4256_v49, 0.0  ;;  %v4257_v50 = vadd.f32 %v4603_v35, %v4242_v11 }
 0x3aa   : > { %4274 = vst [vmem:[%s296_s9 + $0x10] sm:$0xff] %v4266_v8  ;;  %v4267_v51 = vmax.f32 %v4259_v16, 0.0 }
 0x3ab   : > { %4272 = vst [vmem:[%s296_s9] sm:$0xff] %v4264_v29  ;;  %v4265_v52 = vmax.f32 %v4257_v50, 0.0  ;;  %v4895_v53 = vpop.f32.mrb[4].mxu1 }
 0x3ac   : > { %4275 = vst [vmem:[%s296_s9 + $0x18] sm:$0xff] %v4267_v51  ;;  %v4247_v43 = vmul.f32 %v4895_v53, %v4602_v33  ;;  %v4187_v54 = vpop.f32.mrb[5].mxu1 }
 0x3ad   : > { %4273 = vst [vmem:[%s296_s9 + $0x8] sm:$0xff] %v4265_v52  ;;  %v4245_v40 = vmul.f32 %v4602_v33, %v4187_v54  ;;  %v4896_v56 = vpop.f32.mrb[6].mxu1 }
 0x3ae   : > { %v4262_v41 = vadd.f32 %v4603_v35, %v4247_v43  ;;  %v4248_v21 = vmul.f32 %v4896_v56, %v4602_v33  ;;  %v4190_v14 = vpop.f32.mrb[7].mxu1 }
 0x3af   : > { %v4260_v57 = vadd.f32 %v4603_v35, %v4245_v40  ;;  %v4246_v58 = vmul.f32 %v4602_v33, %v4190_v14 }
 0x3b0   : > { %v4270_v30 = vmax.f32 %v4262_v41, 0.0  ;;  %v4263_v37 = vadd.f32 %v4603_v35, %v4248_v21 }
 0x3b1   : > { %v4268_v61 = vmax.f32 %v4260_v57, 0.0  ;;  %v4261_v1 = vadd.f32 %v4603_v35, %v4246_v58 }
 0x3b2   : > { %4278 = vst [vmem:[%s296_s9 + $0x30] sm:$0xff] %v4270_v30  ;;  %v4271_v62 = vmax.f32 %v4263_v37, 0.0 }
 0x3b3   : > { %4276 = vst [vmem:[%s296_s9 + $0x20] sm:$0xff] %v4268_v61  ;;  %v4269_v38 = vmax.f32 %v4261_v1, 0.0 }
 0x3b4   : > { %4279 = vst [vmem:[%s296_s9 + $0x38] sm:$0xff] %v4271_v62 }
 0x3b5   : > { %4277 = vst [vmem:[%s296_s9 + $0x28] sm:$0xff] %v4269_v38 }
 0x3b6   : > { %5113 = shalt.err (!%p5110_p2)
}
 0x3b7   : > { %s5114_s29 = scalar_lea.hbm %s6109_s15, 1024  ;;  %s5118_s9 = scalar_lea.hbm %s6160_s7, 2048 }
 0x3b8   : > { %p5115_p4 = scmp.ne.s32.totalorder %s6109_s15, %s5114_s29  ;;  %p5119_p9 = scmp.lt.u32.totalorder %s6109_s15, %s6160_s7 }
 0x3b9   : > { %p5120_p1 = scmp.lt.u32.totalorder %s5118_s9, %s5114_s29  ;;  %p5122_p6 = scmp.lt.u32.totalorder %s5114_s29, %s6109_s15 }
 0x3ba   : > { %p5116_p5 = pnand %p5115_p4, %p6183_p11 }
 0x3bb   : > { %p5121_p3 = por %p5120_p1, %p5119_p9 }
 0x3bc   : > { %p5117_p7 = pneg %p5116_p5 }
 0x3bd   : > { %p5123_p12 = por %p5122_p6, %p5121_p3 }
 0x3bf   : > { %p5124_p13 = pnand %p5123_p12, %p5117_p7 }
 0x3c1   : > { %5127 = shalt.err (!%p5124_p13)
}
 0x3c2   : > { %s5174_s18 = smov 128   ;;  %s5175_s12 = smov 8  }
 0x3c3   : > { %4981 = dma.vmem_to_hbm [thread:$0]  (%p6183_p11), %s6104_s8, 1024, %s6109_s15, %s4281_s28, %s5174_s18, %s5174_s18, %s5175_s12  }
 0x3c4 PF: > { %s4309_s20 = sand.u32 1, %s5154_s24   ;;  %p6184_p8 = scmp.ne.s32.totalorder %s6165_s14, 0 }
 0x3c5   : > { %p6185_p10 = scmp.ge.s32.totalorder %s5166_s27, 2  ;;  %s4310_s22 = scalar_lea.sflag [#allocation8], %s4309_s20 }
 0x3c7   : > { %p4988_p0 = pnand %p6185_p10, %p6184_p8 }
 0x3c9   : > { %5149 = dma.done.wait (!%p4988_p0), %s4310_s22, 1024  }
 0x3ca   : > { %5151 = vsyncadd (!%p4988_p0), %s4310_s22, 4294966272  ;;  %p20_p2 = scmp.ge.s32.totalorder %s5241_s30, 4   ;;  %s6186_s24 = smov %s5158_s25 }
 0x3cb   : > { %s6187_s25 = smov %s5162_s26  ;;  %s6188_s26 = smov %s5253_s10 }
 0x3cc   : > { %s6189_s27 = smov %s5241_s30  ;;  %22 = sbr.rel (!%p20_p2) target bundleno = 5 (0x5), region = 115 }
 0x3d3   :  { %4315 = vsyncpa [#allocation7], 1 }
 0x3d4   :  { %4317 = vsyncpa [#allocation7 + $0x1], 1 }
 0x3d5   :  { %4318 = vsyncpa [#allocation8], 1 }
 0x3d6   :  { %4320 = vsyncpa [#allocation8 + $0x1], 1 }

</bundles_post_ra>
